<compile_context>
chip_gen: v6e
topology: v6e:2x2x1
jax: 0.10.0
libtpu: 0.0.40
codegen_flags: <defaults>
</compile_context>

<pallas_src>
import functools
import math

import numpy as np
import jax
import jax.numpy as jnp
from jax import lax
from jax.experimental import pallas as pl
from jax.experimental.pallas import tpu as pltpu


_VMEM_BIG = 48 * 1024 * 1024      # explicit scoped-VMEM budget (v7x headroom)
_VMEM_SMALL = 32 * 1024 * 1024


# ----------------------------------------------------------------------------
# Small shared helpers (used *inside* kernels)
# ----------------------------------------------------------------------------
def _ln(x, g, b):
    """LayerNorm over the last axis (f32)."""
    mu = jnp.mean(x, axis=-1, keepdims=True)
    var = jnp.mean((x - mu) ** 2, axis=-1, keepdims=True)
    return (x - mu) * lax.rsqrt(var + 1e-5) * g + b


def _masked_softmax(s, m):
    s = jnp.where(m > 0.5, s, -1e9)
    s = s - jnp.max(s, axis=-1, keepdims=True)
    p = jnp.exp(s)
    return p * pl.reciprocal(jnp.sum(p, axis=-1, keepdims=True), approx=True)


def _pwam_attn(vis, kv, m, wq, bq, wo, bo, cout, scale):
    """Pixel-word attention: vis queries attend to masked language tokens.
    kv:(L, 2*Cout) is the PRE-PROJECTED (hoisted) language K/V."""
    q = (jnp.dot(vis.astype(jnp.bfloat16), wq,
                 preferred_element_type=jnp.float32) + bq) * scale
    k = kv[:, :cout]
    v = kv[:, cout:]
    s = lax.dot_general(q.astype(jnp.bfloat16), k.astype(jnp.bfloat16),
                        (((1,), (1,)), ((), ())),
                        preferred_element_type=jnp.float32)
    p = _masked_softmax(s, m)
    a = jnp.dot(p.astype(jnp.bfloat16), v.astype(jnp.bfloat16),
                preferred_element_type=jnp.float32)
    return jnp.dot(a.astype(jnp.bfloat16), wo,
                   preferred_element_type=jnp.float32) + bo


def _round_up(x, m):
    return (x + m - 1) // m * m


def _row_tiling(m, tm_max, align):
    """Pick a row-tile size (multiple of `align`) and padded row count."""
    if m <= tm_max:
        tm = _round_up(m, align)
        return tm, tm
    return tm_max, _round_up(m, tm_max)


def _pad_rows(x, mp):
    if x.shape[0] == mp:
        return x
    return jnp.pad(x, ((0, mp - x.shape[0]), (0, 0)))


def _pick_row_tile(hn, wn, target=256, cap=2048):
    """Smallest divisor tr of hn with tr*wn >= target; else largest <= cap."""
    divisors = [d for d in range(1, hn + 1) if hn % d == 0]
    ok = [d for d in divisors if d * wn <= cap]
    if not ok:
        return 1
    for d in ok:
        if d * wn >= target:
            return d
    return ok[-1]


# ----------------------------------------------------------------------------
# Kernel 0: hoisted language K/V projection (once per stage / classifier)
# ----------------------------------------------------------------------------
def _kv_kernel(lf_ref, w_ref, b_ref, o_ref):
    o_ref[...] = jnp.dot(lf_ref[...].astype(jnp.bfloat16), w_ref[...],
                         preferred_element_type=jnp.float32) + b_ref[...]


def project_kv(lf, wkv, bkv):
    B, L, Ct = lf.shape
    O = wkv.shape[1]
    out = pl.pallas_call(
        _kv_kernel,
        out_shape=jax.ShapeDtypeStruct((B * L, O), jnp.float32),
    )(lf.reshape(B * L, Ct), wkv, bkv)
    return out.reshape(B, L, O)


# ----------------------------------------------------------------------------
# Kernel 1: fused BERT-style text-encoder layer (whole layer, grid over batch)
# ----------------------------------------------------------------------------
def _bert_layer_kernel(h_ref, m_ref,
                       ln0g_ref, ln0b_ref,
                       wqkv_ref, bqkv_ref, wo_ref, bo_ref,
                       ln1g_ref, ln1b_ref,
                       w1_ref, b1_ref, w2_ref, b2_ref,
                       ln2g_ref, ln2b_ref,
                       o_ref, *, ct, scale):
    x = h_ref[0]                                   # (L, Ct)
    m = m_ref[0]                                   # (1, L)
    h = _ln(x, ln0g_ref[...], ln0b_ref[...])

    qkv = jnp.dot(h.astype(jnp.bfloat16), wqkv_ref[...],
                  preferred_element_type=jnp.float32) + bqkv_ref[...]
    q = qkv[:, :ct] * scale                        # fold scale into q
    k = qkv[:, ct:2 * ct]
    v = qkv[:, 2 * ct:]
    s = lax.dot_general(q.astype(jnp.bfloat16), k.astype(jnp.bfloat16),
                        (((1,), (1,)), ((), ())),
                        preferred_element_type=jnp.float32)
    p = _masked_softmax(s, m)
    a = jnp.dot(p.astype(jnp.bfloat16), v.astype(jnp.bfloat16),
                preferred_element_type=jnp.float32)
    a = jnp.dot(a.astype(jnp.bfloat16), wo_ref[...],
                preferred_element_type=jnp.float32) + bo_ref[...]

    h = h + a
    h = _ln(h, ln1g_ref[...], ln1b_ref[...])
    f = jnp.maximum(
        jnp.dot(h.astype(jnp.bfloat16), w1_ref[...],
                preferred_element_type=jnp.float32) + b1_ref[...], 0.0)
    f = jnp.dot(f.astype(jnp.bfloat16), w2_ref[...],
                preferred_element_type=jnp.float32) + b2_ref[...]
    h = h + f
    o_ref[0] = _ln(h, ln2g_ref[...], ln2b_ref[...])


def text_encoder(params, text_ids, mask_b1l):
    p = params["text"]
    B, L = text_ids.shape
    Ct = p["tok_emb"].shape[1]
    emb = p["tok_emb"][text_ids] + p["pos_emb"][None]          # XLA gather
    ws = [p["ln0_g"], p["ln0_b"], p["wqkv"], p["bqkv"], p["wo"], p["bo"],
          p["ln1_g"], p["ln1_b"], p["ffn1_w"], p["ffn1_b"],
          p["ffn2_w"], p["ffn2_b"], p["ln2_g"], p["ln2_b"]]
    return pl.pallas_call(
        functools.partial(_bert_layer_kernel, ct=Ct, scale=1.0 / math.sqrt(Ct)),
        out_shape=jax.ShapeDtypeStruct((B, L, Ct), jnp.float32),
        grid=(B,),
        in_specs=[pl.BlockSpec((1, L, Ct), lambda b: (b, 0, 0)),
                  pl.BlockSpec((1, 1, L), lambda b: (b, 0, 0))]
                 + [pl.BlockSpec(w.shape, lambda b: (0, 0)) for w in ws],
        out_specs=pl.BlockSpec((1, L, Ct), lambda b: (b, 0, 0)),
        compiler_params=pltpu.CompilerParams(
            dimension_semantics=("parallel",),
            vmem_limit_bytes=_VMEM_BIG),
    )(emb, mask_b1l, *ws)


# ----------------------------------------------------------------------------
# Kernel 2: fused backbone stage = patch-merging conv + PWAM fusion + residual
#           (TR output rows per grid step; K/V hoisted)
# ----------------------------------------------------------------------------
def _stage_kernel(x_ref, kv_ref, m_ref,
                  wd_ref, bd_ref,
                  wq_ref, bq_ref, wo_ref, bo_ref,
                  o_ref, *, cout, scale, tr, wn):
    x = x_ref[0]                                   # (TR, 2, Wn, 2C)
    # single fused 2x2 patch-merge dot: concat [row 2i | row 2i+1] channels
    xc = jnp.concatenate([x[:, 0], x[:, 1]], axis=-1)        # (TR, Wn, 4C)
    xc = xc.reshape(tr * wn, xc.shape[-1])                    # (TR*Wn, 4C)
    vis = jnp.maximum(
        jnp.dot(xc.astype(jnp.bfloat16), wd_ref[...],
                preferred_element_type=jnp.float32) + bd_ref[...], 0.0)

    a = _pwam_attn(vis, kv_ref[0], m_ref[0],
                   wq_ref[...], bq_ref[...], wo_ref[...], bo_ref[...],
                   cout, scale)
    o_ref[0] = (vis + a).reshape(tr, wn, cout)


def backbone_stage(h_nhwc, kv, mask_b1l, sp):
    B, H, W, C = h_nhwc.shape
    Hn, Wn = H // 2, W // 2
    Cout = sp["wo"].shape[1]
    L = kv.shape[1]
    TR = _pick_row_tile(Hn, Wn)
    # Contiguous (free) reshape: (B,H,W,C) -> (B, H/2, 2, W/2, 2C).
    x5 = h_nhwc.reshape(B, Hn, 2, Wn, 2 * C)
    ws = [sp["wd"], sp["bd"], sp["wq"], sp["bq"], sp["wo"], sp["bo"]]
    return pl.pallas_call(
        functools.partial(_stage_kernel, cout=Cout, scale=1.0 / math.sqrt(Cout),
                          tr=TR, wn=Wn),
        out_shape=jax.ShapeDtypeStruct((B, Hn, Wn, Cout), jnp.float32),
        grid=(B, Hn // TR),
        in_specs=[pl.BlockSpec((1, TR, 2, Wn, 2 * C),
                               lambda b, i: (b, i, 0, 0, 0)),
                  pl.BlockSpec((1, L, 2 * Cout), lambda b, i: (b, 0, 0)),
                  pl.BlockSpec((1, 1, L), lambda b, i: (b, 0, 0))]
                 + [pl.BlockSpec(w.shape, lambda b, i: (0, 0)) for w in ws],
        out_specs=pl.BlockSpec((1, TR, Wn, Cout), lambda b, i: (b, i, 0, 0)),
        compiler_params=pltpu.CompilerParams(
            dimension_semantics=("parallel", "parallel"),
            vmem_limit_bytes=_VMEM_BIG),
    )(x5, kv, mask_b1l, *ws)


def backbone(params, x_nhwc, lf, mask_b1l):
    feats = []
    h = x_nhwc
    for sp in params["stages"]:
        kv = project_kv(lf, sp["wkv"], sp["bkv"])   # hoisted language K/V
        h = backbone_stage(h, kv, mask_b1l, sp)
        feats.append(h)
    return feats[0], feats[1], feats[2]


# ----------------------------------------------------------------------------
# Kernel 3: classifier proj4 + PWAM fusion + residual (grid over batch)
# ----------------------------------------------------------------------------
def _proj_pwam_kernel(x_ref, kv_ref, m_ref,
                      wp_ref, bp_ref,
                      wq_ref, bq_ref, wo_ref, bo_ref,
                      o_ref, *, d, scale):
    x = x_ref[0]                                   # (N, C4)
    vis = jnp.maximum(
        jnp.dot(x.astype(jnp.bfloat16), wp_ref[...],
                preferred_element_type=jnp.float32) + bp_ref[...], 0.0)
    a = _pwam_attn(vis, kv_ref[0], m_ref[0],
                   wq_ref[...], bq_ref[...], wo_ref[...], bo_ref[...],
                   d, scale)
    o_ref[0] = vis + a


def proj_pwam(x_tokens, kv, mask_b1l, p):
    B, N, C = x_tokens.shape
    L = kv.shape[1]
    D = p["proj4_w"].shape[1]
    ws = [p["proj4_w"], p["proj4_b"], p["wq"], p["bq"], p["wo"], p["bo"]]
    return pl.pallas_call(
        functools.partial(_proj_pwam_kernel, d=D, scale=1.0 / math.sqrt(D)),
        out_shape=jax.ShapeDtypeStruct((B, N, D), jnp.float32),
        grid=(B,),
        in_specs=[pl.BlockSpec((1, N, C), lambda b: (b, 0, 0)),
                  pl.BlockSpec((1, L, 2 * D), lambda b: (b, 0, 0)),
                  pl.BlockSpec((1, 1, L), lambda b: (b, 0, 0))]
                 + [pl.BlockSpec(w.shape, lambda b: (0, 0)) for w in ws],
        out_specs=pl.BlockSpec((1, N, D), lambda b: (b, 0, 0)),
        compiler_params=pltpu.CompilerParams(
            dimension_semantics=("parallel",),
            vmem_limit_bytes=_VMEM_BIG),
    )(x_tokens, kv, mask_b1l, *ws)


# ----------------------------------------------------------------------------
# Kernel 4: bilinear resize (align_corners=True) as two constant matmuls
# ----------------------------------------------------------------------------
def _interp_matrix_np(n_out, n_in):
    """align_corners=True bilinear interpolation matrix (n_out, n_in)."""
    A = np.zeros((n_out, n_in), dtype=np.float32)
    if n_out == 1 or n_in == 1:
        A[:, 0] = 1.0
        return A
    scale = (n_in - 1) / (n_out - 1)
    for i in range(n_out):
        src = i * scale
        i0 = int(np.floor(src))
        i1 = min(i0 + 1, n_in - 1)
        w = src - i0
        A[i, i0] += 1.0 - w
        A[i, i1] += w
    return A


def _resize_h_kernel(x_ref, aw_ref, o_ref, *, hin, wout, win):
    # horizontal pass: batched (Wout,Win)@(Win,C) matmul, channels on lanes
    aw_b = jnp.broadcast_to(aw_ref[...], (hin, wout, win))
    o_ref[0] = lax.dot_general(aw_b, x_ref[0],
                               (((2,), (1,)), ((0,), (0,))),
                               preferred_element_type=jnp.float32)


def _resize_v_kernel(x_ref, ah_ref, o_ref):
    # vertical pass: one (Hout,Hin)@(Hin,Wout*C) matmul
    o_ref[0] = jnp.dot(ah_ref[...], x_ref[0], preferred_element_type=jnp.float32)


def resize_nhwc(x, hout, wout):
    """F.interpolate(mode='bilinear', align_corners=True) on NHWC tensors."""
    B, Hin, Win, C = x.shape
    if (hout, wout) == (Hin, Win):
        return x
    if wout != Win:
        aw = jnp.asarray(_interp_matrix_np(wout, Win))
        x = pl.pallas_call(
            functools.partial(_resize_h_kernel, hin=Hin, wout=wout, win=Win),
            out_shape=jax.ShapeDtypeStruct((B, Hin, wout, C), jnp.float32),
            grid=(B,),
            in_specs=[pl.BlockSpec((1, Hin, Win, C), lambda b: (b, 0, 0, 0)),
                      pl.BlockSpec(aw.shape, lambda b: (0, 0))],
            out_specs=pl.BlockSpec((1, Hin, wout, C), lambda b: (b, 0, 0, 0)),
            compiler_params=pltpu.CompilerParams(
                dimension_semantics=("parallel",)),
        )(x, aw)
    if hout != Hin:
        ah = jnp.asarray(_interp_matrix_np(hout, Hin))
        xf = x.reshape(B, Hin, wout * C)            # free, layout-preserving
        x = pl.pallas_call(
            _resize_v_kernel,
            out_shape=jax.ShapeDtypeStruct((B, hout, wout * C), jnp.float32),
            grid=(B,),
            in_specs=[pl.BlockSpec((1, Hin, wout * C), lambda b: (b, 0, 0)),
                      pl.BlockSpec(ah.shape, lambda b: (0, 0))],
            out_specs=pl.BlockSpec((1, hout, wout * C), lambda b: (b, 0, 0)),
            compiler_params=pltpu.CompilerParams(
                dimension_semantics=("parallel",)),
        )(xf, ah).reshape(B, hout, wout, C)
    return x


def _resize_chw_kernel(x_ref, ah_ref, awt_ref, o_ref):
    t = jnp.dot(ah_ref[...], x_ref[0, 0], preferred_element_type=jnp.float32)
    o_ref[0, 0] = jnp.dot(t, awt_ref[...], preferred_element_type=jnp.float32)


def resize_chw(x, hout, wout):
    """Bilinear align_corners=True resize in NCHW layout (W on lanes)."""
    B, C, Hin, Win = x.shape
    if (hout, wout) == (Hin, Win):
        return x
    ah = jnp.asarray(_interp_matrix_np(hout, Hin))
    awt = jnp.asarray(_interp_matrix_np(wout, Win).T)
    return pl.pallas_call(
        _resize_chw_kernel,
        out_shape=jax.ShapeDtypeStruct((B, C, hout, wout), jnp.float32),
        grid=(B, C),
        in_specs=[pl.BlockSpec((1, 1, Hin, Win), lambda b, c: (b, c, 0, 0)),
                  pl.BlockSpec(ah.shape, lambda b, c: (0, 0)),
                  pl.BlockSpec(awt.shape, lambda b, c: (0, 0))],
        out_specs=pl.BlockSpec((1, 1, hout, wout), lambda b, c: (b, c, 0, 0)),
        compiler_params=pltpu.CompilerParams(
            dimension_semantics=("parallel", "parallel")),
    )(x, ah, awt)


# ----------------------------------------------------------------------------
# Kernels 5/6: fused decoder blocks, row(M)-tiled
#   fuse:  o   = relu((up + relu(x @ Wp + bp)) @ Wf + bf)
#   head:  o^T = Wc_t @ relu((up + relu(x @ Wp + bp)) @ Wf + bf)^T + bc
#          (written transposed -> lane-dense stores, output ends up CHW-ready)
# ----------------------------------------------------------------------------
def _decoder_fuse_kernel(up_ref, x_ref, wp_ref, bp_ref, wf_ref, bf_ref, o_ref):
    y = jnp.maximum(
        jnp.dot(x_ref[...].astype(jnp.bfloat16), wp_ref[...],
                preferred_element_type=jnp.float32) + bp_ref[...], 0.0)
    z = up_ref[...] + y
    o_ref[...] = jnp.maximum(
        jnp.dot(z.astype(jnp.bfloat16), wf_ref[...],
                preferred_element_type=jnp.float32) + bf_ref[...], 0.0)


def _decoder_head_kernel(up_ref, x_ref, wp_ref, bp_ref, wf_ref, bf_ref,
                         wct_ref, bc_ref, o_ref):
    y = jnp.maximum(
        jnp.dot(x_ref[...].astype(jnp.bfloat16), wp_ref[...],
                preferred_element_type=jnp.float32) + bp_ref[...], 0.0)
    z = up_ref[...] + y
    m = jnp.maximum(
        jnp.dot(z.astype(jnp.bfloat16), wf_ref[...],
                preferred_element_type=jnp.float32) + bf_ref[...], 0.0)
    # (ncls, tm) = Wc_t (ncls,D3) contracted with m (tm,D3) -> lane-dense store
    o_ref[...] = lax.dot_general(
        wct_ref[...], m.astype(jnp.bfloat16),
        (((1,), (1,)), ((), ())),
        preferred_element_type=jnp.float32) + bc_ref[...]


def _decoder_fuse_call(up, x, weights, n_out, *, tm_max=512):
    M = x.shape[0]
    tm, mp = _row_tiling(M, tm_max, 8)
    upp, xp = _pad_rows(up, mp), _pad_rows(x, mp)
    out = pl.pallas_call(
        _decoder_fuse_kernel,
        out_shape=jax.ShapeDtypeStruct((mp, n_out), jnp.float32),
        grid=(mp // tm,),
        in_specs=[pl.BlockSpec((tm, up.shape[1]), lambda i: (i, 0)),
                  pl.BlockSpec((tm, x.shape[1]), lambda i: (i, 0))]
                 + [pl.BlockSpec(w.shape, lambda i: (0, 0)) for w in weights],
        out_specs=pl.BlockSpec((tm, n_out), lambda i: (i, 0)),
        compiler_params=pltpu.CompilerParams(
            dimension_semantics=("parallel",),
            vmem_limit_bytes=_VMEM_SMALL),
    )(upp, xp, *weights)
    return out[:M] if mp != M else out


def _decoder_head_call(up, x, weights, ncls, *, tm_max=512):
    M = x.shape[0]
    tm, mp = _row_tiling(M, tm_max, 128)
    upp, xp = _pad_rows(up, mp), _pad_rows(x, mp)
    out = pl.pallas_call(
        _decoder_head_kernel,
        out_shape=jax.ShapeDtypeStruct((ncls, mp), jnp.float32),
        grid=(mp // tm,),
        in_specs=[pl.BlockSpec((tm, up.shape[1]), lambda i: (i, 0)),
                  pl.BlockSpec((tm, x.shape[1]), lambda i: (i, 0))]
                 + [pl.BlockSpec(w.shape, lambda i: (0, 0)) for w in weights],
        out_specs=pl.BlockSpec((ncls, tm), lambda i: (0, i)),
        compiler_params=pltpu.CompilerParams(
            dimension_semantics=("parallel",),
            vmem_limit_bytes=_VMEM_SMALL),
    )(upp, xp, *weights)
    return out[:, :M] if mp != M else out


def classifier(params, x_c4, x_c3, x_c2, lf, mask_b1l):
    p = params["cls"]
    B, H4, W4, C4 = x_c4.shape
    D = p["proj4_w"].shape[1]
    D3 = p["fuse34_w"].shape[1]
    ncls = p["final_w_t"].shape[0]

    # proj4 + PWAM (fused), language K/V hoisted
    kv_cls = project_kv(lf, p["wkv"], p["bkv"])
    y4 = proj_pwam(x_c4.reshape(B, H4 * W4, C4), kv_cls, mask_b1l, p)
    y4 = y4.reshape(B, H4, W4, D)

    # upsample to c3 resolution, then proj3 + add + fuse34 (fused)
    H3, W3 = x_c3.shape[1], x_c3.shape[2]
    up4 = resize_nhwc(y4, H3, W3)
    m3 = _decoder_fuse_call(up4.reshape(-1, D), x_c3.reshape(-1, x_c3.shape[-1]),
                            [p["proj3_w"], p["proj3_b"],
                             p["fuse34_w"], p["fuse34_b"]], D3)
    m3 = m3.reshape(B, H3, W3, D3)

    # upsample to c2 resolution, then proj2 + add + fuse23 + final (fused,
    # written transposed so the final path is lane-dense / CHW-ready)
    H2, W2 = x_c2.shape[1], x_c2.shape[2]
    up3 = resize_nhwc(m3, H2, W2)
    out_t = _decoder_head_call(up3.reshape(-1, D3),
                               x_c2.reshape(-1, x_c2.shape[-1]),
                               [p["proj2_w"], p["proj2_b"],
                                p["fuse23_w"], p["fuse23_b"],
                                p["final_w_t"], p["final_b_col"]], ncls)
    # (ncls, B*H2*W2) -> (B, ncls, H2, W2): tiny batch-dim transpose in XLA
    return jnp.transpose(out_t.reshape(ncls, B, H2, W2), (1, 0, 2, 3))


# ----------------------------------------------------------------------------
# Forward pass (mirrors _LAVT_VLT.forward(x, text, l_mask))
# ----------------------------------------------------------------------------
def lavt_vlt_forward(params, x_nchw, text, l_mask):
    H, W = x_nchw.shape[-2:]
    mask_b1l = l_mask.astype(jnp.float32)[:, None, :]        # (B, 1, L)
    l_feats = text_encoder(params, text, mask_b1l)           # (B, L, Ct)
    # Original permute(0,2,1)/unsqueeze(-1) are layout-only; the fused PWAM
    # kernels consume (B, L, Ct) / (B, 1, L) directly (same semantics).
    x_nhwc = jnp.transpose(x_nchw, (0, 2, 3, 1))             # NCHW -> NHWC
    x_c2, x_c3, x_c4 = backbone(params, x_nhwc, l_feats, mask_b1l)
    y_chw = classifier(params, x_c4, x_c3, x_c2, l_feats, mask_b1l)
    # F.interpolate(size=input_shape, mode='bilinear', align_corners=True);
    # output is already NCHW -- no trailing transpose needed.
    return resize_chw(y_chw, H, W)


# ----------------------------------------------------------------------------
# Deterministic parameter initialization (bf16 matmul weights, f32 bias/LN)
# ----------------------------------------------------------------------------
def _dense(key, fan_in, fan_out):
    w = (jax.random.normal(key, (fan_in, fan_out), jnp.float32)
         / np.sqrt(fan_in)).astype(jnp.bfloat16)
    b = jnp.zeros((1, fan_out), jnp.float32)
    return w, b


def init_params(key, *, vocab=100, L=8, Ct=32, cin=4, stage_ch=(16, 32, 64), ncls=2):
    keys = iter(jax.random.split(key, 64))
    ones = lambda n: jnp.ones((1, n), jnp.float32)
    zeros = lambda n: jnp.zeros((1, n), jnp.float32)

    text = {
        "tok_emb": 0.02 * jax.random.normal(next(keys), (vocab, Ct), jnp.float32),
        "pos_emb": 0.02 * jax.random.normal(next(keys), (L, Ct), jnp.float32),
        "ln0_g": ones(Ct), "ln0_b": zeros(Ct),
        "ln1_g": ones(Ct), "ln1_b": zeros(Ct),
        "ln2_g": ones(Ct), "ln2_b": zeros(Ct),
    }
    text["wqkv"], text["bqkv"] = _dense(next(keys), Ct, 3 * Ct)
    text["wo"], text["bo"] = _dense(next(keys), Ct, Ct)
    text["ffn1_w"], text["ffn1_b"] = _dense(next(keys), Ct, 4 * Ct)
    text["ffn2_w"], text["ffn2_b"] = _dense(next(keys), 4 * Ct, Ct)
    params = {"text": text}

    stages = []
    c_prev = cin
    for c_out in stage_ch:
        wd, bd = _dense(next(keys), 4 * c_prev, c_out)       # 2x2 patch-merge
        wq, bq = _dense(next(keys), c_out, c_out)
        wkv, bkv = _dense(next(keys), Ct, 2 * c_out)         # concat(Wk, Wv)
        wo, bo = _dense(next(keys), c_out, c_out)
        stages.append({"wd": wd, "bd": bd, "wq": wq, "bq": bq,
                       "wkv": wkv, "bkv": bkv, "wo": wo, "bo": bo})
        c_prev = c_out
    params["stages"] = stages

    c2, c3, c4 = stage_ch
    D, D3 = 32, 16
    cls = {}
    cls["proj4_w"], cls["proj4_b"] = _dense(next(keys), c4, D)
    cls["wq"], cls["bq"] = _dense(next(keys), D, D)
    cls["wkv"], cls["bkv"] = _dense(next(keys), Ct, 2 * D)
    cls["wo"], cls["bo"] = _dense(next(keys), D, D)
    cls["proj3_w"], cls["proj3_b"] = _dense(next(keys), c3, D)
    cls["fuse34_w"], cls["fuse34_b"] = _dense(next(keys), D, D3)
    cls["proj2_w"], cls["proj2_b"] = _dense(next(keys), c2, D3)
    cls["fuse23_w"], cls["fuse23_b"] = _dense(next(keys), D3, D3)
    wfin, _ = _dense(next(keys), D3, ncls)
    cls["final_w_t"] = jnp.transpose(wfin)                   # (ncls, D3) bf16
    cls["final_b_col"] = jnp.zeros((ncls, 1), jnp.float32)   # column bias
    params["cls"] = cls
    return params


# ----------------------------------------------------------------------------
# Main
# ----------------------------------------------------------------------------
if __name__ == "__main__":
    key = jax.random.PRNGKey(0)
    kp, kx, kt = jax.random.split(key, 3)

    B, Cin, H, W, L = 2, 4, 16, 16, 8
    NUM_CLASSES = 2

    params = init_params(kp, vocab=100, L=L, Ct=32, cin=Cin,
                         stage_ch=(16, 32, 64), ncls=NUM_CLASSES)

    x = jax.random.normal(kx, (B, Cin, H, W), jnp.float32)   # NCHW as in PyTorch
    text = jax.random.randint(kt, (B, L), 0, 100, dtype=jnp.int32)
    l_mask = jnp.array([[1, 1, 1, 1, 1, 1, 1, 1],
                        [1, 1, 1, 1, 1, 0, 0, 0]], dtype=jnp.int32)

    fwd = jax.jit(lavt_vlt_forward)
    out = fwd(params, x, text, l_mask)
    jax.block_until_ready(out)

    assert out.shape == (B, NUM_CLASSES, H, W), out.shape
    assert bool(jnp.all(jnp.isfinite(out)))
    print("KERNEL_OK")
</pallas_src>

<mosaic_0001>
module attributes {stable_mosaic.version = 11 : i64} {
  func.func @_kv_kernel(%arg0: memref<16x32xf32, #tpu.memory_space<vmem>>, %arg1: memref<32x32xbf16, #tpu.memory_space<vmem>>, %arg2: memref<1x32xf32, #tpu.memory_space<vmem>>, %arg3: memref<16x32xf32, #tpu.memory_space<vmem>>) attributes {dimension_semantics = [], scalar_prefetch = 0 : i64, scratch_operands = 0 : i64, tpu.core_type = #tpu.core_type<tc>} {
    %c0 = arith.constant 0 : index
    %c0_0 = arith.constant 0 : index
    %0 = vector.load %arg0[%c0, %c0_0] : memref<16x32xf32, #tpu.memory_space<vmem>>, vector<16x32xf32>
    %1 = arith.truncf %0 : vector<16x32xf32> to vector<16x32xbf16>
    %c0_1 = arith.constant 0 : index
    %c0_2 = arith.constant 0 : index
    %2 = vector.load %arg1[%c0_1, %c0_2] : memref<32x32xbf16, #tpu.memory_space<vmem>>, vector<32x32xbf16>
    %cst = arith.constant dense<0.000000e+00> : vector<16x32xf32>
    %3 = tpu.matmul %1, %2, %cst {dimension_numbers = #tpu.dot_dimension_numbers<[1], [0], [0], [1], [0, 0, 1, 1], [], []>} : vector<16x32xbf16>, vector<32x32xbf16>, vector<16x32xf32> -> vector<16x32xf32>
    %c0_3 = arith.constant 0 : index
    %c0_4 = arith.constant 0 : index
    %4 = vector.load %arg2[%c0_3, %c0_4] : memref<1x32xf32, #tpu.memory_space<vmem>>, vector<1x32xf32>
    %5 = vector.broadcast %4 : vector<1x32xf32> to vector<16x32xf32>
    %6 = arith.addf %3, %5 : vector<16x32xf32>
    %c0_5 = arith.constant 0 : index
    %c0_6 = arith.constant 0 : index
    %7 = vector.load %arg3[%c0_5, %c0_6] : memref<16x32xf32, #tpu.memory_space<vmem>>, vector<16x32xf32>
    tpu.vector_store %arg3[%c0_5, %c0_6], %6 {strides = array<i32>} : memref<16x32xf32, #tpu.memory_space<vmem>>, vector<16x32xf32>,
    return
  }
}

module attributes {stable_mosaic.version = 11 : i64} {
  func.func @_bert_layer_kernel(%arg0: i32, %arg1: memref<1x8x32xf32, #tpu.memory_space<vmem>>, %arg2: memref<1x1x8xf32, #tpu.memory_space<vmem>>, %arg3: memref<1x32xf32, #tpu.memory_space<vmem>>, %arg4: memref<1x32xf32, #tpu.memory_space<vmem>>, %arg5: memref<32x96xbf16, #tpu.memory_space<vmem>>, %arg6: memref<1x96xf32, #tpu.memory_space<vmem>>, %arg7: memref<32x32xbf16, #tpu.memory_space<vmem>>, %arg8: memref<1x32xf32, #tpu.memory_space<vmem>>, %arg9: memref<1x32xf32, #tpu.memory_space<vmem>>, %arg10: memref<1x32xf32, #tpu.memory_space<vmem>>, %arg11: memref<32x128xbf16, #tpu.memory_space<vmem>>, %arg12: memref<1x128xf32, #tpu.memory_space<vmem>>, %arg13: memref<128x32xbf16, #tpu.memory_space<vmem>>, %arg14: memref<1x32xf32, #tpu.memory_space<vmem>>, %arg15: memref<1x32xf32, #tpu.memory_space<vmem>>, %arg16: memref<1x32xf32, #tpu.memory_space<vmem>>, %arg17: memref<1x8x32xf32, #tpu.memory_space<vmem>>) attributes {dimension_semantics = [#tpu.dimension_semantics<parallel>], iteration_bounds = array<i64: 2>, scalar_prefetch = 0 : i64, scratch_operands = 0 : i64, tpu.core_type = #tpu.core_type<tc>, window_params = [{transform_indices = @transform_0, window_bounds = array<i64: 1, 8, 32>}, {transform_indices = @transform_1, window_bounds = array<i64: 1, 1, 8>}, {pipeline_mode = #tpu.pipeline_mode<synchronous>, transform_indices = @transform_2, window_bounds = array<i64: 1, 32>}, {pipeline_mode = #tpu.pipeline_mode<synchronous>, transform_indices = @transform_3, window_bounds = array<i64: 1, 32>}, {pipeline_mode = #tpu.pipeline_mode<synchronous>, transform_indices = @transform_4, window_bounds = array<i64: 32, 96>}, {pipeline_mode = #tpu.pipeline_mode<synchronous>, transform_indices = @transform_5, window_bounds = array<i64: 1, 96>}, {pipeline_mode = #tpu.pipeline_mode<synchronous>, transform_indices = @transform_6, window_bounds = array<i64: 32, 32>}, {pipeline_mode = #tpu.pipeline_mode<synchronous>, transform_indices = @transform_7, window_bounds = array<i64: 1, 32>}, {pipeline_mode = #tpu.pipeline_mode<synchronous>, transform_indices = @transform_8, window_bounds = array<i64: 1, 32>}, {pipeline_mode = #tpu.pipeline_mode<synchronous>, transform_indices = @transform_9, window_bounds = array<i64: 1, 32>}, {pipeline_mode = #tpu.pipeline_mode<synchronous>, transform_indices = @transform_10, window_bounds = array<i64: 32, 128>}, {pipeline_mode = #tpu.pipeline_mode<synchronous>, transform_indices = @transform_11, window_bounds = array<i64: 1, 128>}, {pipeline_mode = #tpu.pipeline_mode<synchronous>, transform_indices = @transform_12, window_bounds = array<i64: 128, 32>}, {pipeline_mode = #tpu.pipeline_mode<synchronous>, transform_indices = @transform_13, window_bounds = array<i64: 1, 32>}, {pipeline_mode = #tpu.pipeline_mode<synchronous>, transform_indices = @transform_14, window_bounds = array<i64: 1, 32>}, {pipeline_mode = #tpu.pipeline_mode<synchronous>, transform_indices = @transform_15, window_bounds = array<i64: 1, 32>}, {transform_indices = @transform_16, window_bounds = array<i64: 1, 8, 32>}]} {
    %c0 = arith.constant 0 : index
    %c0_0 = arith.constant 0 : index
    %c0_1 = arith.constant 0 : index
    %0 = vector.load %arg1[%c0, %c0_0, %c0_1] : memref<1x8x32xf32, #tpu.memory_space<vmem>>, vector<1x8x32xf32>
    %1 = vector.shape_cast %0 : vector<1x8x32xf32> to vector<8x32xf32>
    %c0_2 = arith.constant 0 : index
    %c0_3 = arith.constant 0 : index
    %c0_4 = arith.constant 0 : index
    %2 = vector.load %arg2[%c0_2, %c0_3, %c0_4] : memref<1x1x8xf32, #tpu.memory_space<vmem>>, vector<1x1x8xf32>
    %3 = vector.shape_cast %2 : vector<1x1x8xf32> to vector<1x8xf32>
    %c0_5 = arith.constant 0 : index
    %c0_6 = arith.constant 0 : index
    %4 = vector.load %arg3[%c0_5, %c0_6] : memref<1x32xf32, #tpu.memory_space<vmem>>, vector<1x32xf32>
    %c0_7 = arith.constant 0 : index
    %c0_8 = arith.constant 0 : index
    %5 = vector.load %arg4[%c0_7, %c0_8] : memref<1x32xf32, #tpu.memory_space<vmem>>, vector<1x32xf32>
    %cst = arith.constant dense<0.000000e+00> : vector<8xf32>
    %6 = vector.multi_reduction <add>, %1, %cst [1] : vector<8x32xf32> to vector<8xf32>
    %7 = vector.shape_cast %6 : vector<8xf32> to vector<8x1xf32>
    %cst_9 = arith.constant 3.200000e+01 : f32
    %8 = vector.broadcast %cst_9 : f32 to vector<8x1xf32>
    %9 = arith.divf %7, %8 : vector<8x1xf32>
    %10 = vector.broadcast %9 : vector<8x1xf32> to vector<8x32xf32>
    %11 = arith.subf %1, %10 : vector<8x32xf32>
    %12 = arith.mulf %11, %11 : vector<8x32xf32>
    %cst_10 = arith.constant dense<0.000000e+00> : vector<8xf32>
    %13 = vector.multi_reduction <add>, %12, %cst_10 [1] : vector<8x32xf32> to vector<8xf32>
    %14 = vector.shape_cast %13 : vector<8xf32> to vector<8x1xf32>
    %cst_11 = arith.constant 3.200000e+01 : f32
    %15 = vector.broadcast %cst_11 : f32 to vector<8x1xf32>
    %16 = arith.divf %14, %15 : vector<8x1xf32>
    %17 = vector.broadcast %9 : vector<8x1xf32> to vector<8x32xf32>
    %18 = arith.subf %1, %17 : vector<8x32xf32>
    %cst_12 = arith.constant 9.99999974E-6 : f32
    %19 = vector.broadcast %cst_12 : f32 to vector<8x1xf32>
    %20 = arith.addf %16, %19 : vector<8x1xf32>
    %21 = math.rsqrt %20 : vector<8x1xf32>
    %22 = vector.broadcast %21 : vector<8x1xf32> to vector<8x32xf32>
    %23 = arith.mulf %18, %22 : vector<8x32xf32>
    %24 = vector.broadcast %4 : vector<1x32xf32> to vector<8x32xf32>
    %25 = arith.mulf %23, %24 : vector<8x32xf32>
    %26 = vector.broadcast %5 : vector<1x32xf32> to vector<8x32xf32>
    %27 = arith.addf %25, %26 : vector<8x32xf32>
    %28 = arith.truncf %27 : vector<8x32xf32> to vector<8x32xbf16>
    %c0_13 = arith.constant 0 : index
    %c0_14 = arith.constant 0 : index
    %29 = vector.load %arg5[%c0_13, %c0_14] : memref<32x96xbf16, #tpu.memory_space<vmem>>, vector<32x96xbf16>
    %cst_15 = arith.constant dense<0.000000e+00> : vector<8x96xf32>
    %30 = tpu.matmul %28, %29, %cst_15 {dimension_numbers = #tpu.dot_dimension_numbers<[1], [0], [0], [1], [0, 0, 1, 1], [], []>} : vector<8x32xbf16>, vector<32x96xbf16>, vector<8x96xf32> -> vector<8x96xf32>
    %c0_16 = arith.constant 0 : index
    %c0_17 = arith.constant 0 : index
    %31 = vector.load %arg6[%c0_16, %c0_17] : memref<1x96xf32, #tpu.memory_space<vmem>>, vector<1x96xf32>
    %32 = vector.broadcast %31 : vector<1x96xf32> to vector<8x96xf32>
    %33 = arith.addf %30, %32 : vector<8x96xf32>
    %34 = vector.extract_strided_slice %33 {offsets = [0, 0], sizes = [8, 32], strides = [1, 1]} : vector<8x96xf32> to vector<8x32xf32>
    %cst_18 = arith.constant 0.176776692 : f32
    %35 = vector.broadcast %cst_18 : f32 to vector<8x32xf32>
    %36 = arith.mulf %34, %35 : vector<8x32xf32>
    %37 = vector.extract_strided_slice %33 {offsets = [0, 32], sizes = [8, 32], strides = [1, 1]} : vector<8x96xf32> to vector<8x32xf32>
    %38 = vector.extract_strided_slice %33 {offsets = [0, 64], sizes = [8, 32], strides = [1, 1]} : vector<8x96xf32> to vector<8x32xf32>
    %39 = arith.truncf %36 : vector<8x32xf32> to vector<8x32xbf16>
    %40 = arith.truncf %37 : vector<8x32xf32> to vector<8x32xbf16>
    %cst_19 = arith.constant dense<0.000000e+00> : vector<8x8xf32>
    %41 = tpu.matmul %39, %40, %cst_19 {dimension_numbers = #tpu.dot_dimension_numbers<[1], [1], [0], [0], [0, 0, 1, 0], [], []>} : vector<8x32xbf16>, vector<8x32xbf16>, vector<8x8xf32> -> vector<8x8xf32>
    %cst_20 = arith.constant 5.000000e-01 : f32
    %42 = vector.broadcast %cst_20 : f32 to vector<1x8xf32>
    %43 = arith.cmpf ogt, %3, %42 : vector<1x8xf32>
    %cst_21 = arith.constant -1.000000e+09 : f32
    %44 = vector.shape_cast %43 : vector<1x8xi1> to vector<1x8xi1>
    %45 = vector.broadcast %44 : vector<1x8xi1> to vector<8x8xi1>
    %46 = vector.broadcast %cst_21 : f32 to vector<8x8xf32>
    %47 = arith.select %45, %41, %46 : vector<8x8xi1>, vector<8x8xf32>
    %cst_22 = arith.constant dense<0xFF800000> : vector<8xf32>
    %48 = vector.multi_reduction <maximumf>, %47, %cst_22 [1] : vector<8x8xf32> to vector<8xf32>
    %49 = vector.shape_cast %48 : vector<8xf32> to vector<8x1xf32>
    %50 = vector.broadcast %49 : vector<8x1xf32> to vector<8x8xf32>
    %51 = arith.subf %47, %50 : vector<8x8xf32>
    %52 = math.exp %51 : vector<8x8xf32>
    %cst_23 = arith.constant dense<0.000000e+00> : vector<8xf32>
    %53 = vector.multi_reduction <add>, %52, %cst_23 [1] : vector<8x8xf32> to vector<8xf32>
    %54 = vector.shape_cast %53 : vector<8xf32> to vector<8x1xf32>
    %55 = tpu.reciprocal %54 {approx = true} : vector<8x1xf32> -> vector<8x1xf32>
    %56 = vector.broadcast %55 : vector<8x1xf32> to vector<8x8xf32>
    %57 = arith.mulf %52, %56 : vector<8x8xf32>
    %58 = arith.truncf %57 : vector<8x8xf32> to vector<8x8xbf16>
    %59 = arith.truncf %38 : vector<8x32xf32> to vector<8x32xbf16>
    %cst_24 = arith.constant dense<0.000000e+00> : vector<8x32xf32>
    %60 = tpu.matmul %58, %59, %cst_24 {dimension_numbers = #tpu.dot_dimension_numbers<[1], [0], [0], [1], [0, 0, 1, 1], [], []>} : vector<8x8xbf16>, vector<8x32xbf16>, vector<8x32xf32> -> vector<8x32xf32>
    %61 = arith.truncf %60 : vector<8x32xf32> to vector<8x32xbf16>
    %c0_25 = arith.constant 0 : index
    %c0_26 = arith.constant 0 : index
    %62 = vector.load %arg7[%c0_25, %c0_26] : memref<32x32xbf16, #tpu.memory_space<vmem>>, vector<32x32xbf16>
    %cst_27 = arith.constant dense<0.000000e+00> : vector<8x32xf32>
    %63 = tpu.matmul %61, %62, %cst_27 {dimension_numbers = #tpu.dot_dimension_numbers<[1], [0], [0], [1], [0, 0, 1, 1], [], []>} : vector<8x32xbf16>, vector<32x32xbf16>, vector<8x32xf32> -> vector<8x32xf32>
    %c0_28 = arith.constant 0 : index
    %c0_29 = arith.constant 0 : index
    %64 = vector.load %arg8[%c0_28, %c0_29] : memref<1x32xf32, #tpu.memory_space<vmem>>, vector<1x32xf32>
    %65 = vector.broadcast %64 : vector<1x32xf32> to vector<8x32xf32>
    %66 = arith.addf %63, %65 : vector<8x32xf32>
    %67 = arith.addf %27, %66 : vector<8x32xf32>
    %c0_30 = arith.constant 0 : index
    %c0_31 = arith.constant 0 : index
    %68 = vector.load %arg9[%c0_30, %c0_31] : memref<1x32xf32, #tpu.memory_space<vmem>>, vector<1x32xf32>
    %c0_32 = arith.constant 0 : index
    %c0_33 = arith.constant 0 : index
    %69 = vector.load %arg10[%c0_32, %c0_33] : memref<1x32xf32, #tpu.memory_space<vmem>>, vector<1x32xf32>
    %cst_34 = arith.constant dense<0.000000e+00> : vector<8xf32>
    %70 = vector.multi_reduction <add>, %67, %cst_34 [1] : vector<8x32xf32> to vector<8xf32>
    %71 = vector.shape_cast %70 : vector<8xf32> to vector<8x1xf32>
    %cst_35 = arith.constant 3.200000e+01 : f32
    %72 = vector.broadcast %cst_35 : f32 to vector<8x1xf32>
    %73 = arith.divf %71, %72 : vector<8x1xf32>
    %74 = vector.broadcast %73 : vector<8x1xf32> to vector<8x32xf32>
    %75 = arith.subf %67, %74 : vector<8x32xf32>
    %76 = arith.mulf %75, %75 : vector<8x32xf32>
    %cst_36 = arith.constant dense<0.000000e+00> : vector<8xf32>
    %77 = vector.multi_reduction <add>, %76, %cst_36 [1] : vector<8x32xf32> to vector<8xf32>
    %78 = vector.shape_cast %77 : vector<8xf32> to vector<8x1xf32>
    %cst_37 = arith.constant 3.200000e+01 : f32
    %79 = vector.broadcast %cst_37 : f32 to vector<8x1xf32>
    %80 = arith.divf %78, %79 : vector<8x1xf32>
    %81 = vector.broadcast %73 : vector<8x1xf32> to vector<8x32xf32>
    %82 = arith.subf %67, %81 : vector<8x32xf32>
    %cst_38 = arith.constant 9.99999974E-6 : f32
    %83 = vector.broadcast %cst_38 : f32 to vector<8x1xf32>
    %84 = arith.addf %80, %83 : vector<8x1xf32>
    %85 = math.rsqrt %84 : vector<8x1xf32>
    %86 = vector.broadcast %85 : vector<8x1xf32> to vector<8x32xf32>
    %87 = arith.mulf %82, %86 : vector<8x32xf32>
    %88 = vector.broadcast %68 : vector<1x32xf32> to vector<8x32xf32>
    %89 = arith.mulf %87, %88 : vector<8x32xf32>
    %90 = vector.broadcast %69 : vector<1x32xf32> to vector<8x32xf32>
    %91 = arith.addf %89, %90 : vector<8x32xf32>
    %92 = arith.truncf %91 : vector<8x32xf32> to vector<8x32xbf16>
    %c0_39 = arith.constant 0 : index
    %c0_40 = arith.constant 0 : index
    %93 = vector.load %arg11[%c0_39, %c0_40] : memref<32x128xbf16, #tpu.memory_space<vmem>>, vector<32x128xbf16>
    %cst_41 = arith.constant dense<0.000000e+00> : vector<8x128xf32>
    %94 = tpu.matmul %92, %93, %cst_41 {dimension_numbers = #tpu.dot_dimension_numbers<[1], [0], [0], [1], [0, 0, 1, 1], [], []>} : vector<8x32xbf16>, vector<32x128xbf16>, vector<8x128xf32> -> vector<8x128xf32>
    %c0_42 = arith.constant 0 : index
    %c0_43 = arith.constant 0 : index
    %95 = vector.load %arg12[%c0_42, %c0_43] : memref<1x128xf32, #tpu.memory_space<vmem>>, vector<1x128xf32>
    %96 = vector.broadcast %95 : vector<1x128xf32> to vector<8x128xf32>
    %97 = arith.addf %94, %96 : vector<8x128xf32>
    %cst_44 = arith.constant 0.000000e+00 : f32
    %98 = vector.broadcast %cst_44 : f32 to vector<8x128xf32>
    %99 = arith.maximumf %97, %98 : vector<8x128xf32>
    %100 = arith.truncf %99 : vector<8x128xf32> to vector<8x128xbf16>
    %c0_45 = arith.constant 0 : index
    %c0_46 = arith.constant 0 : index
    %101 = vector.load %arg13[%c0_45, %c0_46] : memref<128x32xbf16, #tpu.memory_space<vmem>>, vector<128x32xbf16>
    %cst_47 = arith.constant dense<0.000000e+00> : vector<8x32xf32>
    %102 = tpu.matmul %100, %101, %cst_47 {dimension_numbers = #tpu.dot_dimension_numbers<[1], [0], [0], [1], [0, 0, 1, 1], [], []>} : vector<8x128xbf16>, vector<128x32xbf16>, vector<8x32xf32> -> vector<8x32xf32>
    %c0_48 = arith.constant 0 : index
    %c0_49 = arith.constant 0 : index
    %103 = vector.load %arg14[%c0_48, %c0_49] : memref<1x32xf32, #tpu.memory_space<vmem>>, vector<1x32xf32>
    %104 = vector.broadcast %103 : vector<1x32xf32> to vector<8x32xf32>
    %105 = arith.addf %102, %104 : vector<8x32xf32>
    %106 = arith.addf %91, %105 : vector<8x32xf32>
    %c0_50 = arith.constant 0 : index
    %c0_51 = arith.constant 0 : index
    %107 = vector.load %arg15[%c0_50, %c0_51] : memref<1x32xf32, #tpu.memory_space<vmem>>, vector<1x32xf32>
    %c0_52 = arith.constant 0 : index
    %c0_53 = arith.constant 0 : index
    %108 = vector.load %arg16[%c0_52, %c0_53] : memref<1x32xf32, #tpu.memory_space<vmem>>, vector<1x32xf32>
    %cst_54 = arith.constant dense<0.000000e+00> : vector<8xf32>
    %109 = vector.multi_reduction <add>, %106, %cst_54 [1] : vector<8x32xf32> to vector<8xf32>
    %110 = vector.shape_cast %109 : vector<8xf32> to vector<8x1xf32>
    %cst_55 = arith.constant 3.200000e+01 : f32
    %111 = vector.broadcast %cst_55 : f32 to vector<8x1xf32>
    %112 = arith.divf %110, %111 : vector<8x1xf32>
    %113 = vector.broadcast %112 : vector<8x1xf32> to vector<8x32xf32>
    %114 = arith.subf %106, %113 : vector<8x32xf32>
    %115 = arith.mulf %114, %114 : vector<8x32xf32>
    %cst_56 = arith.constant dense<0.000000e+00> : vector<8xf32>
    %116 = vector.multi_reduction <add>, %115, %cst_56 [1] : vector<8x32xf32> to vector<8xf32>
    %117 = vector.shape_cast %116 : vector<8xf32> to vector<8x1xf32>
    %cst_57 = arith.constant 3.200000e+01 : f32
    %118 = vector.broadcast %cst_57 : f32 to vector<8x1xf32>
    %119 = arith.divf %117, %118 : vector<8x1xf32>
    %120 = vector.broadcast %112 : vector<8x1xf32> to vector<8x32xf32>
    %121 = arith.subf %106, %120 : vector<8x32xf32>
    %cst_58 = arith.constant 9.99999974E-6 : f32
    %122 = vector.broadcast %cst_58 : f32 to vector<8x1xf32>
    %123 = arith.addf %119, %122 : vector<8x1xf32>
    %124 = math.rsqrt %123 : vector<8x1xf32>
    %125 = vector.broadcast %124 : vector<8x1xf32> to vector<8x32xf32>
    %126 = arith.mulf %121, %125 : vector<8x32xf32>
    %127 = vector.broadcast %107 : vector<1x32xf32> to vector<8x32xf32>
    %128 = arith.mulf %126, %127 : vector<8x32xf32>
    %129 = vector.broadcast %108 : vector<1x32xf32> to vector<8x32xf32>
    %130 = arith.addf %128, %129 : vector<8x32xf32>
    %c0_59 = arith.constant 0 : index
    %c0_60 = arith.constant 0 : index
    %c0_61 = arith.constant 0 : index
    %131 = vector.load %arg17[%c0_59, %c0_60, %c0_61] : memref<1x8x32xf32, #tpu.memory_space<vmem>>, vector<1x8x32xf32>
    %132 = vector.shape_cast %131 : vector<1x8x32xf32> to vector<8x32xf32>
    %133 = vector.shape_cast %130 : vector<8x32xf32> to vector<1x8x32xf32>
    tpu.vector_store %arg17[%c0_59, %c0_60, %c0_61], %133 {strides = array<i32>} : memref<1x8x32xf32, #tpu.memory_space<vmem>>, vector<1x8x32xf32>,
    return
  }
  func.func @transform_0(%arg0: i32) -> (i32, i32, i32) {
    %c0_i32 = arith.constant 0 : i32
    %c0_i32_0 = arith.constant 0 : i32
    %c0_i32_1 = arith.constant 0 : i32
    return %arg0, %c0_i32, %c0_i32_0 : i32, i32, i32
  }
  func.func @transform_1(%arg0: i32) -> (i32, i32, i32) {
    %c0_i32 = arith.constant 0 : i32
    %c0_i32_0 = arith.constant 0 : i32
    %c0_i32_1 = arith.constant 0 : i32
    return %arg0, %c0_i32, %c0_i32_0 : i32, i32, i32
  }
  func.func @transform_2(%arg0: i32) -> (i32, i32) {
    %c0_i32 = arith.constant 0 : i32
    %c0_i32_0 = arith.constant 0 : i32
    %c0_i32_1 = arith.constant 0 : i32
    return %c0_i32, %c0_i32_0 : i32, i32
  }
  func.func @transform_3(%arg0: i32) -> (i32, i32) {
    %c0_i32 = arith.constant 0 : i32
    %c0_i32_0 = arith.constant 0 : i32
    %c0_i32_1 = arith.constant 0 : i32
    return %c0_i32, %c0_i32_0 : i32, i32
  }
  func.func @transform_4(%arg0: i32) -> (i32, i32) {
    %c0_i32 = arith.constant 0 : i32
    %c0_i32_0 = arith.constant 0 : i32
    %c0_i32_1 = arith.constant 0 : i32
    return %c0_i32, %c0_i32_0 : i32, i32
  }
  func.func @transform_5(%arg0: i32) -> (i32, i32) {
    %c0_i32 = arith.constant 0 : i32
    %c0_i32_0 = arith.constant 0 : i32
    %c0_i32_1 = arith.constant 0 : i32
    return %c0_i32, %c0_i32_0 : i32, i32
  }
  func.func @transform_6(%arg0: i32) -> (i32, i32) {
    %c0_i32 = arith.constant 0 : i32
    %c0_i32_0 = arith.constant 0 : i32
    %c0_i32_1 = arith.constant 0 : i32
    return %c0_i32, %c0_i32_0 : i32, i32
  }
  func.func @transform_7(%arg0: i32) -> (i32, i32) {
    %c0_i32 = arith.constant 0 : i32
    %c0_i32_0 = arith.constant 0 : i32
    %c0_i32_1 = arith.constant 0 : i32
    return %c0_i32, %c0_i32_0 : i32, i32
  }
  func.func @transform_8(%arg0: i32) -> (i32, i32) {
    %c0_i32 = arith.constant 0 : i32
    %c0_i32_0 = arith.constant 0 : i32
    %c0_i32_1 = arith.constant 0 : i32
    return %c0_i32, %c0_i32_0 : i32, i32
  }
  func.func @transform_9(%arg0: i32) -> (i32, i32) {
    %c0_i32 = arith.constant 0 : i32
    %c0_i32_0 = arith.constant 0 : i32
    %c0_i32_1 = arith.constant 0 : i32
    return %c0_i32, %c0_i32_0 : i32, i32
  }
  func.func @transform_10(%arg0: i32) -> (i32, i32) {
    %c0_i32 = arith.constant 0 : i32
    %c0_i32_0 = arith.constant 0 : i32
    %c0_i32_1 = arith.constant 0 : i32
    return %c0_i32, %c0_i32_0 : i32, i32
  }
  func.func @transform_11(%arg0: i32) -> (i32, i32) {
    %c0_i32 = arith.constant 0 : i32
    %c0_i32_0 = arith.constant 0 : i32
    %c0_i32_1 = arith.constant 0 : i32
    return %c0_i32, %c0_i32_0 : i32, i32
  }
  func.func @transform_12(%arg0: i32) -> (i32, i32) {
    %c0_i32 = arith.constant 0 : i32
    %c0_i32_0 = arith.constant 0 : i32
    %c0_i32_1 = arith.constant 0 : i32
    return %c0_i32, %c0_i32_0 : i32, i32
  }
  func.func @transform_13(%arg0: i32) -> (i32, i32) {
    %c0_i32 = arith.constant 0 : i32
    %c0_i32_0 = arith.constant 0 : i32
    %c0_i32_1 = arith.constant 0 : i32
    return %c0_i32, %c0_i32_0 : i32, i32
  }
  func.func @transform_14(%arg0: i32) -> (i32, i32) {
    %c0_i32 = arith.constant 0 : i32
    %c0_i32_0 = arith.constant 0 : i32
    %c0_i32_1 = arith.constant 0 : i32
    return %c0_i32, %c0_i32_0 : i32, i32
  }
  func.func @transform_15(%arg0: i32) -> (i32, i32) {
    %c0_i32 = arith.constant 0 : i32
    %c0_i32_0 = arith.constant 0 : i32
    %c0_i32_1 = arith.constant 0 : i32
    return %c0_i32, %c0_i32_0 : i32, i32
  }
  func.func @transform_16(%arg0: i32) -> (i32, i32, i32) {
    %c0_i32 = arith.constant 0 : i32
    %c0_i32_0 = arith.constant 0 : i32
    %c0_i32_1 = arith.constant 0 : i32
    return %arg0, %c0_i32, %c0_i32_0 : i32, i32, i32
  }
}

module attributes {stable_mosaic.version = 11 : i64} {
  func.func @_stage_kernel(%arg0: i32, %arg1: i32, %arg2: memref<1x8x2x8x8xf32, #tpu.memory_space<vmem>>, %arg3: memref<1x8x32xf32, #tpu.memory_space<vmem>>, %arg4: memref<1x1x8xf32, #tpu.memory_space<vmem>>, %arg5: memref<16x16xbf16, #tpu.memory_space<vmem>>, %arg6: memref<1x16xf32, #tpu.memory_space<vmem>>, %arg7: memref<16x16xbf16, #tpu.memory_space<vmem>>, %arg8: memref<1x16xf32, #tpu.memory_space<vmem>>, %arg9: memref<16x16xbf16, #tpu.memory_space<vmem>>, %arg10: memref<1x16xf32, #tpu.memory_space<vmem>>, %arg11: memref<1x8x8x16xf32, #tpu.memory_space<vmem>>) attributes {dimension_semantics = [#tpu.dimension_semantics<parallel>, #tpu.dimension_semantics<parallel>], iteration_bounds = array<i64: 2, 1>, scalar_prefetch = 0 : i64, scratch_operands = 0 : i64, tpu.core_type = #tpu.core_type<tc>, window_params = [{transform_indices = @transform_0, window_bounds = array<i64: 1, 8, 2, 8, 8>}, {transform_indices = @transform_1, window_bounds = array<i64: 1, 8, 32>}, {transform_indices = @transform_2, window_bounds = array<i64: 1, 1, 8>}, {pipeline_mode = #tpu.pipeline_mode<synchronous>, transform_indices = @transform_3, window_bounds = array<i64: 16, 16>}, {pipeline_mode = #tpu.pipeline_mode<synchronous>, transform_indices = @transform_4, window_bounds = array<i64: 1, 16>}, {pipeline_mode = #tpu.pipeline_mode<synchronous>, transform_indices = @transform_5, window_bounds = array<i64: 16, 16>}, {pipeline_mode = #tpu.pipeline_mode<synchronous>, transform_indices = @transform_6, window_bounds = array<i64: 1, 16>}, {pipeline_mode = #tpu.pipeline_mode<synchronous>, transform_indices = @transform_7, window_bounds = array<i64: 16, 16>}, {pipeline_mode = #tpu.pipeline_mode<synchronous>, transform_indices = @transform_8, window_bounds = array<i64: 1, 16>}, {transform_indices = @transform_9, window_bounds = array<i64: 1, 8, 8, 16>}]} {
    %c0 = arith.constant 0 : index
    %c0_0 = arith.constant 0 : index
    %c0_1 = arith.constant 0 : index
    %c0_2 = arith.constant 0 : index
    %c0_3 = arith.constant 0 : index
    %0 = vector.load %arg2[%c0, %c0_0, %c0_1, %c0_2, %c0_3] : memref<1x8x2x8x8xf32, #tpu.memory_space<vmem>>, vector<1x8x2x8x8xf32>
    %1 = vector.shape_cast %0 : vector<1x8x2x8x8xf32> to vector<8x2x8x8xf32>
    %2 = vector.extract_strided_slice %1 {offsets = [0, 0, 0, 0], sizes = [8, 1, 8, 8], strides = [1, 1, 1, 1]} : vector<8x2x8x8xf32> to vector<8x1x8x8xf32>
    %3 = vector.shape_cast %2 : vector<8x1x8x8xf32> to vector<8x8x8xf32>
    %4 = vector.extract_strided_slice %1 {offsets = [0, 1, 0, 0], sizes = [8, 1, 8, 8], strides = [1, 1, 1, 1]} : vector<8x2x8x8xf32> to vector<8x1x8x8xf32>
    %5 = vector.shape_cast %4 : vector<8x1x8x8xf32> to vector<8x8x8xf32>
    %6 = tpu.concatenate %3, %5 in 2 : vector<8x8x8xf32>, vector<8x8x8xf32> -> vector<8x8x16xf32>
    %7 = vector.shape_cast %6 : vector<8x8x16xf32> to vector<64x16xf32>
    %8 = arith.truncf %7 : vector<64x16xf32> to vector<64x16xbf16>
    %c0_4 = arith.constant 0 : index
    %c0_5 = arith.constant 0 : index
    %9 = vector.load %arg5[%c0_4, %c0_5] : memref<16x16xbf16, #tpu.memory_space<vmem>>, vector<16x16xbf16>
    %cst = arith.constant dense<0.000000e+00> : vector<64x16xf32>
    %10 = tpu.matmul %8, %9, %cst {dimension_numbers = #tpu.dot_dimension_numbers<[1], [0], [0], [1], [0, 0, 1, 1], [], []>} : vector<64x16xbf16>, vector<16x16xbf16>, vector<64x16xf32> -> vector<64x16xf32>
    %c0_6 = arith.constant 0 : index
    %c0_7 = arith.constant 0 : index
    %11 = vector.load %arg6[%c0_6, %c0_7] : memref<1x16xf32, #tpu.memory_space<vmem>>, vector<1x16xf32>
    %12 = vector.broadcast %11 : vector<1x16xf32> to vector<64x16xf32>
    %13 = arith.addf %10, %12 : vector<64x16xf32>
    %cst_8 = arith.constant 0.000000e+00 : f32
    %14 = vector.broadcast %cst_8 : f32 to vector<64x16xf32>
    %15 = arith.maximumf %13, %14 : vector<64x16xf32>
    %c0_9 = arith.constant 0 : index
    %c0_10 = arith.constant 0 : index
    %c0_11 = arith.constant 0 : index
    %16 = vector.load %arg3[%c0_9, %c0_10, %c0_11] : memref<1x8x32xf32, #tpu.memory_space<vmem>>, vector<1x8x32xf32>
    %17 = vector.shape_cast %16 : vector<1x8x32xf32> to vector<8x32xf32>
    %c0_12 = arith.constant 0 : index
    %c0_13 = arith.constant 0 : index
    %c0_14 = arith.constant 0 : index
    %18 = vector.load %arg4[%c0_12, %c0_13, %c0_14] : memref<1x1x8xf32, #tpu.memory_space<vmem>>, vector<1x1x8xf32>
    %19 = vector.shape_cast %18 : vector<1x1x8xf32> to vector<1x8xf32>
    %c0_15 = arith.constant 0 : index
    %c0_16 = arith.constant 0 : index
    %20 = vector.load %arg7[%c0_15, %c0_16] : memref<16x16xbf16, #tpu.memory_space<vmem>>, vector<16x16xbf16>
    %c0_17 = arith.constant 0 : index
    %c0_18 = arith.constant 0 : index
    %21 = vector.load %arg8[%c0_17, %c0_18] : memref<1x16xf32, #tpu.memory_space<vmem>>, vector<1x16xf32>
    %c0_19 = arith.constant 0 : index
    %c0_20 = arith.constant 0 : index
    %22 = vector.load %arg9[%c0_19, %c0_20] : memref<16x16xbf16, #tpu.memory_space<vmem>>, vector<16x16xbf16>
    %c0_21 = arith.constant 0 : index
    %c0_22 = arith.constant 0 : index
    %23 = vector.load %arg10[%c0_21, %c0_22] : memref<1x16xf32, #tpu.memory_space<vmem>>, vector<1x16xf32>
    %24 = arith.truncf %15 : vector<64x16xf32> to vector<64x16xbf16>
    %cst_23 = arith.constant dense<0.000000e+00> : vector<64x16xf32>
    %25 = tpu.matmul %24, %20, %cst_23 {dimension_numbers = #tpu.dot_dimension_numbers<[1], [0], [0], [1], [0, 0, 1, 1], [], []>} : vector<64x16xbf16>, vector<16x16xbf16>, vector<64x16xf32> -> vector<64x16xf32>
    %26 = vector.broadcast %21 : vector<1x16xf32> to vector<64x16xf32>
    %27 = arith.addf %25, %26 : vector<64x16xf32>
    %cst_24 = arith.constant 2.500000e-01 : f32
    %28 = vector.broadcast %cst_24 : f32 to vector<64x16xf32>
    %29 = arith.mulf %27, %28 : vector<64x16xf32>
    %30 = vector.extract_strided_slice %17 {offsets = [0, 0], sizes = [8, 16], strides = [1, 1]} : vector<8x32xf32> to vector<8x16xf32>
    %31 = vector.extract_strided_slice %17 {offsets = [0, 16], sizes = [8, 16], strides = [1, 1]} : vector<8x32xf32> to vector<8x16xf32>
    %32 = arith.truncf %29 : vector<64x16xf32> to vector<64x16xbf16>
    %33 = arith.truncf %30 : vector<8x16xf32> to vector<8x16xbf16>
    %cst_25 = arith.constant dense<0.000000e+00> : vector<64x8xf32>
    %34 = tpu.matmul %32, %33, %cst_25 {dimension_numbers = #tpu.dot_dimension_numbers<[1], [1], [0], [0], [0, 0, 1, 0], [], []>} : vector<64x16xbf16>, vector<8x16xbf16>, vector<64x8xf32> -> vector<64x8xf32>
    %cst_26 = arith.constant 5.000000e-01 : f32
    %35 = vector.broadcast %cst_26 : f32 to vector<1x8xf32>
    %36 = arith.cmpf ogt, %19, %35 : vector<1x8xf32>
    %cst_27 = arith.constant -1.000000e+09 : f32
    %37 = vector.shape_cast %36 : vector<1x8xi1> to vector<1x8xi1>
    %38 = vector.broadcast %37 : vector<1x8xi1> to vector<64x8xi1>
    %39 = vector.broadcast %cst_27 : f32 to vector<64x8xf32>
    %40 = arith.select %38, %34, %39 : vector<64x8xi1>, vector<64x8xf32>
    %cst_28 = arith.constant dense<0xFF800000> : vector<64xf32>
    %41 = vector.multi_reduction <maximumf>, %40, %cst_28 [1] : vector<64x8xf32> to vector<64xf32>
    %42 = vector.shape_cast %41 : vector<64xf32> to vector<64x1xf32>
    %43 = vector.broadcast %42 : vector<64x1xf32> to vector<64x8xf32>
    %44 = arith.subf %40, %43 : vector<64x8xf32>
    %45 = math.exp %44 : vector<64x8xf32>
    %cst_29 = arith.constant dense<0.000000e+00> : vector<64xf32>
    %46 = vector.multi_reduction <add>, %45, %cst_29 [1] : vector<64x8xf32> to vector<64xf32>
    %47 = vector.shape_cast %46 : vector<64xf32> to vector<64x1xf32>
    %48 = tpu.reciprocal %47 {approx = true} : vector<64x1xf32> -> vector<64x1xf32>
    %49 = vector.broadcast %48 : vector<64x1xf32> to vector<64x8xf32>
    %50 = arith.mulf %45, %49 : vector<64x8xf32>
    %51 = arith.truncf %50 : vector<64x8xf32> to vector<64x8xbf16>
    %52 = arith.truncf %31 : vector<8x16xf32> to vector<8x16xbf16>
    %cst_30 = arith.constant dense<0.000000e+00> : vector<64x16xf32>
    %53 = tpu.matmul %51, %52, %cst_30 {dimension_numbers = #tpu.dot_dimension_numbers<[1], [0], [0], [1], [0, 0, 1, 1], [], []>} : vector<64x8xbf16>, vector<8x16xbf16>, vector<64x16xf32> -> vector<64x16xf32>
    %54 = arith.truncf %53 : vector<64x16xf32> to vector<64x16xbf16>
    %cst_31 = arith.constant dense<0.000000e+00> : vector<64x16xf32>
    %55 = tpu.matmul %54, %22, %cst_31 {dimension_numbers = #tpu.dot_dimension_numbers<[1], [0], [0], [1], [0, 0, 1, 1], [], []>} : vector<64x16xbf16>, vector<16x16xbf16>, vector<64x16xf32> -> vector<64x16xf32>
    %56 = vector.broadcast %23 : vector<1x16xf32> to vector<64x16xf32>
    %57 = arith.addf %55, %56 : vector<64x16xf32>
    %58 = arith.addf %15, %57 : vector<64x16xf32>
    %59 = vector.shape_cast %58 : vector<64x16xf32> to vector<8x8x16xf32>
    %c0_32 = arith.constant 0 : index
    %c0_33 = arith.constant 0 : index
    %c0_34 = arith.constant 0 : index
    %c0_35 = arith.constant 0 : index
    %60 = vector.load %arg11[%c0_32, %c0_33, %c0_34, %c0_35] : memref<1x8x8x16xf32, #tpu.memory_space<vmem>>, vector<1x8x8x16xf32>
    %61 = vector.shape_cast %60 : vector<1x8x8x16xf32> to vector<8x8x16xf32>
    %62 = vector.shape_cast %59 : vector<8x8x16xf32> to vector<1x8x8x16xf32>
    tpu.vector_store %arg11[%c0_32, %c0_33, %c0_34, %c0_35], %62 {strides = array<i32>} : memref<1x8x8x16xf32, #tpu.memory_space<vmem>>, vector<1x8x8x16xf32>,
    return
  }
  func.func @transform_0(%arg0: i32, %arg1: i32) -> (i32, i32, i32, i32, i32) {
    %c0_i32 = arith.constant 0 : i32
    %c0_i32_0 = arith.constant 0 : i32
    %c0_i32_1 = arith.constant 0 : i32
    %c0_i32_2 = arith.constant 0 : i32
    return %arg0, %arg1, %c0_i32, %c0_i32_0, %c0_i32_1 : i32, i32, i32, i32, i32
  }
  func.func @transform_1(%arg0: i32, %arg1: i32) -> (i32, i32, i32) {
    %c0_i32 = arith.constant 0 : i32
    %c0_i32_0 = arith.constant 0 : i32
    %c0_i32_1 = arith.constant 0 : i32
    return %arg0, %c0_i32, %c0_i32_0 : i32, i32, i32
  }
  func.func @transform_2(%arg0: i32, %arg1: i32) -> (i32, i32, i32) {
    %c0_i32 = arith.constant 0 : i32
    %c0_i32_0 = arith.constant 0 : i32
    %c0_i32_1 = arith.constant 0 : i32
    return %arg0, %c0_i32, %c0_i32_0 : i32, i32, i32
  }
  func.func @transform_3(%arg0: i32, %arg1: i32) -> (i32, i32) {
    %c0_i32 = arith.constant 0 : i32
    %c0_i32_0 = arith.constant 0 : i32
    %c0_i32_1 = arith.constant 0 : i32
    return %c0_i32, %c0_i32_0 : i32, i32
  }
  func.func @transform_4(%arg0: i32, %arg1: i32) -> (i32, i32) {
    %c0_i32 = arith.constant 0 : i32
    %c0_i32_0 = arith.constant 0 : i32
    %c0_i32_1 = arith.constant 0 : i32
    return %c0_i32, %c0_i32_0 : i32, i32
  }
  func.func @transform_5(%arg0: i32, %arg1: i32) -> (i32, i32) {
    %c0_i32 = arith.constant 0 : i32
    %c0_i32_0 = arith.constant 0 : i32
    %c0_i32_1 = arith.constant 0 : i32
    return %c0_i32, %c0_i32_0 : i32, i32
  }
  func.func @transform_6(%arg0: i32, %arg1: i32) -> (i32, i32) {
    %c0_i32 = arith.constant 0 : i32
    %c0_i32_0 = arith.constant 0 : i32
    %c0_i32_1 = arith.constant 0 : i32
    return %c0_i32, %c0_i32_0 : i32, i32
  }
  func.func @transform_7(%arg0: i32, %arg1: i32) -> (i32, i32) {
    %c0_i32 = arith.constant 0 : i32
    %c0_i32_0 = arith.constant 0 : i32
    %c0_i32_1 = arith.constant 0 : i32
    return %c0_i32, %c0_i32_0 : i32, i32
  }
  func.func @transform_8(%arg0: i32, %arg1: i32) -> (i32, i32) {
    %c0_i32 = arith.constant 0 : i32
    %c0_i32_0 = arith.constant 0 : i32
    %c0_i32_1 = arith.constant 0 : i32
    return %c0_i32, %c0_i32_0 : i32, i32
  }
  func.func @transform_9(%arg0: i32, %arg1: i32) -> (i32, i32, i32, i32) {
    %c0_i32 = arith.constant 0 : i32
    %c0_i32_0 = arith.constant 0 : i32
    %c0_i32_1 = arith.constant 0 : i32
    return %arg0, %arg1, %c0_i32, %c0_i32_0 : i32, i32, i32, i32
  }
}

module attributes {stable_mosaic.version = 11 : i64} {
  func.func @_kv_kernel(%arg0: memref<16x32xf32, #tpu.memory_space<vmem>>, %arg1: memref<32x64xbf16, #tpu.memory_space<vmem>>, %arg2: memref<1x64xf32, #tpu.memory_space<vmem>>, %arg3: memref<16x64xf32, #tpu.memory_space<vmem>>) attributes {dimension_semantics = [], scalar_prefetch = 0 : i64, scratch_operands = 0 : i64, tpu.core_type = #tpu.core_type<tc>} {
    %c0 = arith.constant 0 : index
    %c0_0 = arith.constant 0 : index
    %0 = vector.load %arg0[%c0, %c0_0] : memref<16x32xf32, #tpu.memory_space<vmem>>, vector<16x32xf32>
    %1 = arith.truncf %0 : vector<16x32xf32> to vector<16x32xbf16>
    %c0_1 = arith.constant 0 : index
    %c0_2 = arith.constant 0 : index
    %2 = vector.load %arg1[%c0_1, %c0_2] : memref<32x64xbf16, #tpu.memory_space<vmem>>, vector<32x64xbf16>
    %cst = arith.constant dense<0.000000e+00> : vector<16x64xf32>
    %3 = tpu.matmul %1, %2, %cst {dimension_numbers = #tpu.dot_dimension_numbers<[1], [0], [0], [1], [0, 0, 1, 1], [], []>} : vector<16x32xbf16>, vector<32x64xbf16>, vector<16x64xf32> -> vector<16x64xf32>
    %c0_3 = arith.constant 0 : index
    %c0_4 = arith.constant 0 : index
    %4 = vector.load %arg2[%c0_3, %c0_4] : memref<1x64xf32, #tpu.memory_space<vmem>>, vector<1x64xf32>
    %5 = vector.broadcast %4 : vector<1x64xf32> to vector<16x64xf32>
    %6 = arith.addf %3, %5 : vector<16x64xf32>
    %c0_5 = arith.constant 0 : index
    %c0_6 = arith.constant 0 : index
    %7 = vector.load %arg3[%c0_5, %c0_6] : memref<16x64xf32, #tpu.memory_space<vmem>>, vector<16x64xf32>
    tpu.vector_store %arg3[%c0_5, %c0_6], %6 {strides = array<i32>} : memref<16x64xf32, #tpu.memory_space<vmem>>, vector<16x64xf32>,
    return
  }
}

module attributes {stable_mosaic.version = 11 : i64} {
  func.func @_kv_kernel(%arg0: memref<16x32xf32, #tpu.memory_space<vmem>>, %arg1: memref<32x128xbf16, #tpu.memory_space<vmem>>, %arg2: memref<1x128xf32, #tpu.memory_space<vmem>>, %arg3: memref<16x128xf32, #tpu.memory_space<vmem>>) attributes {dimension_semantics = [], scalar_prefetch = 0 : i64, scratch_operands = 0 : i64, tpu.core_type = #tpu.core_type<tc>} {
    %c0 = arith.constant 0 : index
    %c0_0 = arith.constant 0 : index
    %0 = vector.load %arg0[%c0, %c0_0] : memref<16x32xf32, #tpu.memory_space<vmem>>, vector<16x32xf32>
    %1 = arith.truncf %0 : vector<16x32xf32> to vector<16x32xbf16>
    %c0_1 = arith.constant 0 : index
    %c0_2 = arith.constant 0 : index
    %2 = vector.load %arg1[%c0_1, %c0_2] : memref<32x128xbf16, #tpu.memory_space<vmem>>, vector<32x128xbf16>
    %cst = arith.constant dense<0.000000e+00> : vector<16x128xf32>
    %3 = tpu.matmul %1, %2, %cst {dimension_numbers = #tpu.dot_dimension_numbers<[1], [0], [0], [1], [0, 0, 1, 1], [], []>} : vector<16x32xbf16>, vector<32x128xbf16>, vector<16x128xf32> -> vector<16x128xf32>
    %c0_3 = arith.constant 0 : index
    %c0_4 = arith.constant 0 : index
    %4 = vector.load %arg2[%c0_3, %c0_4] : memref<1x128xf32, #tpu.memory_space<vmem>>, vector<1x128xf32>
    %5 = vector.broadcast %4 : vector<1x128xf32> to vector<16x128xf32>
    %6 = arith.addf %3, %5 : vector<16x128xf32>
    %c0_5 = arith.constant 0 : index
    %c0_6 = arith.constant 0 : index
    %7 = vector.load %arg3[%c0_5, %c0_6] : memref<16x128xf32, #tpu.memory_space<vmem>>, vector<16x128xf32>
    tpu.vector_store %arg3[%c0_5, %c0_6], %6 {strides = array<i32>} : memref<16x128xf32, #tpu.memory_space<vmem>>, vector<16x128xf32>,
    return
  }
}

module attributes {stable_mosaic.version = 11 : i64} {
  func.func @_stage_kernel(%arg0: i32, %arg1: i32, %arg2: memref<1x4x2x4x32xf32, #tpu.memory_space<vmem>>, %arg3: memref<1x8x64xf32, #tpu.memory_space<vmem>>, %arg4: memref<1x1x8xf32, #tpu.memory_space<vmem>>, %arg5: memref<64x32xbf16, #tpu.memory_space<vmem>>, %arg6: memref<1x32xf32, #tpu.memory_space<vmem>>, %arg7: memref<32x32xbf16, #tpu.memory_space<vmem>>, %arg8: memref<1x32xf32, #tpu.memory_space<vmem>>, %arg9: memref<32x32xbf16, #tpu.memory_space<vmem>>, %arg10: memref<1x32xf32, #tpu.memory_space<vmem>>, %arg11: memref<1x4x4x32xf32, #tpu.memory_space<vmem>>) attributes {dimension_semantics = [#tpu.dimension_semantics<parallel>, #tpu.dimension_semantics<parallel>], iteration_bounds = array<i64: 2, 1>, scalar_prefetch = 0 : i64, scratch_operands = 0 : i64, tpu.core_type = #tpu.core_type<tc>, window_params = [{transform_indices = @transform_0, window_bounds = array<i64: 1, 4, 2, 4, 32>}, {transform_indices = @transform_1, window_bounds = array<i64: 1, 8, 64>}, {transform_indices = @transform_2, window_bounds = array<i64: 1, 1, 8>}, {pipeline_mode = #tpu.pipeline_mode<synchronous>, transform_indices = @transform_3, window_bounds = array<i64: 64, 32>}, {pipeline_mode = #tpu.pipeline_mode<synchronous>, transform_indices = @transform_4, window_bounds = array<i64: 1, 32>}, {pipeline_mode = #tpu.pipeline_mode<synchronous>, transform_indices = @transform_5, window_bounds = array<i64: 32, 32>}, {pipeline_mode = #tpu.pipeline_mode<synchronous>, transform_indices = @transform_6, window_bounds = array<i64: 1, 32>}, {pipeline_mode = #tpu.pipeline_mode<synchronous>, transform_indices = @transform_7, window_bounds = array<i64: 32, 32>}, {pipeline_mode = #tpu.pipeline_mode<synchronous>, transform_indices = @transform_8, window_bounds = array<i64: 1, 32>}, {transform_indices = @transform_9, window_bounds = array<i64: 1, 4, 4, 32>}]} {
    %c0 = arith.constant 0 : index
    %c0_0 = arith.constant 0 : index
    %c0_1 = arith.constant 0 : index
    %c0_2 = arith.constant 0 : index
    %c0_3 = arith.constant 0 : index
    %0 = vector.load %arg2[%c0, %c0_0, %c0_1, %c0_2, %c0_3] : memref<1x4x2x4x32xf32, #tpu.memory_space<vmem>>, vector<1x4x2x4x32xf32>
    %1 = vector.shape_cast %0 : vector<1x4x2x4x32xf32> to vector<4x2x4x32xf32>
    %2 = vector.extract_strided_slice %1 {offsets = [0, 0, 0, 0], sizes = [4, 1, 4, 32], strides = [1, 1, 1, 1]} : vector<4x2x4x32xf32> to vector<4x1x4x32xf32>
    %3 = vector.shape_cast %2 : vector<4x1x4x32xf32> to vector<4x4x32xf32>
    %4 = vector.extract_strided_slice %1 {offsets = [0, 1, 0, 0], sizes = [4, 1, 4, 32], strides = [1, 1, 1, 1]} : vector<4x2x4x32xf32> to vector<4x1x4x32xf32>
    %5 = vector.shape_cast %4 : vector<4x1x4x32xf32> to vector<4x4x32xf32>
    %6 = tpu.concatenate %3, %5 in 2 : vector<4x4x32xf32>, vector<4x4x32xf32> -> vector<4x4x64xf32>
    %7 = vector.shape_cast %6 : vector<4x4x64xf32> to vector<16x64xf32>
    %8 = arith.truncf %7 : vector<16x64xf32> to vector<16x64xbf16>
    %c0_4 = arith.constant 0 : index
    %c0_5 = arith.constant 0 : index
    %9 = vector.load %arg5[%c0_4, %c0_5] : memref<64x32xbf16, #tpu.memory_space<vmem>>, vector<64x32xbf16>
    %cst = arith.constant dense<0.000000e+00> : vector<16x32xf32>
    %10 = tpu.matmul %8, %9, %cst {dimension_numbers = #tpu.dot_dimension_numbers<[1], [0], [0], [1], [0, 0, 1, 1], [], []>} : vector<16x64xbf16>, vector<64x32xbf16>, vector<16x32xf32> -> vector<16x32xf32>
    %c0_6 = arith.constant 0 : index
    %c0_7 = arith.constant 0 : index
    %11 = vector.load %arg6[%c0_6, %c0_7] : memref<1x32xf32, #tpu.memory_space<vmem>>, vector<1x32xf32>
    %12 = vector.broadcast %11 : vector<1x32xf32> to vector<16x32xf32>
    %13 = arith.addf %10, %12 : vector<16x32xf32>
    %cst_8 = arith.constant 0.000000e+00 : f32
    %14 = vector.broadcast %cst_8 : f32 to vector<16x32xf32>
    %15 = arith.maximumf %13, %14 : vector<16x32xf32>
    %c0_9 = arith.constant 0 : index
    %c0_10 = arith.constant 0 : index
    %c0_11 = arith.constant 0 : index
    %16 = vector.load %arg3[%c0_9, %c0_10, %c0_11] : memref<1x8x64xf32, #tpu.memory_space<vmem>>, vector<1x8x64xf32>
    %17 = vector.shape_cast %16 : vector<1x8x64xf32> to vector<8x64xf32>
    %c0_12 = arith.constant 0 : index
    %c0_13 = arith.constant 0 : index
    %c0_14 = arith.constant 0 : index
    %18 = vector.load %arg4[%c0_12, %c0_13, %c0_14] : memref<1x1x8xf32, #tpu.memory_space<vmem>>, vector<1x1x8xf32>
    %19 = vector.shape_cast %18 : vector<1x1x8xf32> to vector<1x8xf32>
    %c0_15 = arith.constant 0 : index
    %c0_16 = arith.constant 0 : index
    %20 = vector.load %arg7[%c0_15, %c0_16] : memref<32x32xbf16, #tpu.memory_space<vmem>>, vector<32x32xbf16>
    %c0_17 = arith.constant 0 : index
    %c0_18 = arith.constant 0 : index
    %21 = vector.load %arg8[%c0_17, %c0_18] : memref<1x32xf32, #tpu.memory_space<vmem>>, vector<1x32xf32>
    %c0_19 = arith.constant 0 : index
    %c0_20 = arith.constant 0 : index
    %22 = vector.load %arg9[%c0_19, %c0_20] : memref<32x32xbf16, #tpu.memory_space<vmem>>, vector<32x32xbf16>
    %c0_21 = arith.constant 0 : index
    %c0_22 = arith.constant 0 : index
    %23 = vector.load %arg10[%c0_21, %c0_22] : memref<1x32xf32, #tpu.memory_space<vmem>>, vector<1x32xf32>
    %24 = arith.truncf %15 : vector<16x32xf32> to vector<16x32xbf16>
    %cst_23 = arith.constant dense<0.000000e+00> : vector<16x32xf32>
    %25 = tpu.matmul %24, %20, %cst_23 {dimension_numbers = #tpu.dot_dimension_numbers<[1], [0], [0], [1], [0, 0, 1, 1], [], []>} : vector<16x32xbf16>, vector<32x32xbf16>, vector<16x32xf32> -> vector<16x32xf32>
    %26 = vector.broadcast %21 : vector<1x32xf32> to vector<16x32xf32>
    %27 = arith.addf %25, %26 : vector<16x32xf32>
    %cst_24 = arith.constant 0.176776692 : f32
    %28 = vector.broadcast %cst_24 : f32 to vector<16x32xf32>
    %29 = arith.mulf %27, %28 : vector<16x32xf32>
    %30 = vector.extract_strided_slice %17 {offsets = [0, 0], sizes = [8, 32], strides = [1, 1]} : vector<8x64xf32> to vector<8x32xf32>
    %31 = vector.extract_strided_slice %17 {offsets = [0, 32], sizes = [8, 32], strides = [1, 1]} : vector<8x64xf32> to vector<8x32xf32>
    %32 = arith.truncf %29 : vector<16x32xf32> to vector<16x32xbf16>
    %33 = arith.truncf %30 : vector<8x32xf32> to vector<8x32xbf16>
    %cst_25 = arith.constant dense<0.000000e+00> : vector<16x8xf32>
    %34 = tpu.matmul %32, %33, %cst_25 {dimension_numbers = #tpu.dot_dimension_numbers<[1], [1], [0], [0], [0, 0, 1, 0], [], []>} : vector<16x32xbf16>, vector<8x32xbf16>, vector<16x8xf32> -> vector<16x8xf32>
    %cst_26 = arith.constant 5.000000e-01 : f32
    %35 = vector.broadcast %cst_26 : f32 to vector<1x8xf32>
    %36 = arith.cmpf ogt, %19, %35 : vector<1x8xf32>
    %cst_27 = arith.constant -1.000000e+09 : f32
    %37 = vector.shape_cast %36 : vector<1x8xi1> to vector<1x8xi1>
    %38 = vector.broadcast %37 : vector<1x8xi1> to vector<16x8xi1>
    %39 = vector.broadcast %cst_27 : f32 to vector<16x8xf32>
    %40 = arith.select %38, %34, %39 : vector<16x8xi1>, vector<16x8xf32>
    %cst_28 = arith.constant dense<0xFF800000> : vector<16xf32>
    %41 = vector.multi_reduction <maximumf>, %40, %cst_28 [1] : vector<16x8xf32> to vector<16xf32>
    %42 = vector.shape_cast %41 : vector<16xf32> to vector<16x1xf32>
    %43 = vector.broadcast %42 : vector<16x1xf32> to vector<16x8xf32>
    %44 = arith.subf %40, %43 : vector<16x8xf32>
    %45 = math.exp %44 : vector<16x8xf32>
    %cst_29 = arith.constant dense<0.000000e+00> : vector<16xf32>
    %46 = vector.multi_reduction <add>, %45, %cst_29 [1] : vector<16x8xf32> to vector<16xf32>
    %47 = vector.shape_cast %46 : vector<16xf32> to vector<16x1xf32>
    %48 = tpu.reciprocal %47 {approx = true} : vector<16x1xf32> -> vector<16x1xf32>
    %49 = vector.broadcast %48 : vector<16x1xf32> to vector<16x8xf32>
    %50 = arith.mulf %45, %49 : vector<16x8xf32>
    %51 = arith.truncf %50 : vector<16x8xf32> to vector<16x8xbf16>
    %52 = arith.truncf %31 : vector<8x32xf32> to vector<8x32xbf16>
    %cst_30 = arith.constant dense<0.000000e+00> : vector<16x32xf32>
    %53 = tpu.matmul %51, %52, %cst_30 {dimension_numbers = #tpu.dot_dimension_numbers<[1], [0], [0], [1], [0, 0, 1, 1], [], []>} : vector<16x8xbf16>, vector<8x32xbf16>, vector<16x32xf32> -> vector<16x32xf32>
    %54 = arith.truncf %53 : vector<16x32xf32> to vector<16x32xbf16>
    %cst_31 = arith.constant dense<0.000000e+00> : vector<16x32xf32>
    %55 = tpu.matmul %54, %22, %cst_31 {dimension_numbers = #tpu.dot_dimension_numbers<[1], [0], [0], [1], [0, 0, 1, 1], [], []>} : vector<16x32xbf16>, vector<32x32xbf16>, vector<16x32xf32> -> vector<16x32xf32>
    %56 = vector.broadcast %23 : vector<1x32xf32> to vector<16x32xf32>
    %57 = arith.addf %55, %56 : vector<16x32xf32>
    %58 = arith.addf %15, %57 : vector<16x32xf32>
    %59 = vector.shape_cast %58 : vector<16x32xf32> to vector<4x4x32xf32>
    %c0_32 = arith.constant 0 : index
    %c0_33 = arith.constant 0 : index
    %c0_34 = arith.constant 0 : index
    %c0_35 = arith.constant 0 : index
    %60 = vector.load %arg11[%c0_32, %c0_33, %c0_34, %c0_35] : memref<1x4x4x32xf32, #tpu.memory_space<vmem>>, vector<1x4x4x32xf32>
    %61 = vector.shape_cast %60 : vector<1x4x4x32xf32> to vector<4x4x32xf32>
    %62 = vector.shape_cast %59 : vector<4x4x32xf32> to vector<1x4x4x32xf32>
    tpu.vector_store %arg11[%c0_32, %c0_33, %c0_34, %c0_35], %62 {strides = array<i32>} : memref<1x4x4x32xf32, #tpu.memory_space<vmem>>, vector<1x4x4x32xf32>,
    return
  }
  func.func @transform_0(%arg0: i32, %arg1: i32) -> (i32, i32, i32, i32, i32) {
    %c0_i32 = arith.constant 0 : i32
    %c0_i32_0 = arith.constant 0 : i32
    %c0_i32_1 = arith.constant 0 : i32
    %c0_i32_2 = arith.constant 0 : i32
    return %arg0, %arg1, %c0_i32, %c0_i32_0, %c0_i32_1 : i32, i32, i32, i32, i32
  }
  func.func @transform_1(%arg0: i32, %arg1: i32) -> (i32, i32, i32) {
    %c0_i32 = arith.constant 0 : i32
    %c0_i32_0 = arith.constant 0 : i32
    %c0_i32_1 = arith.constant 0 : i32
    return %arg0, %c0_i32, %c0_i32_0 : i32, i32, i32
  }
  func.func @transform_2(%arg0: i32, %arg1: i32) -> (i32, i32, i32) {
    %c0_i32 = arith.constant 0 : i32
    %c0_i32_0 = arith.constant 0 : i32
    %c0_i32_1 = arith.constant 0 : i32
    return %arg0, %c0_i32, %c0_i32_0 : i32, i32, i32
  }
  func.func @transform_3(%arg0: i32, %arg1: i32) -> (i32, i32) {
    %c0_i32 = arith.constant 0 : i32
    %c0_i32_0 = arith.constant 0 : i32
    %c0_i32_1 = arith.constant 0 : i32
    return %c0_i32, %c0_i32_0 : i32, i32
  }
  func.func @transform_4(%arg0: i32, %arg1: i32) -> (i32, i32) {
    %c0_i32 = arith.constant 0 : i32
    %c0_i32_0 = arith.constant 0 : i32
    %c0_i32_1 = arith.constant 0 : i32
    return %c0_i32, %c0_i32_0 : i32, i32
  }
  func.func @transform_5(%arg0: i32, %arg1: i32) -> (i32, i32) {
    %c0_i32 = arith.constant 0 : i32
    %c0_i32_0 = arith.constant 0 : i32
    %c0_i32_1 = arith.constant 0 : i32
    return %c0_i32, %c0_i32_0 : i32, i32
  }
  func.func @transform_6(%arg0: i32, %arg1: i32) -> (i32, i32) {
    %c0_i32 = arith.constant 0 : i32
    %c0_i32_0 = arith.constant 0 : i32
    %c0_i32_1 = arith.constant 0 : i32
    return %c0_i32, %c0_i32_0 : i32, i32
  }
  func.func @transform_7(%arg0: i32, %arg1: i32) -> (i32, i32) {
    %c0_i32 = arith.constant 0 : i32
    %c0_i32_0 = arith.constant 0 : i32
    %c0_i32_1 = arith.constant 0 : i32
    return %c0_i32, %c0_i32_0 : i32, i32
  }
  func.func @transform_8(%arg0: i32, %arg1: i32) -> (i32, i32) {
    %c0_i32 = arith.constant 0 : i32
    %c0_i32_0 = arith.constant 0 : i32
    %c0_i32_1 = arith.constant 0 : i32
    return %c0_i32, %c0_i32_0 : i32, i32
  }
  func.func @transform_9(%arg0: i32, %arg1: i32) -> (i32, i32, i32, i32) {
    %c0_i32 = arith.constant 0 : i32
    %c0_i32_0 = arith.constant 0 : i32
    %c0_i32_1 = arith.constant 0 : i32
    return %arg0, %arg1, %c0_i32, %c0_i32_0 : i32, i32, i32, i32
  }
}

module attributes {stable_mosaic.version = 11 : i64} {
  func.func @_stage_kernel(%arg0: i32, %arg1: i32, %arg2: memref<1x2x2x2x64xf32, #tpu.memory_space<vmem>>, %arg3: memref<1x8x128xf32, #tpu.memory_space<vmem>>, %arg4: memref<1x1x8xf32, #tpu.memory_space<vmem>>, %arg5: memref<128x64xbf16, #tpu.memory_space<vmem>>, %arg6: memref<1x64xf32, #tpu.memory_space<vmem>>, %arg7: memref<64x64xbf16, #tpu.memory_space<vmem>>, %arg8: memref<1x64xf32, #tpu.memory_space<vmem>>, %arg9: memref<64x64xbf16, #tpu.memory_space<vmem>>, %arg10: memref<1x64xf32, #tpu.memory_space<vmem>>, %arg11: memref<1x2x2x64xf32, #tpu.memory_space<vmem>>) attributes {dimension_semantics = [#tpu.dimension_semantics<parallel>, #tpu.dimension_semantics<parallel>], iteration_bounds = array<i64: 2, 1>, scalar_prefetch = 0 : i64, scratch_operands = 0 : i64, tpu.core_type = #tpu.core_type<tc>, window_params = [{transform_indices = @transform_0, window_bounds = array<i64: 1, 2, 2, 2, 64>}, {transform_indices = @transform_1, window_bounds = array<i64: 1, 8, 128>}, {transform_indices = @transform_2, window_bounds = array<i64: 1, 1, 8>}, {pipeline_mode = #tpu.pipeline_mode<synchronous>, transform_indices = @transform_3, window_bounds = array<i64: 128, 64>}, {pipeline_mode = #tpu.pipeline_mode<synchronous>, transform_indices = @transform_4, window_bounds = array<i64: 1, 64>}, {pipeline_mode = #tpu.pipeline_mode<synchronous>, transform_indices = @transform_5, window_bounds = array<i64: 64, 64>}, {pipeline_mode = #tpu.pipeline_mode<synchronous>, transform_indices = @transform_6, window_bounds = array<i64: 1, 64>}, {pipeline_mode = #tpu.pipeline_mode<synchronous>, transform_indices = @transform_7, window_bounds = array<i64: 64, 64>}, {pipeline_mode = #tpu.pipeline_mode<synchronous>, transform_indices = @transform_8, window_bounds = array<i64: 1, 64>}, {transform_indices = @transform_9, window_bounds = array<i64: 1, 2, 2, 64>}]} {
    %c0 = arith.constant 0 : index
    %c0_0 = arith.constant 0 : index
    %c0_1 = arith.constant 0 : index
    %c0_2 = arith.constant 0 : index
    %c0_3 = arith.constant 0 : index
    %0 = vector.load %arg2[%c0, %c0_0, %c0_1, %c0_2, %c0_3] : memref<1x2x2x2x64xf32, #tpu.memory_space<vmem>>, vector<1x2x2x2x64xf32>
    %1 = vector.shape_cast %0 : vector<1x2x2x2x64xf32> to vector<2x2x2x64xf32>
    %2 = vector.extract_strided_slice %1 {offsets = [0, 0, 0, 0], sizes = [2, 1, 2, 64], strides = [1, 1, 1, 1]} : vector<2x2x2x64xf32> to vector<2x1x2x64xf32>
    %3 = vector.shape_cast %2 : vector<2x1x2x64xf32> to vector<2x2x64xf32>
    %4 = vector.extract_strided_slice %1 {offsets = [0, 1, 0, 0], sizes = [2, 1, 2, 64], strides = [1, 1, 1, 1]} : vector<2x2x2x64xf32> to vector<2x1x2x64xf32>
    %5 = vector.shape_cast %4 : vector<2x1x2x64xf32> to vector<2x2x64xf32>
    %6 = tpu.concatenate %3, %5 in 2 : vector<2x2x64xf32>, vector<2x2x64xf32> -> vector<2x2x128xf32>
    %7 = vector.shape_cast %6 : vector<2x2x128xf32> to vector<4x128xf32>
    %8 = arith.truncf %7 : vector<4x128xf32> to vector<4x128xbf16>
    %c0_4 = arith.constant 0 : index
    %c0_5 = arith.constant 0 : index
    %9 = vector.load %arg5[%c0_4, %c0_5] : memref<128x64xbf16, #tpu.memory_space<vmem>>, vector<128x64xbf16>
    %cst = arith.constant dense<0.000000e+00> : vector<4x64xf32>
    %10 = tpu.matmul %8, %9, %cst {dimension_numbers = #tpu.dot_dimension_numbers<[1], [0], [0], [1], [0, 0, 1, 1], [], []>} : vector<4x128xbf16>, vector<128x64xbf16>, vector<4x64xf32> -> vector<4x64xf32>
    %c0_6 = arith.constant 0 : index
    %c0_7 = arith.constant 0 : index
    %11 = vector.load %arg6[%c0_6, %c0_7] : memref<1x64xf32, #tpu.memory_space<vmem>>, vector<1x64xf32>
    %12 = vector.broadcast %11 : vector<1x64xf32> to vector<4x64xf32>
    %13 = arith.addf %10, %12 : vector<4x64xf32>
    %cst_8 = arith.constant 0.000000e+00 : f32
    %14 = vector.broadcast %cst_8 : f32 to vector<4x64xf32>
    %15 = arith.maximumf %13, %14 : vector<4x64xf32>
    %c0_9 = arith.constant 0 : index
    %c0_10 = arith.constant 0 : index
    %c0_11 = arith.constant 0 : index
    %16 = vector.load %arg3[%c0_9, %c0_10, %c0_11] : memref<1x8x128xf32, #tpu.memory_space<vmem>>, vector<1x8x128xf32>
    %17 = vector.shape_cast %16 : vector<1x8x128xf32> to vector<8x128xf32>
    %c0_12 = arith.constant 0 : index
    %c0_13 = arith.constant 0 : index
    %c0_14 = arith.constant 0 : index
    %18 = vector.load %arg4[%c0_12, %c0_13, %c0_14] : memref<1x1x8xf32, #tpu.memory_space<vmem>>, vector<1x1x8xf32>
    %19 = vector.shape_cast %18 : vector<1x1x8xf32> to vector<1x8xf32>
    %c0_15 = arith.constant 0 : index
    %c0_16 = arith.constant 0 : index
    %20 = vector.load %arg7[%c0_15, %c0_16] : memref<64x64xbf16, #tpu.memory_space<vmem>>, vector<64x64xbf16>
    %c0_17 = arith.constant 0 : index
    %c0_18 = arith.constant 0 : index
    %21 = vector.load %arg8[%c0_17, %c0_18] : memref<1x64xf32, #tpu.memory_space<vmem>>, vector<1x64xf32>
    %c0_19 = arith.constant 0 : index
    %c0_20 = arith.constant 0 : index
    %22 = vector.load %arg9[%c0_19, %c0_20] : memref<64x64xbf16, #tpu.memory_space<vmem>>, vector<64x64xbf16>
    %c0_21 = arith.constant 0 : index
    %c0_22 = arith.constant 0 : index
    %23 = vector.load %arg10[%c0_21, %c0_22] : memref<1x64xf32, #tpu.memory_space<vmem>>, vector<1x64xf32>
    %24 = arith.truncf %15 : vector<4x64xf32> to vector<4x64xbf16>
    %cst_23 = arith.constant dense<0.000000e+00> : vector<4x64xf32>
    %25 = tpu.matmul %24, %20, %cst_23 {dimension_numbers = #tpu.dot_dimension_numbers<[1], [0], [0], [1], [0, 0, 1, 1], [], []>} : vector<4x64xbf16>, vector<64x64xbf16>, vector<4x64xf32> -> vector<4x64xf32>
    %26 = vector.broadcast %21 : vector<1x64xf32> to vector<4x64xf32>
    %27 = arith.addf %25, %26 : vector<4x64xf32>
    %cst_24 = arith.constant 1.250000e-01 : f32
    %28 = vector.broadcast %cst_24 : f32 to vector<4x64xf32>
    %29 = arith.mulf %27, %28 : vector<4x64xf32>
    %30 = vector.extract_strided_slice %17 {offsets = [0, 0], sizes = [8, 64], strides = [1, 1]} : vector<8x128xf32> to vector<8x64xf32>
    %31 = vector.extract_strided_slice %17 {offsets = [0, 64], sizes = [8, 64], strides = [1, 1]} : vector<8x128xf32> to vector<8x64xf32>
    %32 = arith.truncf %29 : vector<4x64xf32> to vector<4x64xbf16>
    %33 = arith.truncf %30 : vector<8x64xf32> to vector<8x64xbf16>
    %cst_25 = arith.constant dense<0.000000e+00> : vector<4x8xf32>
    %34 = tpu.matmul %32, %33, %cst_25 {dimension_numbers = #tpu.dot_dimension_numbers<[1], [1], [0], [0], [0, 0, 1, 0], [], []>} : vector<4x64xbf16>, vector<8x64xbf16>, vector<4x8xf32> -> vector<4x8xf32>
    %cst_26 = arith.constant 5.000000e-01 : f32
    %35 = vector.broadcast %cst_26 : f32 to vector<1x8xf32>
    %36 = arith.cmpf ogt, %19, %35 : vector<1x8xf32>
    %cst_27 = arith.constant -1.000000e+09 : f32
    %37 = vector.shape_cast %36 : vector<1x8xi1> to vector<1x8xi1>
    %38 = vector.broadcast %37 : vector<1x8xi1> to vector<4x8xi1>
    %39 = vector.broadcast %cst_27 : f32 to vector<4x8xf32>
    %40 = arith.select %38, %34, %39 : vector<4x8xi1>, vector<4x8xf32>
    %cst_28 = arith.constant dense<0xFF800000> : vector<4xf32>
    %41 = vector.multi_reduction <maximumf>, %40, %cst_28 [1] : vector<4x8xf32> to vector<4xf32>
    %42 = vector.shape_cast %41 : vector<4xf32> to vector<4x1xf32>
    %43 = vector.broadcast %42 : vector<4x1xf32> to vector<4x8xf32>
    %44 = arith.subf %40, %43 : vector<4x8xf32>
    %45 = math.exp %44 : vector<4x8xf32>
    %cst_29 = arith.constant dense<0.000000e+00> : vector<4xf32>
    %46 = vector.multi_reduction <add>, %45, %cst_29 [1] : vector<4x8xf32> to vector<4xf32>
    %47 = vector.shape_cast %46 : vector<4xf32> to vector<4x1xf32>
    %48 = tpu.reciprocal %47 {approx = true} : vector<4x1xf32> -> vector<4x1xf32>
    %49 = vector.broadcast %48 : vector<4x1xf32> to vector<4x8xf32>
    %50 = arith.mulf %45, %49 : vector<4x8xf32>
    %51 = arith.truncf %50 : vector<4x8xf32> to vector<4x8xbf16>
    %52 = arith.truncf %31 : vector<8x64xf32> to vector<8x64xbf16>
    %cst_30 = arith.constant dense<0.000000e+00> : vector<4x64xf32>
    %53 = tpu.matmul %51, %52, %cst_30 {dimension_numbers = #tpu.dot_dimension_numbers<[1], [0], [0], [1], [0, 0, 1, 1], [], []>} : vector<4x8xbf16>, vector<8x64xbf16>, vector<4x64xf32> -> vector<4x64xf32>
    %54 = arith.truncf %53 : vector<4x64xf32> to vector<4x64xbf16>
    %cst_31 = arith.constant dense<0.000000e+00> : vector<4x64xf32>
    %55 = tpu.matmul %54, %22, %cst_31 {dimension_numbers = #tpu.dot_dimension_numbers<[1], [0], [0], [1], [0, 0, 1, 1], [], []>} : vector<4x64xbf16>, vector<64x64xbf16>, vector<4x64xf32> -> vector<4x64xf32>
    %56 = vector.broadcast %23 : vector<1x64xf32> to vector<4x64xf32>
    %57 = arith.addf %55, %56 : vector<4x64xf32>
    %58 = arith.addf %15, %57 : vector<4x64xf32>
    %59 = vector.shape_cast %58 : vector<4x64xf32> to vector<2x2x64xf32>
    %c0_32 = arith.constant 0 : index
    %c0_33 = arith.constant 0 : index
    %c0_34 = arith.constant 0 : index
    %c0_35 = arith.constant 0 : index
    %60 = vector.load %arg11[%c0_32, %c0_33, %c0_34, %c0_35] : memref<1x2x2x64xf32, #tpu.memory_space<vmem>>, vector<1x2x2x64xf32>
    %61 = vector.shape_cast %60 : vector<1x2x2x64xf32> to vector<2x2x64xf32>
    %62 = vector.shape_cast %59 : vector<2x2x64xf32> to vector<1x2x2x64xf32>
    tpu.vector_store %arg11[%c0_32, %c0_33, %c0_34, %c0_35], %62 {strides = array<i32>} : memref<1x2x2x64xf32, #tpu.memory_space<vmem>>, vector<1x2x2x64xf32>,
    return
  }
  func.func @transform_0(%arg0: i32, %arg1: i32) -> (i32, i32, i32, i32, i32) {
    %c0_i32 = arith.constant 0 : i32
    %c0_i32_0 = arith.constant 0 : i32
    %c0_i32_1 = arith.constant 0 : i32
    %c0_i32_2 = arith.constant 0 : i32
    return %arg0, %arg1, %c0_i32, %c0_i32_0, %c0_i32_1 : i32, i32, i32, i32, i32
  }
  func.func @transform_1(%arg0: i32, %arg1: i32) -> (i32, i32, i32) {
    %c0_i32 = arith.constant 0 : i32
    %c0_i32_0 = arith.constant 0 : i32
    %c0_i32_1 = arith.constant 0 : i32
    return %arg0, %c0_i32, %c0_i32_0 : i32, i32, i32
  }
  func.func @transform_2(%arg0: i32, %arg1: i32) -> (i32, i32, i32) {
    %c0_i32 = arith.constant 0 : i32
    %c0_i32_0 = arith.constant 0 : i32
    %c0_i32_1 = arith.constant 0 : i32
    return %arg0, %c0_i32, %c0_i32_0 : i32, i32, i32
  }
  func.func @transform_3(%arg0: i32, %arg1: i32) -> (i32, i32) {
    %c0_i32 = arith.constant 0 : i32
    %c0_i32_0 = arith.constant 0 : i32
    %c0_i32_1 = arith.constant 0 : i32
    return %c0_i32, %c0_i32_0 : i32, i32
  }
  func.func @transform_4(%arg0: i32, %arg1: i32) -> (i32, i32) {
    %c0_i32 = arith.constant 0 : i32
    %c0_i32_0 = arith.constant 0 : i32
    %c0_i32_1 = arith.constant 0 : i32
    return %c0_i32, %c0_i32_0 : i32, i32
  }
  func.func @transform_5(%arg0: i32, %arg1: i32) -> (i32, i32) {
    %c0_i32 = arith.constant 0 : i32
    %c0_i32_0 = arith.constant 0 : i32
    %c0_i32_1 = arith.constant 0 : i32
    return %c0_i32, %c0_i32_0 : i32, i32
  }
  func.func @transform_6(%arg0: i32, %arg1: i32) -> (i32, i32) {
    %c0_i32 = arith.constant 0 : i32
    %c0_i32_0 = arith.constant 0 : i32
    %c0_i32_1 = arith.constant 0 : i32
    return %c0_i32, %c0_i32_0 : i32, i32
  }
  func.func @transform_7(%arg0: i32, %arg1: i32) -> (i32, i32) {
    %c0_i32 = arith.constant 0 : i32
    %c0_i32_0 = arith.constant 0 : i32
    %c0_i32_1 = arith.constant 0 : i32
    return %c0_i32, %c0_i32_0 : i32, i32
  }
  func.func @transform_8(%arg0: i32, %arg1: i32) -> (i32, i32) {
    %c0_i32 = arith.constant 0 : i32
    %c0_i32_0 = arith.constant 0 : i32
    %c0_i32_1 = arith.constant 0 : i32
    return %c0_i32, %c0_i32_0 : i32, i32
  }
  func.func @transform_9(%arg0: i32, %arg1: i32) -> (i32, i32, i32, i32) {
    %c0_i32 = arith.constant 0 : i32
    %c0_i32_0 = arith.constant 0 : i32
    %c0_i32_1 = arith.constant 0 : i32
    return %arg0, %arg1, %c0_i32, %c0_i32_0 : i32, i32, i32, i32
  }
}

module attributes {stable_mosaic.version = 11 : i64} {
  func.func @_proj_pwam_kernel(%arg0: i32, %arg1: memref<1x4x64xf32, #tpu.memory_space<vmem>>, %arg2: memref<1x8x64xf32, #tpu.memory_space<vmem>>, %arg3: memref<1x1x8xf32, #tpu.memory_space<vmem>>, %arg4: memref<64x32xbf16, #tpu.memory_space<vmem>>, %arg5: memref<1x32xf32, #tpu.memory_space<vmem>>, %arg6: memref<32x32xbf16, #tpu.memory_space<vmem>>, %arg7: memref<1x32xf32, #tpu.memory_space<vmem>>, %arg8: memref<32x32xbf16, #tpu.memory_space<vmem>>, %arg9: memref<1x32xf32, #tpu.memory_space<vmem>>, %arg10: memref<1x4x32xf32, #tpu.memory_space<vmem>>) attributes {dimension_semantics = [#tpu.dimension_semantics<parallel>], iteration_bounds = array<i64: 2>, scalar_prefetch = 0 : i64, scratch_operands = 0 : i64, tpu.core_type = #tpu.core_type<tc>, window_params = [{transform_indices = @transform_0, window_bounds = array<i64: 1, 4, 64>}, {transform_indices = @transform_1, window_bounds = array<i64: 1, 8, 64>}, {transform_indices = @transform_2, window_bounds = array<i64: 1, 1, 8>}, {pipeline_mode = #tpu.pipeline_mode<synchronous>, transform_indices = @transform_3, window_bounds = array<i64: 64, 32>}, {pipeline_mode = #tpu.pipeline_mode<synchronous>, transform_indices = @transform_4, window_bounds = array<i64: 1, 32>}, {pipeline_mode = #tpu.pipeline_mode<synchronous>, transform_indices = @transform_5, window_bounds = array<i64: 32, 32>}, {pipeline_mode = #tpu.pipeline_mode<synchronous>, transform_indices = @transform_6, window_bounds = array<i64: 1, 32>}, {pipeline_mode = #tpu.pipeline_mode<synchronous>, transform_indices = @transform_7, window_bounds = array<i64: 32, 32>}, {pipeline_mode = #tpu.pipeline_mode<synchronous>, transform_indices = @transform_8, window_bounds = array<i64: 1, 32>}, {transform_indices = @transform_9, window_bounds = array<i64: 1, 4, 32>}]} {
    %c0 = arith.constant 0 : index
    %c0_0 = arith.constant 0 : index
    %c0_1 = arith.constant 0 : index
    %0 = vector.load %arg1[%c0, %c0_0, %c0_1] : memref<1x4x64xf32, #tpu.memory_space<vmem>>, vector<1x4x64xf32>
    %1 = vector.shape_cast %0 : vector<1x4x64xf32> to vector<4x64xf32>
    %2 = arith.truncf %1 : vector<4x64xf32> to vector<4x64xbf16>
    %c0_2 = arith.constant 0 : index
    %c0_3 = arith.constant 0 : index
    %3 = vector.load %arg4[%c0_2, %c0_3] : memref<64x32xbf16, #tpu.memory_space<vmem>>, vector<64x32xbf16>
    %cst = arith.constant dense<0.000000e+00> : vector<4x32xf32>
    %4 = tpu.matmul %2, %3, %cst {dimension_numbers = #tpu.dot_dimension_numbers<[1], [0], [0], [1], [0, 0, 1, 1], [], []>} : vector<4x64xbf16>, vector<64x32xbf16>, vector<4x32xf32> -> vector<4x32xf32>
    %c0_4 = arith.constant 0 : index
    %c0_5 = arith.constant 0 : index
    %5 = vector.load %arg5[%c0_4, %c0_5] : memref<1x32xf32, #tpu.memory_space<vmem>>, vector<1x32xf32>
    %6 = vector.broadcast %5 : vector<1x32xf32> to vector<4x32xf32>
    %7 = arith.addf %4, %6 : vector<4x32xf32>
    %cst_6 = arith.constant 0.000000e+00 : f32
    %8 = vector.broadcast %cst_6 : f32 to vector<4x32xf32>
    %9 = arith.maximumf %7, %8 : vector<4x32xf32>
    %c0_7 = arith.constant 0 : index
    %c0_8 = arith.constant 0 : index
    %c0_9 = arith.constant 0 : index
    %10 = vector.load %arg2[%c0_7, %c0_8, %c0_9] : memref<1x8x64xf32, #tpu.memory_space<vmem>>, vector<1x8x64xf32>
    %11 = vector.shape_cast %10 : vector<1x8x64xf32> to vector<8x64xf32>
    %c0_10 = arith.constant 0 : index
    %c0_11 = arith.constant 0 : index
    %c0_12 = arith.constant 0 : index
    %12 = vector.load %arg3[%c0_10, %c0_11, %c0_12] : memref<1x1x8xf32, #tpu.memory_space<vmem>>, vector<1x1x8xf32>
    %13 = vector.shape_cast %12 : vector<1x1x8xf32> to vector<1x8xf32>
    %c0_13 = arith.constant 0 : index
    %c0_14 = arith.constant 0 : index
    %14 = vector.load %arg6[%c0_13, %c0_14] : memref<32x32xbf16, #tpu.memory_space<vmem>>, vector<32x32xbf16>
    %c0_15 = arith.constant 0 : index
    %c0_16 = arith.constant 0 : index
    %15 = vector.load %arg7[%c0_15, %c0_16] : memref<1x32xf32, #tpu.memory_space<vmem>>, vector<1x32xf32>
    %c0_17 = arith.constant 0 : index
    %c0_18 = arith.constant 0 : index
    %16 = vector.load %arg8[%c0_17, %c0_18] : memref<32x32xbf16, #tpu.memory_space<vmem>>, vector<32x32xbf16>
    %c0_19 = arith.constant 0 : index
    %c0_20 = arith.constant 0 : index
    %17 = vector.load %arg9[%c0_19, %c0_20] : memref<1x32xf32, #tpu.memory_space<vmem>>, vector<1x32xf32>
    %18 = arith.truncf %9 : vector<4x32xf32> to vector<4x32xbf16>
    %cst_21 = arith.constant dense<0.000000e+00> : vector<4x32xf32>
    %19 = tpu.matmul %18, %14, %cst_21 {dimension_numbers = #tpu.dot_dimension_numbers<[1], [0], [0], [1], [0, 0, 1, 1], [], []>} : vector<4x32xbf16>, vector<32x32xbf16>, vector<4x32xf32> -> vector<4x32xf32>
    %20 = vector.broadcast %15 : vector<1x32xf32> to vector<4x32xf32>
    %21 = arith.addf %19, %20 : vector<4x32xf32>
    %cst_22 = arith.constant 0.176776692 : f32
    %22 = vector.broadcast %cst_22 : f32 to vector<4x32xf32>
    %23 = arith.mulf %21, %22 : vector<4x32xf32>
    %24 = vector.extract_strided_slice %11 {offsets = [0, 0], sizes = [8, 32], strides = [1, 1]} : vector<8x64xf32> to vector<8x32xf32>
    %25 = vector.extract_strided_slice %11 {offsets = [0, 32], sizes = [8, 32], strides = [1, 1]} : vector<8x64xf32> to vector<8x32xf32>
    %26 = arith.truncf %23 : vector<4x32xf32> to vector<4x32xbf16>
    %27 = arith.truncf %24 : vector<8x32xf32> to vector<8x32xbf16>
    %cst_23 = arith.constant dense<0.000000e+00> : vector<4x8xf32>
    %28 = tpu.matmul %26, %27, %cst_23 {dimension_numbers = #tpu.dot_dimension_numbers<[1], [1], [0], [0], [0, 0, 1, 0], [], []>} : vector<4x32xbf16>, vector<8x32xbf16>, vector<4x8xf32> -> vector<4x8xf32>
    %cst_24 = arith.constant 5.000000e-01 : f32
    %29 = vector.broadcast %cst_24 : f32 to vector<1x8xf32>
    %30 = arith.cmpf ogt, %13, %29 : vector<1x8xf32>
    %cst_25 = arith.constant -1.000000e+09 : f32
    %31 = vector.shape_cast %30 : vector<1x8xi1> to vector<1x8xi1>
    %32 = vector.broadcast %31 : vector<1x8xi1> to vector<4x8xi1>
    %33 = vector.broadcast %cst_25 : f32 to vector<4x8xf32>
    %34 = arith.select %32, %28, %33 : vector<4x8xi1>, vector<4x8xf32>
    %cst_26 = arith.constant dense<0xFF800000> : vector<4xf32>
    %35 = vector.multi_reduction <maximumf>, %34, %cst_26 [1] : vector<4x8xf32> to vector<4xf32>
    %36 = vector.shape_cast %35 : vector<4xf32> to vector<4x1xf32>
    %37 = vector.broadcast %36 : vector<4x1xf32> to vector<4x8xf32>
    %38 = arith.subf %34, %37 : vector<4x8xf32>
    %39 = math.exp %38 : vector<4x8xf32>
    %cst_27 = arith.constant dense<0.000000e+00> : vector<4xf32>
    %40 = vector.multi_reduction <add>, %39, %cst_27 [1] : vector<4x8xf32> to vector<4xf32>
    %41 = vector.shape_cast %40 : vector<4xf32> to vector<4x1xf32>
    %42 = tpu.reciprocal %41 {approx = true} : vector<4x1xf32> -> vector<4x1xf32>
    %43 = vector.broadcast %42 : vector<4x1xf32> to vector<4x8xf32>
    %44 = arith.mulf %39, %43 : vector<4x8xf32>
    %45 = arith.truncf %44 : vector<4x8xf32> to vector<4x8xbf16>
    %46 = arith.truncf %25 : vector<8x32xf32> to vector<8x32xbf16>
    %cst_28 = arith.constant dense<0.000000e+00> : vector<4x32xf32>
    %47 = tpu.matmul %45, %46, %cst_28 {dimension_numbers = #tpu.dot_dimension_numbers<[1], [0], [0], [1], [0, 0, 1, 1], [], []>} : vector<4x8xbf16>, vector<8x32xbf16>, vector<4x32xf32> -> vector<4x32xf32>
    %48 = arith.truncf %47 : vector<4x32xf32> to vector<4x32xbf16>
    %cst_29 = arith.constant dense<0.000000e+00> : vector<4x32xf32>
    %49 = tpu.matmul %48, %16, %cst_29 {dimension_numbers = #tpu.dot_dimension_numbers<[1], [0], [0], [1], [0, 0, 1, 1], [], []>} : vector<4x32xbf16>, vector<32x32xbf16>, vector<4x32xf32> -> vector<4x32xf32>
    %50 = vector.broadcast %17 : vector<1x32xf32> to vector<4x32xf32>
    %51 = arith.addf %49, %50 : vector<4x32xf32>
    %52 = arith.addf %9, %51 : vector<4x32xf32>
    %c0_30 = arith.constant 0 : index
    %c0_31 = arith.constant 0 : index
    %c0_32 = arith.constant 0 : index
    %53 = vector.load %arg10[%c0_30, %c0_31, %c0_32] : memref<1x4x32xf32, #tpu.memory_space<vmem>>, vector<1x4x32xf32>
    %54 = vector.shape_cast %53 : vector<1x4x32xf32> to vector<4x32xf32>
    %55 = vector.shape_cast %52 : vector<4x32xf32> to vector<1x4x32xf32>
    tpu.vector_store %arg10[%c0_30, %c0_31, %c0_32], %55 {strides = array<i32>} : memref<1x4x32xf32, #tpu.memory_space<vmem>>, vector<1x4x32xf32>,
    return
  }
  func.func @transform_0(%arg0: i32) -> (i32, i32, i32) {
    %c0_i32 = arith.constant 0 : i32
    %c0_i32_0 = arith.constant 0 : i32
    %c0_i32_1 = arith.constant 0 : i32
    return %arg0, %c0_i32, %c0_i32_0 : i32, i32, i32
  }
  func.func @transform_1(%arg0: i32) -> (i32, i32, i32) {
    %c0_i32 = arith.constant 0 : i32
    %c0_i32_0 = arith.constant 0 : i32
    %c0_i32_1 = arith.constant 0 : i32
    return %arg0, %c0_i32, %c0_i32_0 : i32, i32, i32
  }
  func.func @transform_2(%arg0: i32) -> (i32, i32, i32) {
    %c0_i32 = arith.constant 0 : i32
    %c0_i32_0 = arith.constant 0 : i32
    %c0_i32_1 = arith.constant 0 : i32
    return %arg0, %c0_i32, %c0_i32_0 : i32, i32, i32
  }
  func.func @transform_3(%arg0: i32) -> (i32, i32) {
    %c0_i32 = arith.constant 0 : i32
    %c0_i32_0 = arith.constant 0 : i32
    %c0_i32_1 = arith.constant 0 : i32
    return %c0_i32, %c0_i32_0 : i32, i32
  }
  func.func @transform_4(%arg0: i32) -> (i32, i32) {
    %c0_i32 = arith.constant 0 : i32
    %c0_i32_0 = arith.constant 0 : i32
    %c0_i32_1 = arith.constant 0 : i32
    return %c0_i32, %c0_i32_0 : i32, i32
  }
  func.func @transform_5(%arg0: i32) -> (i32, i32) {
    %c0_i32 = arith.constant 0 : i32
    %c0_i32_0 = arith.constant 0 : i32
    %c0_i32_1 = arith.constant 0 : i32
    return %c0_i32, %c0_i32_0 : i32, i32
  }
  func.func @transform_6(%arg0: i32) -> (i32, i32) {
    %c0_i32 = arith.constant 0 : i32
    %c0_i32_0 = arith.constant 0 : i32
    %c0_i32_1 = arith.constant 0 : i32
    return %c0_i32, %c0_i32_0 : i32, i32
  }
  func.func @transform_7(%arg0: i32) -> (i32, i32) {
    %c0_i32 = arith.constant 0 : i32
    %c0_i32_0 = arith.constant 0 : i32
    %c0_i32_1 = arith.constant 0 : i32
    return %c0_i32, %c0_i32_0 : i32, i32
  }
  func.func @transform_8(%arg0: i32) -> (i32, i32) {
    %c0_i32 = arith.constant 0 : i32
    %c0_i32_0 = arith.constant 0 : i32
    %c0_i32_1 = arith.constant 0 : i32
    return %c0_i32, %c0_i32_0 : i32, i32
  }
  func.func @transform_9(%arg0: i32) -> (i32, i32, i32) {
    %c0_i32 = arith.constant 0 : i32
    %c0_i32_0 = arith.constant 0 : i32
    %c0_i32_1 = arith.constant 0 : i32
    return %arg0, %c0_i32, %c0_i32_0 : i32, i32, i32
  }
}

module attributes {stable_mosaic.version = 11 : i64} {
  func.func @_resize_h_kernel(%arg0: i32, %arg1: memref<1x2x2x32xf32, #tpu.memory_space<vmem>>, %arg2: memref<4x2xf32, #tpu.memory_space<vmem>>, %arg3: memref<1x2x4x32xf32, #tpu.memory_space<vmem>>) attributes {dimension_semantics = [#tpu.dimension_semantics<parallel>], iteration_bounds = array<i64: 2>, scalar_prefetch = 0 : i64, scratch_operands = 0 : i64, tpu.core_type = #tpu.core_type<tc>, window_params = [{transform_indices = @transform_0, window_bounds = array<i64: 1, 2, 2, 32>}, {pipeline_mode = #tpu.pipeline_mode<synchronous>, transform_indices = @transform_1, window_bounds = array<i64: 4, 2>}, {transform_indices = @transform_2, window_bounds = array<i64: 1, 2, 4, 32>}]} {
    %c0 = arith.constant 0 : index
    %c0_0 = arith.constant 0 : index
    %0 = vector.load %arg2[%c0, %c0_0] : memref<4x2xf32, #tpu.memory_space<vmem>>, vector<4x2xf32>
    %1 = vector.shape_cast %0 : vector<4x2xf32> to vector<1x4x2xf32>
    %2 = vector.broadcast %1 : vector<1x4x2xf32> to vector<2x4x2xf32>
    %c0_1 = arith.constant 0 : index
    %c0_2 = arith.constant 0 : index
    %c0_3 = arith.constant 0 : index
    %c0_4 = arith.constant 0 : index
    %3 = vector.load %arg1[%c0_1, %c0_2, %c0_3, %c0_4] : memref<1x2x2x32xf32, #tpu.memory_space<vmem>>, vector<1x2x2x32xf32>
    %4 = vector.shape_cast %3 : vector<1x2x2x32xf32> to vector<2x2x32xf32>
    %cst = arith.constant dense<0.000000e+00> : vector<2x4x32xf32>
    %5 = tpu.matmul %2, %4, %cst {dimension_numbers = #tpu.dot_dimension_numbers<[2], [1], [1], [2], [0, 0, 0, 1, 1, 2], [0], [0]>} : vector<2x4x2xf32>, vector<2x2x32xf32>, vector<2x4x32xf32> -> vector<2x4x32xf32>
    %c0_5 = arith.constant 0 : index
    %c0_6 = arith.constant 0 : index
    %c0_7 = arith.constant 0 : index
    %c0_8 = arith.constant 0 : index
    %6 = vector.load %arg3[%c0_5, %c0_6, %c0_7, %c0_8] : memref<1x2x4x32xf32, #tpu.memory_space<vmem>>, vector<1x2x4x32xf32>
    %7 = vector.shape_cast %6 : vector<1x2x4x32xf32> to vector<2x4x32xf32>
    %8 = vector.shape_cast %5 : vector<2x4x32xf32> to vector<1x2x4x32xf32>
    tpu.vector_store %arg3[%c0_5, %c0_6, %c0_7, %c0_8], %8 {strides = array<i32>} : memref<1x2x4x32xf32, #tpu.memory_space<vmem>>, vector<1x2x4x32xf32>,
    return
  }
  func.func @transform_0(%arg0: i32) -> (i32, i32, i32, i32) {
    %c0_i32 = arith.constant 0 : i32
    %c0_i32_0 = arith.constant 0 : i32
    %c0_i32_1 = arith.constant 0 : i32
    %c0_i32_2 = arith.constant 0 : i32
    return %arg0, %c0_i32, %c0_i32_0, %c0_i32_1 : i32, i32, i32, i32
  }
  func.func @transform_1(%arg0: i32) -> (i32, i32) {
    %c0_i32 = arith.constant 0 : i32
    %c0_i32_0 = arith.constant 0 : i32
    %c0_i32_1 = arith.constant 0 : i32
    return %c0_i32, %c0_i32_0 : i32, i32
  }
  func.func @transform_2(%arg0: i32) -> (i32, i32, i32, i32) {
    %c0_i32 = arith.constant 0 : i32
    %c0_i32_0 = arith.constant 0 : i32
    %c0_i32_1 = arith.constant 0 : i32
    %c0_i32_2 = arith.constant 0 : i32
    return %arg0, %c0_i32, %c0_i32_0, %c0_i32_1 : i32, i32, i32, i32
  }
}

module attributes {stable_mosaic.version = 11 : i64} {
  func.func @_resize_v_kernel(%arg0: i32, %arg1: memref<1x2x128xf32, #tpu.memory_space<vmem>>, %arg2: memref<4x2xf32, #tpu.memory_space<vmem>>, %arg3: memref<1x4x128xf32, #tpu.memory_space<vmem>>) attributes {dimension_semantics = [#tpu.dimension_semantics<parallel>], iteration_bounds = array<i64: 2>, scalar_prefetch = 0 : i64, scratch_operands = 0 : i64, tpu.core_type = #tpu.core_type<tc>, window_params = [{transform_indices = @transform_0, window_bounds = array<i64: 1, 2, 128>}, {pipeline_mode = #tpu.pipeline_mode<synchronous>, transform_indices = @transform_1, window_bounds = array<i64: 4, 2>}, {transform_indices = @transform_2, window_bounds = array<i64: 1, 4, 128>}]} {
    %c0 = arith.constant 0 : index
    %c0_0 = arith.constant 0 : index
    %0 = vector.load %arg2[%c0, %c0_0] : memref<4x2xf32, #tpu.memory_space<vmem>>, vector<4x2xf32>
    %c0_1 = arith.constant 0 : index
    %c0_2 = arith.constant 0 : index
    %c0_3 = arith.constant 0 : index
    %1 = vector.load %arg1[%c0_1, %c0_2, %c0_3] : memref<1x2x128xf32, #tpu.memory_space<vmem>>, vector<1x2x128xf32>
    %2 = vector.shape_cast %1 : vector<1x2x128xf32> to vector<2x128xf32>
    %cst = arith.constant dense<0.000000e+00> : vector<4x128xf32>
    %3 = tpu.matmul %0, %2, %cst {dimension_numbers = #tpu.dot_dimension_numbers<[1], [0], [0], [1], [0, 0, 1, 1], [], []>} : vector<4x2xf32>, vector<2x128xf32>, vector<4x128xf32> -> vector<4x128xf32>
    %c0_4 = arith.constant 0 : index
    %c0_5 = arith.constant 0 : index
    %c0_6 = arith.constant 0 : index
    %4 = vector.load %arg3[%c0_4, %c0_5, %c0_6] : memref<1x4x128xf32, #tpu.memory_space<vmem>>, vector<1x4x128xf32>
    %5 = vector.shape_cast %4 : vector<1x4x128xf32> to vector<4x128xf32>
    %6 = vector.shape_cast %3 : vector<4x128xf32> to vector<1x4x128xf32>
    tpu.vector_store %arg3[%c0_4, %c0_5, %c0_6], %6 {strides = array<i32>} : memref<1x4x128xf32, #tpu.memory_space<vmem>>, vector<1x4x128xf32>,
    return
  }
  func.func @transform_0(%arg0: i32) -> (i32, i32, i32) {
    %c0_i32 = arith.constant 0 : i32
    %c0_i32_0 = arith.constant 0 : i32
    %c0_i32_1 = arith.constant 0 : i32
    return %arg0, %c0_i32, %c0_i32_0 : i32, i32, i32
  }
  func.func @transform_1(%arg0: i32) -> (i32, i32) {
    %c0_i32 = arith.constant 0 : i32
    %c0_i32_0 = arith.constant 0 : i32
    %c0_i32_1 = arith.constant 0 : i32
    return %c0_i32, %c0_i32_0 : i32, i32
  }
  func.func @transform_2(%arg0: i32) -> (i32, i32, i32) {
    %c0_i32 = arith.constant 0 : i32
    %c0_i32_0 = arith.constant 0 : i32
    %c0_i32_1 = arith.constant 0 : i32
    return %arg0, %c0_i32, %c0_i32_0 : i32, i32, i32
  }
}

module attributes {stable_mosaic.version = 11 : i64} {
  func.func @_resize_h_kernel(%arg0: i32, %arg1: memref<1x4x4x16xf32, #tpu.memory_space<vmem>>, %arg2: memref<8x4xf32, #tpu.memory_space<vmem>>, %arg3: memref<1x4x8x16xf32, #tpu.memory_space<vmem>>) attributes {dimension_semantics = [#tpu.dimension_semantics<parallel>], iteration_bounds = array<i64: 2>, scalar_prefetch = 0 : i64, scratch_operands = 0 : i64, tpu.core_type = #tpu.core_type<tc>, window_params = [{transform_indices = @transform_0, window_bounds = array<i64: 1, 4, 4, 16>}, {pipeline_mode = #tpu.pipeline_mode<synchronous>, transform_indices = @transform_1, window_bounds = array<i64: 8, 4>}, {transform_indices = @transform_2, window_bounds = array<i64: 1, 4, 8, 16>}]} {
    %c0 = arith.constant 0 : index
    %c0_0 = arith.constant 0 : index
    %0 = vector.load %arg2[%c0, %c0_0] : memref<8x4xf32, #tpu.memory_space<vmem>>, vector<8x4xf32>
    %1 = vector.shape_cast %0 : vector<8x4xf32> to vector<1x8x4xf32>
    %2 = vector.broadcast %1 : vector<1x8x4xf32> to vector<4x8x4xf32>
    %c0_1 = arith.constant 0 : index
    %c0_2 = arith.constant 0 : index
    %c0_3 = arith.constant 0 : index
    %c0_4 = arith.constant 0 : index
    %3 = vector.load %arg1[%c0_1, %c0_2, %c0_3, %c0_4] : memref<1x4x4x16xf32, #tpu.memory_space<vmem>>, vector<1x4x4x16xf32>
    %4 = vector.shape_cast %3 : vector<1x4x4x16xf32> to vector<4x4x16xf32>
    %cst = arith.constant dense<0.000000e+00> : vector<4x8x16xf32>
    %5 = tpu.matmul %2, %4, %cst {dimension_numbers = #tpu.dot_dimension_numbers<[2], [1], [1], [2], [0, 0, 0, 1, 1, 2], [0], [0]>} : vector<4x8x4xf32>, vector<4x4x16xf32>, vector<4x8x16xf32> -> vector<4x8x16xf32>
    %c0_5 = arith.constant 0 : index
    %c0_6 = arith.constant 0 : index
    %c0_7 = arith.constant 0 : index
    %c0_8 = arith.constant 0 : index
    %6 = vector.load %arg3[%c0_5, %c0_6, %c0_7, %c0_8] : memref<1x4x8x16xf32, #tpu.memory_space<vmem>>, vector<1x4x8x16xf32>
    %7 = vector.shape_cast %6 : vector<1x4x8x16xf32> to vector<4x8x16xf32>
    %8 = vector.shape_cast %5 : vector<4x8x16xf32> to vector<1x4x8x16xf32>
    tpu.vector_store %arg3[%c0_5, %c0_6, %c0_7, %c0_8], %8 {strides = array<i32>} : memref<1x4x8x16xf32, #tpu.memory_space<vmem>>, vector<1x4x8x16xf32>,
    return
  }
  func.func @transform_0(%arg0: i32) -> (i32, i32, i32, i32) {
    %c0_i32 = arith.constant 0 : i32
    %c0_i32_0 = arith.constant 0 : i32
    %c0_i32_1 = arith.constant 0 : i32
    %c0_i32_2 = arith.constant 0 : i32
    return %arg0, %c0_i32, %c0_i32_0, %c0_i32_1 : i32, i32, i32, i32
  }
  func.func @transform_1(%arg0: i32) -> (i32, i32) {
    %c0_i32 = arith.constant 0 : i32
    %c0_i32_0 = arith.constant 0 : i32
    %c0_i32_1 = arith.constant 0 : i32
    return %c0_i32, %c0_i32_0 : i32, i32
  }
  func.func @transform_2(%arg0: i32) -> (i32, i32, i32, i32) {
    %c0_i32 = arith.constant 0 : i32
    %c0_i32_0 = arith.constant 0 : i32
    %c0_i32_1 = arith.constant 0 : i32
    %c0_i32_2 = arith.constant 0 : i32
    return %arg0, %c0_i32, %c0_i32_0, %c0_i32_1 : i32, i32, i32, i32
  }
}

module attributes {stable_mosaic.version = 11 : i64} {
  func.func @_decoder_fuse_kernel(%arg0: i32, %arg1: memref<32x32xf32, #tpu.memory_space<vmem>>, %arg2: memref<32x32xf32, #tpu.memory_space<vmem>>, %arg3: memref<32x32xbf16, #tpu.memory_space<vmem>>, %arg4: memref<1x32xf32, #tpu.memory_space<vmem>>, %arg5: memref<32x16xbf16, #tpu.memory_space<vmem>>, %arg6: memref<1x16xf32, #tpu.memory_space<vmem>>, %arg7: memref<32x16xf32, #tpu.memory_space<vmem>>) attributes {dimension_semantics = [#tpu.dimension_semantics<parallel>], iteration_bounds = array<i64: 1>, scalar_prefetch = 0 : i64, scratch_operands = 0 : i64, tpu.core_type = #tpu.core_type<tc>, window_params = [{transform_indices = @transform_0, window_bounds = array<i64: 32, 32>}, {transform_indices = @transform_1, window_bounds = array<i64: 32, 32>}, {pipeline_mode = #tpu.pipeline_mode<synchronous>, transform_indices = @transform_2, window_bounds = array<i64: 32, 32>}, {pipeline_mode = #tpu.pipeline_mode<synchronous>, transform_indices = @transform_3, window_bounds = array<i64: 1, 32>}, {pipeline_mode = #tpu.pipeline_mode<synchronous>, transform_indices = @transform_4, window_bounds = array<i64: 32, 16>}, {pipeline_mode = #tpu.pipeline_mode<synchronous>, transform_indices = @transform_5, window_bounds = array<i64: 1, 16>}, {transform_indices = @transform_6, window_bounds = array<i64: 32, 16>}]} {
    %c0 = arith.constant 0 : index
    %c0_0 = arith.constant 0 : index
    %0 = vector.load %arg2[%c0, %c0_0] : memref<32x32xf32, #tpu.memory_space<vmem>>, vector<32x32xf32>
    %1 = arith.truncf %0 : vector<32x32xf32> to vector<32x32xbf16>
    %c0_1 = arith.constant 0 : index
    %c0_2 = arith.constant 0 : index
    %2 = vector.load %arg3[%c0_1, %c0_2] : memref<32x32xbf16, #tpu.memory_space<vmem>>, vector<32x32xbf16>
    %cst = arith.constant dense<0.000000e+00> : vector<32x32xf32>
    %3 = tpu.matmul %1, %2, %cst {dimension_numbers = #tpu.dot_dimension_numbers<[1], [0], [0], [1], [0, 0, 1, 1], [], []>} : vector<32x32xbf16>, vector<32x32xbf16>, vector<32x32xf32> -> vector<32x32xf32>
    %c0_3 = arith.constant 0 : index
    %c0_4 = arith.constant 0 : index
    %4 = vector.load %arg4[%c0_3, %c0_4] : memref<1x32xf32, #tpu.memory_space<vmem>>, vector<1x32xf32>
    %5 = vector.broadcast %4 : vector<1x32xf32> to vector<32x32xf32>
    %6 = arith.addf %3, %5 : vector<32x32xf32>
    %cst_5 = arith.constant 0.000000e+00 : f32
    %7 = vector.broadcast %cst_5 : f32 to vector<32x32xf32>
    %8 = arith.maximumf %6, %7 : vector<32x32xf32>
    %c0_6 = arith.constant 0 : index
    %c0_7 = arith.constant 0 : index
    %9 = vector.load %arg1[%c0_6, %c0_7] : memref<32x32xf32, #tpu.memory_space<vmem>>, vector<32x32xf32>
    %10 = arith.addf %9, %8 : vector<32x32xf32>
    %11 = arith.truncf %10 : vector<32x32xf32> to vector<32x32xbf16>
    %c0_8 = arith.constant 0 : index
    %c0_9 = arith.constant 0 : index
    %12 = vector.load %arg5[%c0_8, %c0_9] : memref<32x16xbf16, #tpu.memory_space<vmem>>, vector<32x16xbf16>
    %cst_10 = arith.constant dense<0.000000e+00> : vector<32x16xf32>
    %13 = tpu.matmul %11, %12, %cst_10 {dimension_numbers = #tpu.dot_dimension_numbers<[1], [0], [0], [1], [0, 0, 1, 1], [], []>} : vector<32x32xbf16>, vector<32x16xbf16>, vector<32x16xf32> -> vector<32x16xf32>
    %c0_11 = arith.constant 0 : index
    %c0_12 = arith.constant 0 : index
    %14 = vector.load %arg6[%c0_11, %c0_12] : memref<1x16xf32, #tpu.memory_space<vmem>>, vector<1x16xf32>
    %15 = vector.broadcast %14 : vector<1x16xf32> to vector<32x16xf32>
    %16 = arith.addf %13, %15 : vector<32x16xf32>
    %cst_13 = arith.constant 0.000000e+00 : f32
    %17 = vector.broadcast %cst_13 : f32 to vector<32x16xf32>
    %18 = arith.maximumf %16, %17 : vector<32x16xf32>
    %c0_14 = arith.constant 0 : index
    %c0_15 = arith.constant 0 : index
    %19 = vector.load %arg7[%c0_14, %c0_15] : memref<32x16xf32, #tpu.memory_space<vmem>>, vector<32x16xf32>
    tpu.vector_store %arg7[%c0_14, %c0_15], %18 {strides = array<i32>} : memref<32x16xf32, #tpu.memory_space<vmem>>, vector<32x16xf32>,
    return
  }
  func.func @transform_0(%arg0: i32) -> (i32, i32) {
    %c0_i32 = arith.constant 0 : i32
    %c0_i32_0 = arith.constant 0 : i32
    return %arg0, %c0_i32 : i32, i32
  }
  func.func @transform_1(%arg0: i32) -> (i32, i32) {
    %c0_i32 = arith.constant 0 : i32
    %c0_i32_0 = arith.constant 0 : i32
    return %arg0, %c0_i32 : i32, i32
  }
  func.func @transform_2(%arg0: i32) -> (i32, i32) {
    %c0_i32 = arith.constant 0 : i32
    %c0_i32_0 = arith.constant 0 : i32
    %c0_i32_1 = arith.constant 0 : i32
    return %c0_i32, %c0_i32_0 : i32, i32
  }
  func.func @transform_3(%arg0: i32) -> (i32, i32) {
    %c0_i32 = arith.constant 0 : i32
    %c0_i32_0 = arith.constant 0 : i32
    %c0_i32_1 = arith.constant 0 : i32
    return %c0_i32, %c0_i32_0 : i32, i32
  }
  func.func @transform_4(%arg0: i32) -> (i32, i32) {
    %c0_i32 = arith.constant 0 : i32
    %c0_i32_0 = arith.constant 0 : i32
    %c0_i32_1 = arith.constant 0 : i32
    return %c0_i32, %c0_i32_0 : i32, i32
  }
  func.func @transform_5(%arg0: i32) -> (i32, i32) {
    %c0_i32 = arith.constant 0 : i32
    %c0_i32_0 = arith.constant 0 : i32
    %c0_i32_1 = arith.constant 0 : i32
    return %c0_i32, %c0_i32_0 : i32, i32
  }
  func.func @transform_6(%arg0: i32) -> (i32, i32) {
    %c0_i32 = arith.constant 0 : i32
    %c0_i32_0 = arith.constant 0 : i32
    return %arg0, %c0_i32 : i32, i32
  }
}

module attributes {stable_mosaic.version = 11 : i64} {
  func.func @_resize_v_kernel(%arg0: i32, %arg1: memref<1x4x128xf32, #tpu.memory_space<vmem>>, %arg2: memref<8x4xf32, #tpu.memory_space<vmem>>, %arg3: memref<1x8x128xf32, #tpu.memory_space<vmem>>) attributes {dimension_semantics = [#tpu.dimension_semantics<parallel>], iteration_bounds = array<i64: 2>, scalar_prefetch = 0 : i64, scratch_operands = 0 : i64, tpu.core_type = #tpu.core_type<tc>, window_params = [{transform_indices = @transform_0, window_bounds = array<i64: 1, 4, 128>}, {pipeline_mode = #tpu.pipeline_mode<synchronous>, transform_indices = @transform_1, window_bounds = array<i64: 8, 4>}, {transform_indices = @transform_2, window_bounds = array<i64: 1, 8, 128>}]} {
    %c0 = arith.constant 0 : index
    %c0_0 = arith.constant 0 : index
    %0 = vector.load %arg2[%c0, %c0_0] : memref<8x4xf32, #tpu.memory_space<vmem>>, vector<8x4xf32>
    %c0_1 = arith.constant 0 : index
    %c0_2 = arith.constant 0 : index
    %c0_3 = arith.constant 0 : index
    %1 = vector.load %arg1[%c0_1, %c0_2, %c0_3] : memref<1x4x128xf32, #tpu.memory_space<vmem>>, vector<1x4x128xf32>
    %2 = vector.shape_cast %1 : vector<1x4x128xf32> to vector<4x128xf32>
    %cst = arith.constant dense<0.000000e+00> : vector<8x128xf32>
    %3 = tpu.matmul %0, %2, %cst {dimension_numbers = #tpu.dot_dimension_numbers<[1], [0], [0], [1], [0, 0, 1, 1], [], []>} : vector<8x4xf32>, vector<4x128xf32>, vector<8x128xf32> -> vector<8x128xf32>
    %c0_4 = arith.constant 0 : index
    %c0_5 = arith.constant 0 : index
    %c0_6 = arith.constant 0 : index
    %4 = vector.load %arg3[%c0_4, %c0_5, %c0_6] : memref<1x8x128xf32, #tpu.memory_space<vmem>>, vector<1x8x128xf32>
    %5 = vector.shape_cast %4 : vector<1x8x128xf32> to vector<8x128xf32>
    %6 = vector.shape_cast %3 : vector<8x128xf32> to vector<1x8x128xf32>
    tpu.vector_store %arg3[%c0_4, %c0_5, %c0_6], %6 {strides = array<i32>} : memref<1x8x128xf32, #tpu.memory_space<vmem>>, vector<1x8x128xf32>,
    return
  }
  func.func @transform_0(%arg0: i32) -> (i32, i32, i32) {
    %c0_i32 = arith.constant 0 : i32
    %c0_i32_0 = arith.constant 0 : i32
    %c0_i32_1 = arith.constant 0 : i32
    return %arg0, %c0_i32, %c0_i32_0 : i32, i32, i32
  }
  func.func @transform_1(%arg0: i32) -> (i32, i32) {
    %c0_i32 = arith.constant 0 : i32
    %c0_i32_0 = arith.constant 0 : i32
    %c0_i32_1 = arith.constant 0 : i32
    return %c0_i32, %c0_i32_0 : i32, i32
  }
  func.func @transform_2(%arg0: i32) -> (i32, i32, i32) {
    %c0_i32 = arith.constant 0 : i32
    %c0_i32_0 = arith.constant 0 : i32
    %c0_i32_1 = arith.constant 0 : i32
    return %arg0, %c0_i32, %c0_i32_0 : i32, i32, i32
  }
}

module attributes {stable_mosaic.version = 11 : i64} {
  func.func @_decoder_head_kernel(%arg0: i32, %arg1: memref<128x16xf32, #tpu.memory_space<vmem>>, %arg2: memref<128x16xf32, #tpu.memory_space<vmem>>, %arg3: memref<16x16xbf16, #tpu.memory_space<vmem>>, %arg4: memref<1x16xf32, #tpu.memory_space<vmem>>, %arg5: memref<16x16xbf16, #tpu.memory_space<vmem>>, %arg6: memref<1x16xf32, #tpu.memory_space<vmem>>, %arg7: memref<2x16xbf16, #tpu.memory_space<vmem>>, %arg8: memref<2x1xf32, #tpu.memory_space<vmem>>, %arg9: memref<2x128xf32, #tpu.memory_space<vmem>>) attributes {dimension_semantics = [#tpu.dimension_semantics<parallel>], iteration_bounds = array<i64: 1>, scalar_prefetch = 0 : i64, scratch_operands = 0 : i64, tpu.core_type = #tpu.core_type<tc>, window_params = [{transform_indices = @transform_0, window_bounds = array<i64: 128, 16>}, {transform_indices = @transform_1, window_bounds = array<i64: 128, 16>}, {pipeline_mode = #tpu.pipeline_mode<synchronous>, transform_indices = @transform_2, window_bounds = array<i64: 16, 16>}, {pipeline_mode = #tpu.pipeline_mode<synchronous>, transform_indices = @transform_3, window_bounds = array<i64: 1, 16>}, {pipeline_mode = #tpu.pipeline_mode<synchronous>, transform_indices = @transform_4, window_bounds = array<i64: 16, 16>}, {pipeline_mode = #tpu.pipeline_mode<synchronous>, transform_indices = @transform_5, window_bounds = array<i64: 1, 16>}, {pipeline_mode = #tpu.pipeline_mode<synchronous>, transform_indices = @transform_6, window_bounds = array<i64: 2, 16>}, {pipeline_mode = #tpu.pipeline_mode<synchronous>, transform_indices = @transform_7, window_bounds = array<i64: 2, 1>}, {transform_indices = @transform_8, window_bounds = array<i64: 2, 128>}]} {
    %c0 = arith.constant 0 : index
    %c0_0 = arith.constant 0 : index
    %0 = vector.load %arg2[%c0, %c0_0] : memref<128x16xf32, #tpu.memory_space<vmem>>, vector<128x16xf32>
    %1 = arith.truncf %0 : vector<128x16xf32> to vector<128x16xbf16>
    %c0_1 = arith.constant 0 : index
    %c0_2 = arith.constant 0 : index
    %2 = vector.load %arg3[%c0_1, %c0_2] : memref<16x16xbf16, #tpu.memory_space<vmem>>, vector<16x16xbf16>
    %cst = arith.constant dense<0.000000e+00> : vector<128x16xf32>
    %3 = tpu.matmul %1, %2, %cst {dimension_numbers = #tpu.dot_dimension_numbers<[1], [0], [0], [1], [0, 0, 1, 1], [], []>} : vector<128x16xbf16>, vector<16x16xbf16>, vector<128x16xf32> -> vector<128x16xf32>
    %c0_3 = arith.constant 0 : index
    %c0_4 = arith.constant 0 : index
    %4 = vector.load %arg4[%c0_3, %c0_4] : memref<1x16xf32, #tpu.memory_space<vmem>>, vector<1x16xf32>
    %5 = vector.broadcast %4 : vector<1x16xf32> to vector<128x16xf32>
    %6 = arith.addf %3, %5 : vector<128x16xf32>
    %cst_5 = arith.constant 0.000000e+00 : f32
    %7 = vector.broadcast %cst_5 : f32 to vector<128x16xf32>
    %8 = arith.maximumf %6, %7 : vector<128x16xf32>
    %c0_6 = arith.constant 0 : index
    %c0_7 = arith.constant 0 : index
    %9 = vector.load %arg1[%c0_6, %c0_7] : memref<128x16xf32, #tpu.memory_space<vmem>>, vector<128x16xf32>
    %10 = arith.addf %9, %8 : vector<128x16xf32>
    %11 = arith.truncf %10 : vector<128x16xf32> to vector<128x16xbf16>
    %c0_8 = arith.constant 0 : index
    %c0_9 = arith.constant 0 : index
    %12 = vector.load %arg5[%c0_8, %c0_9] : memref<16x16xbf16, #tpu.memory_space<vmem>>, vector<16x16xbf16>
    %cst_10 = arith.constant dense<0.000000e+00> : vector<128x16xf32>
    %13 = tpu.matmul %11, %12, %cst_10 {dimension_numbers = #tpu.dot_dimension_numbers<[1], [0], [0], [1], [0, 0, 1, 1], [], []>} : vector<128x16xbf16>, vector<16x16xbf16>, vector<128x16xf32> -> vector<128x16xf32>
    %c0_11 = arith.constant 0 : index
    %c0_12 = arith.constant 0 : index
    %14 = vector.load %arg6[%c0_11, %c0_12] : memref<1x16xf32, #tpu.memory_space<vmem>>, vector<1x16xf32>
    %15 = vector.broadcast %14 : vector<1x16xf32> to vector<128x16xf32>
    %16 = arith.addf %13, %15 : vector<128x16xf32>
    %cst_13 = arith.constant 0.000000e+00 : f32
    %17 = vector.broadcast %cst_13 : f32 to vector<128x16xf32>
    %18 = arith.maximumf %16, %17 : vector<128x16xf32>
    %c0_14 = arith.constant 0 : index
    %c0_15 = arith.constant 0 : index
    %19 = vector.load %arg7[%c0_14, %c0_15] : memref<2x16xbf16, #tpu.memory_space<vmem>>, vector<2x16xbf16>
    %20 = arith.truncf %18 : vector<128x16xf32> to vector<128x16xbf16>
    %cst_16 = arith.constant dense<0.000000e+00> : vector<2x128xf32>
    %21 = tpu.matmul %19, %20, %cst_16 {dimension_numbers = #tpu.dot_dimension_numbers<[1], [1], [0], [0], [0, 0, 1, 0], [], []>} : vector<2x16xbf16>, vector<128x16xbf16>, vector<2x128xf32> -> vector<2x128xf32>
    %c0_17 = arith.constant 0 : index
    %c0_18 = arith.constant 0 : index
    %22 = vector.load %arg8[%c0_17, %c0_18] : memref<2x1xf32, #tpu.memory_space<vmem>>, vector<2x1xf32>
    %23 = vector.broadcast %22 : vector<2x1xf32> to vector<2x128xf32>
    %24 = arith.addf %21, %23 : vector<2x128xf32>
    %c0_19 = arith.constant 0 : index
    %c0_20 = arith.constant 0 : index
    %25 = vector.load %arg9[%c0_19, %c0_20] : memref<2x128xf32, #tpu.memory_space<vmem>>, vector<2x128xf32>
    tpu.vector_store %arg9[%c0_19, %c0_20], %24 {strides = array<i32>} : memref<2x128xf32, #tpu.memory_space<vmem>>, vector<2x128xf32>,
    return
  }
  func.func @transform_0(%arg0: i32) -> (i32, i32) {
    %c0_i32 = arith.constant 0 : i32
    %c0_i32_0 = arith.constant 0 : i32
    return %arg0, %c0_i32 : i32, i32
  }
  func.func @transform_1(%arg0: i32) -> (i32, i32) {
    %c0_i32 = arith.constant 0 : i32
    %c0_i32_0 = arith.constant 0 : i32
    return %arg0, %c0_i32 : i32, i32
  }
  func.func @transform_2(%arg0: i32) -> (i32, i32) {
    %c0_i32 = arith.constant 0 : i32
    %c0_i32_0 = arith.constant 0 : i32
    %c0_i32_1 = arith.constant 0 : i32
    return %c0_i32, %c0_i32_0 : i32, i32
  }
  func.func @transform_3(%arg0: i32) -> (i32, i32) {
    %c0_i32 = arith.constant 0 : i32
    %c0_i32_0 = arith.constant 0 : i32
    %c0_i32_1 = arith.constant 0 : i32
    return %c0_i32, %c0_i32_0 : i32, i32
  }
  func.func @transform_4(%arg0: i32) -> (i32, i32) {
    %c0_i32 = arith.constant 0 : i32
    %c0_i32_0 = arith.constant 0 : i32
    %c0_i32_1 = arith.constant 0 : i32
    return %c0_i32, %c0_i32_0 : i32, i32
  }
  func.func @transform_5(%arg0: i32) -> (i32, i32) {
    %c0_i32 = arith.constant 0 : i32
    %c0_i32_0 = arith.constant 0 : i32
    %c0_i32_1 = arith.constant 0 : i32
    return %c0_i32, %c0_i32_0 : i32, i32
  }
  func.func @transform_6(%arg0: i32) -> (i32, i32) {
    %c0_i32 = arith.constant 0 : i32
    %c0_i32_0 = arith.constant 0 : i32
    %c0_i32_1 = arith.constant 0 : i32
    return %c0_i32, %c0_i32_0 : i32, i32
  }
  func.func @transform_7(%arg0: i32) -> (i32, i32) {
    %c0_i32 = arith.constant 0 : i32
    %c0_i32_0 = arith.constant 0 : i32
    %c0_i32_1 = arith.constant 0 : i32
    return %c0_i32, %c0_i32_0 : i32, i32
  }
  func.func @transform_8(%arg0: i32) -> (i32, i32) {
    %c0_i32 = arith.constant 0 : i32
    %c0_i32_0 = arith.constant 0 : i32
    return %c0_i32, %arg0 : i32, i32
  }
}

module attributes {stable_mosaic.version = 11 : i64} {
  func.func @_resize_chw_kernel(%arg0: i32, %arg1: i32, %arg2: memref<1x1x8x8xf32, #tpu.memory_space<vmem>>, %arg3: memref<16x8xf32, #tpu.memory_space<vmem>>, %arg4: memref<8x16xf32, #tpu.memory_space<vmem>>, %arg5: memref<1x1x16x16xf32, #tpu.memory_space<vmem>>) attributes {dimension_semantics = [#tpu.dimension_semantics<parallel>, #tpu.dimension_semantics<parallel>], iteration_bounds = array<i64: 2, 2>, scalar_prefetch = 0 : i64, scratch_operands = 0 : i64, tpu.core_type = #tpu.core_type<tc>, window_params = [{transform_indices = @transform_0, window_bounds = array<i64: 1, 1, 8, 8>}, {pipeline_mode = #tpu.pipeline_mode<synchronous>, transform_indices = @transform_1, window_bounds = array<i64: 16, 8>}, {pipeline_mode = #tpu.pipeline_mode<synchronous>, transform_indices = @transform_2, window_bounds = array<i64: 8, 16>}, {transform_indices = @transform_3, window_bounds = array<i64: 1, 1, 16, 16>}]} {
    %c0 = arith.constant 0 : index
    %c0_0 = arith.constant 0 : index
    %0 = vector.load %arg3[%c0, %c0_0] : memref<16x8xf32, #tpu.memory_space<vmem>>, vector<16x8xf32>
    %c0_1 = arith.constant 0 : index
    %c0_2 = arith.constant 0 : index
    %c0_3 = arith.constant 0 : index
    %c0_4 = arith.constant 0 : index
    %1 = vector.load %arg2[%c0_1, %c0_2, %c0_3, %c0_4] : memref<1x1x8x8xf32, #tpu.memory_space<vmem>>, vector<1x1x8x8xf32>
    %2 = vector.shape_cast %1 : vector<1x1x8x8xf32> to vector<8x8xf32>
    %cst = arith.constant dense<0.000000e+00> : vector<16x8xf32>
    %3 = tpu.matmul %0, %2, %cst {dimension_numbers = #tpu.dot_dimension_numbers<[1], [0], [0], [1], [0, 0, 1, 1], [], []>} : vector<16x8xf32>, vector<8x8xf32>, vector<16x8xf32> -> vector<16x8xf32>
    %c0_5 = arith.constant 0 : index
    %c0_6 = arith.constant 0 : index
    %4 = vector.load %arg4[%c0_5, %c0_6] : memref<8x16xf32, #tpu.memory_space<vmem>>, vector<8x16xf32>
    %cst_7 = arith.constant dense<0.000000e+00> : vector<16x16xf32>
    %5 = tpu.matmul %3, %4, %cst_7 {dimension_numbers = #tpu.dot_dimension_numbers<[1], [0], [0], [1], [0, 0, 1, 1], [], []>} : vector<16x8xf32>, vector<8x16xf32>, vector<16x16xf32> -> vector<16x16xf32>
    %c0_8 = arith.constant 0 : index
    %c0_9 = arith.constant 0 : index
    %c0_10 = arith.constant 0 : index
    %c0_11 = arith.constant 0 : index
    %6 = vector.load %arg5[%c0_8, %c0_9, %c0_10, %c0_11] : memref<1x1x16x16xf32, #tpu.memory_space<vmem>>, vector<1x1x16x16xf32>
    %7 = vector.shape_cast %6 : vector<1x1x16x16xf32> to vector<16x16xf32>
    %8 = vector.shape_cast %5 : vector<16x16xf32> to vector<1x1x16x16xf32>
    tpu.vector_store %arg5[%c0_8, %c0_9, %c0_10, %c0_11], %8 {strides = array<i32>} : memref<1x1x16x16xf32, #tpu.memory_space<vmem>>, vector<1x1x16x16xf32>,
    return
  }
  func.func @transform_0(%arg0: i32, %arg1: i32) -> (i32, i32, i32, i32) {
    %c0_i32 = arith.constant 0 : i32
    %c0_i32_0 = arith.constant 0 : i32
    %c0_i32_1 = arith.constant 0 : i32
    return %arg0, %arg1, %c0_i32, %c0_i32_0 : i32, i32, i32, i32
  }
  func.func @transform_1(%arg0: i32, %arg1: i32) -> (i32, i32) {
    %c0_i32 = arith.constant 0 : i32
    %c0_i32_0 = arith.constant 0 : i32
    %c0_i32_1 = arith.constant 0 : i32
    return %c0_i32, %c0_i32_0 : i32, i32
  }
  func.func @transform_2(%arg0: i32, %arg1: i32) -> (i32, i32) {
    %c0_i32 = arith.constant 0 : i32
    %c0_i32_0 = arith.constant 0 : i32
    %c0_i32_1 = arith.constant 0 : i32
    return %c0_i32, %c0_i32_0 : i32, i32
  }
  func.func @transform_3(%arg0: i32, %arg1: i32) -> (i32, i32, i32, i32) {
    %c0_i32 = arith.constant 0 : i32
    %c0_i32_0 = arith.constant 0 : i32
    %c0_i32_1 = arith.constant 0 : i32
    return %arg0, %arg1, %c0_i32, %c0_i32_0 : i32, i32, i32, i32
  }
}

</mosaic_0001>

<bundles_post_ra>
// kernel: lavt_vlt_forward.17
= control target key start
LH: loop header
LB: loop body
LE: loop exit
PB: predicated region body
PF: predicated region fallthrough
CT: control target
= control target key end

     0   :  { %v111_v0 = vmov 0.0   ;;  %vm112_vm0 = vmmov 0   ;;  %vm41_vm1 = vcmask 261120   ;;  %s154_s1 = inlined_call_operand.vmem [shape: bf16[32,32], index: 1, kind: input, shape index: {}]   ;;  %s155_s0 = inlined_call_operand.vmem [shape: f32[16,32], index: 0, kind: input, shape index: {}]   ;;  %s156_s2 = inlined_call_operand.vmem [shape: f32[1,32], index: 2, kind: input, shape index: {}]   ;;  %s157_s3 = inlined_call_operand.vmem [shape: f32[16,32], index: 3, kind: output, shape index: {}]  }
   0x1   :  { %99 = vmatprep.subr.bf16.mxu0 %v111_v0  ;;  %v109_v1 = vld [vmem:[%s154_s1 + $0x8] sm:$0xff]   ;;  %103 = vmatprep.mubr.msk.bf16.mxu0 %vm112_vm0, %v111_v0  ;;  %v110_v2 = vld [vmem:[%s154_s1] sm:$0xff]  }
   0x2   :  { %100 = vmatpush3.bf16.msra.mxu0 %v109_v1  ;;  %v15_v3 = vld [vmem:[%s155_s0] sm:$0xff]  ;;  %v16_v4 = vld [vmem:[%s155_s0 + $0x8] sm:$0xff] }
   0x3   :  { %101 = vmatprep.subr.bf16.mxu0 %v111_v0  ;;  %v17_v5 = vpack.c.bf16 %v16_v4, %v15_v3  ;;  %v92_v6 = vld [vmem:[%s156_s2] ss:$0 sm:$0xff] }
   0x6   :  { %102 = vmatpush3.bf16.msra.mxu0 %v110_v2 }
   0x9   :  { %104 = vmatmul.mubr.msk.bf16.vlgmr.msra.gmra.mxu0 %vm41_vm1, %v17_v5 }
  0xc9   :  { %v79_v7 = vpop.f32.mrf.mxu0 }
  0xca   :  { %v80_v8 = vadd.f32 %v92_v6, %v79_v7 }
  0xcb   :  { %v105_v9 = vpop.f32.mrf.mxu0 }
  0xcc   :  { %86 = vst.msk [vmem:[%s157_s3] sm:$0xff] %vm41_vm1, %v80_v8 }
  0xcd   :  { %v82_v10 = vpop.f32.mrf.mxu0 }
  0xce   :  { %v83_v11 = vadd.f32 %v92_v6, %v82_v10 }
  0xcf   :  { %v106_v12 = vpop.f32.mrf.mxu0 }
  0xd0   :  { %87 = vst.msk [vmem:[%s157_s3 + $0x8] sm:$0xff] %vm41_vm1, %v83_v11 }

// kernel: lavt_vlt_forward.19
= control target key start
LH: loop header
LB: loop body
LE: loop exit
PB: predicated region body
PF: predicated region fallthrough
CT: control target
= control target key end

     0   :  { %v112_v0 = vmov 0.0   ;;  %vm113_vm0 = vmmov 0   ;;  %vm41_vm1 = vcmask 261120   ;;  %vm86_vm2 = vcmask 523264   ;;  %s155_s1 = inlined_call_operand.vmem [shape: bf16[32,64], index: 1, kind: input, shape index: {}]   ;;  %s156_s0 = inlined_call_operand.vmem [shape: f32[16,32], index: 0, kind: input, shape index: {}]   ;;  %s157_s2 = inlined_call_operand.vmem [shape: f32[1,64], index: 2, kind: input, shape index: {}]   ;;  %s158_s3 = inlined_call_operand.vmem [shape: f32[16,64], index: 3, kind: output, shape index: {}]  }
   0x1   :  { %100 = vmatprep.subr.bf16.mxu0 %v112_v0  ;;  %v110_v1 = vld [vmem:[%s155_s1 + $0x8] sm:$0xff]   ;;  %104 = vmatprep.mubr.msk.bf16.mxu0 %vm113_vm0, %v112_v0  ;;  %v111_v2 = vld [vmem:[%s155_s1] sm:$0xff]  }
   0x2   :  { %101 = vmatpush3.bf16.msra.mxu0 %v110_v1  ;;  %v15_v3 = vld [vmem:[%s156_s0] sm:$0xff]  ;;  %v16_v4 = vld [vmem:[%s156_s0 + $0x8] sm:$0xff] }
   0x3   :  { %102 = vmatprep.subr.bf16.mxu0 %v112_v0  ;;  %v17_v5 = vpack.c.bf16 %v16_v4, %v15_v3  ;;  %v93_v6 = vld [vmem:[%s157_s2] ss:$0 sm:$0xff] }
   0x6   :  { %103 = vmatpush3.bf16.msra.mxu0 %v111_v2 }
   0x9   :  { %105 = vmatmul.mubr.msk.bf16.vlgmr.msra.gmra.mxu0 %vm41_vm1, %v17_v5 }
  0xc9   :  { %v79_v7 = vpop.f32.mrf.mxu0 }
  0xca   :  { %v80_v8 = vadd.f32 %v93_v6, %v79_v7 }
  0xcb   :  { %v106_v9 = vpop.f32.mrf.mxu0 }
  0xcc   :  { %87 = vst.msk [vmem:[%s158_s3] sm:$0xff] %vm86_vm2, %v80_v8 }
  0xcd   :  { %v82_v10 = vpop.f32.mrf.mxu0 }
  0xce   :  { %v83_v11 = vadd.f32 %v93_v6, %v82_v10 }
  0xcf   :  { %v107_v12 = vpop.f32.mrf.mxu0 }
  0xd0   :  { %88 = vst.msk [vmem:[%s158_s3 + $0x8] sm:$0xff] %vm86_vm2, %v83_v11 }

// kernel: lavt_vlt_forward.18
= control target key start
LH: loop header
LB: loop body
LE: loop exit
PB: predicated region body
PF: predicated region fallthrough
CT: control target
= control target key end

     0   :  { %s1452_s30 = smov 0   ;;  %s1454_s10 = smov 0   ;;  %s1656_s0 = inlined_call_operand.vmem [shape: f32[2,8,2,8,8], index: 0, kind: input, shape index: {}]   ;;  %s1657_s1 = inlined_call_operand.vmem [shape: f32[2,8,32], index: 1, kind: input, shape index: {}]   ;;  %s1658_s2 = inlined_call_operand.vmem [shape: f32[2,1,8], index: 2, kind: input, shape index: {}]   ;;  %s1659_s3 = inlined_call_operand.vmem [shape: bf16[16,16], index: 3, kind: input, shape index: {}]   ;;  %s1660_s4 = inlined_call_operand.vmem [shape: f32[1,16], index: 4, kind: input, shape index: {}]   ;;  %s1661_s5 = inlined_call_operand.vmem [shape: bf16[16,16], index: 5, kind: input, shape index: {}]   ;;  %s1662_s6 = inlined_call_operand.vmem [shape: f32[1,16], index: 6, kind: input, shape index: {}]   ;;  %s1663_s7 = inlined_call_operand.vmem [shape: bf16[16,16], index: 7, kind: input, shape index: {}]   ;;  %s1664_s8 = inlined_call_operand.vmem [shape: f32[1,16], index: 8, kind: input, shape index: {}]   ;;  %s1665_s9 = inlined_call_operand.vmem [shape: f32[2,8,8,16], index: 9, kind: output, shape index: {}]  }
   0x1   :  { %s1456_s11 = smov 0  }
   0x2 LB: > { %s31_s12 = sadd.s32 1, %s1393_s10  ;;  %p1178_p0 = scmp.ge.s32.totalorder %s1397_s11, 1  ;;  %s1397_s11 = sphi %s1456_s11, %s19_s11   ;;  %s1393_s10 = sphi %s1454_s10, %s1667_s10   ;;  %s1389_s30 = sphi %s1452_s30, %s1666_s30  }
   0x3   : > { %p33_p1 = scmp.ge.s32.totalorder %s31_s12, 2  ;;  %p326_p2 = scmp.lt.s32.totalorder %s1397_s11, 3 }
   0x5   : > { %s1669_s12 = smov (%p33_p1, %s31_s12), 0  ;;  %p327_p3 = pnand %p1178_p0, %p326_p2 }
   0x6   : > { %p379_p4 = scmp.lt.s32.totalorder (!%p327_p3), %s1389_s30, 1  ;;  %s1399_s19 = smov (!%p327_p3), 8  }
   0x7   : > { %330 = sbr.rel (%p327_p3) target bundleno = 1487 (0x5cf), region = 56  ;;  %s1401_s16 = smov (!%p327_p3), 112  }
   0xc   : > { %v1340_v0 = vld [vmem:[%s1659_s3] sm:$0xff]   ;;  %s1671_s30 = smov (!%p379_p4, %s1389_s30), 1  ;;  %vm455_vm0 = vcmask 64512   ;;  %vm483_vm1 = vcmask 130048   ;;  %vm885_vm4 = vcmask 1043456  }
   0xd   : > { %1239 = vmatprep.subr.bf16.mxu0 %v1340_v0  ;;  %1289 = vmatprep.subr.bf16.mxu1 %v1340_v0  ;;  %s1212_s15 = sshll.u32 %s1671_s30, 7  ;;  %v1341_v45 = vld [vmem:[%s1661_s5] sm:$0xff]   ;;  %s1181_s24 = sshll.u32 %s1671_s30, 3 }
   0xe   : > { %1240 = vmatpush3.bf16.msra.mxu0 %v1340_v0  ;;  %1290 = vmatpush3.bf16.msra.mxu1 %v1340_v0  ;;  %s1479_s18 = scalar_lea.vmem %s1656_s0, %s1212_s15  ;;  %v1184_v49 = vld [vmem:[%s1660_s4] ss:$0 sm:$0xff]  ;;  %s392_s27 = scalar_lea.vmem %s1657_s1, %s1181_s24 }
   0xf   : > { %v408_v1 = vld [vmem:[%s1479_s18 + $0x8] sm:$0xff]  ;;  %v410_v2 = vld [vmem:[%s1479_s18 + $0x18] sm:$0xff]  ;;  %v407_v14 = vld [vmem:[%s1479_s18] sm:$0xff]  ;;  %1249 = vmatprep.subr.bf16.mxu1 %v1341_v45  ;;  %s395_s15 = scalar_lea.vmem %s1658_s2, %s1671_s30  ;;  %s1213_s21 = sshll.u32 %s1671_s30, 6 }
  0x10   : > { %v416_v3 = vld [vmem:[%s1479_s18 + $0x48] sm:$0xff]  ;;  %v1320_v4 = vpack.i.bf16 %v410_v2, %v408_v1  ;;  %v418_v5 = vld [vmem:[%s1479_s18 + $0x58] sm:$0xff]  ;;  %v409_v15 = vld [vmem:[%s1479_s18 + $0x10] sm:$0xff]  ;;  %s404_s24 = scalar_lea.vmem %s1665_s9, %s1213_s21 }
  0x11   : > { %v412_v6 = vld [vmem:[%s1479_s18 + $0x28] sm:$0xff]  ;;  %v414_v7 = vld [vmem:[%s1479_s18 + $0x38] sm:$0xff]  ;;  %v1330_v8 = vpack.i.bf16 %v418_v5, %v416_v3  ;;  %v415_v19 = vld [vmem:[%s1479_s18 + $0x40] sm:$0xff] }
  0x12   : > { %v420_v9 = vld [vmem:[%s1479_s18 + $0x68] sm:$0xff]  ;;  %v422_v10 = vld [vmem:[%s1479_s18 + $0x78] sm:$0xff]  ;;  %1321 = vrot.lane.b32.xlu0 %v1320_v4, %s1399_s19  ;;  %v1325_v11 = vpack.i.bf16 %v414_v7, %v412_v6  ;;  %v417_v20 = vld [vmem:[%s1479_s18 + $0x50] sm:$0xff] }
  0x13   : > { %1331 = vrot.lane.b32.xlu1 %v1330_v8, %s1399_s19  ;;  %v1335_v12 = vpack.i.bf16 %v422_v10, %v420_v9  ;;  %v411_v25 = vld [vmem:[%s1479_s18 + $0x20] sm:$0xff]  ;;  %v413_v26 = vld [vmem:[%s1479_s18 + $0x30] sm:$0xff] }
  0x14   : > { %v419_v33 = vld [vmem:[%s1479_s18 + $0x60] sm:$0xff]  ;;  %v421_v34 = vld [vmem:[%s1479_s18 + $0x70] sm:$0xff] }
  0x16   : > { %1326 = vrot.lane.b32.xlu0 %v1325_v11, %s1399_s19  ;;  %v569_v11 = vld [vmem:[%s392_s27] sm:$0xff] }
  0x17   : > { %1336 = vrot.lane.b32.xlu1 %v1335_v12, %s1399_s19  ;;  %v1563_v12 = vpack.c.bf16 %v569_v11, %v569_v11 }
  0x19   : > { %1291 = vmatprep.subr.msk.bf16.mxu0 %vm483_vm1, %v1563_v12 }
  0x84   : > { %v1322_v13 = vpop.permute.xlu0 %1321 }
  0x85   : > { %v1324_v16 = vunpack.i.h.bf16 %v1322_v13  ;;  %v1323_v17 = vunpack.i.l.bf16 %v1322_v13  ;;  %v1332_v18 = vpop.permute.xlu1 %1331  ;;  %v696_v13 = vsel %vm483_vm1, %v1563_v12, 0 }
  0x86   : > { %v1334_v21 = vunpack.i.h.bf16 %v1332_v18  ;;  %v1333_v22 = vunpack.i.l.bf16 %v1332_v18 }
  0x87   : > { %v456_v23 = vsel %vm455_vm0, %v407_v14, %v1323_v17  ;;  %v457_v24 = vsel %vm455_vm0, %v409_v15, %v1324_v16  ;;  %v1190_v16 = vld [vmem:[%s1662_s6] ss:$0 sm:$0xff] }
  0x88   : > { %v1327_v27 = vpop.permute.xlu0 %1326  ;;  %v464_v28 = vpack.c.bf16 %v457_v24, %v456_v23  ;;  %v460_v29 = vsel %vm455_vm0, %v415_v19, %v1333_v22  ;;  %v461_v30 = vsel %vm455_vm0, %v417_v20, %v1334_v21 }
  0x89   : > { %v1329_v31 = vunpack.i.h.bf16 %v1327_v27  ;;  %v1328_v32 = vunpack.i.l.bf16 %v1327_v27  ;;  %v1337_v35 = vpop.permute.xlu1 %1336  ;;  %v466_v36 = vpack.c.bf16 %v461_v30, %v460_v29 }
  0x8a   : > { %v1339_v37 = vunpack.i.h.bf16 %v1337_v35  ;;  %v1338_v38 = vunpack.i.l.bf16 %v1337_v35  ;;  %1241 = vmatprep.mubr.msk.bf16.mxu0 %vm483_vm1, %v464_v28 }
  0x8b   : > { %v459_v39 = vsel %vm455_vm0, %v413_v26, %v1329_v31  ;;  %v458_v40 = vsel %vm455_vm0, %v411_v25, %v1328_v32  ;;  %1245 = vmatprep.mubr.msk.bf16.mxu1 %vm483_vm1, %v466_v36 }
  0x8c   : > { %v465_v41 = vpack.c.bf16 %v459_v39, %v458_v40  ;;  %v463_v42 = vsel %vm455_vm0, %v421_v34, %v1339_v37  ;;  %v462_v43 = vsel %vm455_vm0, %v419_v33, %v1338_v38 }
  0x8d   : > { %v467_v44 = vpack.c.bf16 %v463_v42, %v462_v43  ;;  %v765_v43 = vlaneseq }
  0x8e   : > { %1242 = vmatmul.mubr.msk.bf16.vlgmr.msra.gmra.mxu0 %vm483_vm1, %v465_v41 }
  0x8f   : > { %1246 = vmatmul.mubr.msk.bf16.vlgmr.msra.gmra.mxu1 %vm483_vm1, %v467_v44  ;;  %1260 = vmatpush3.bf16.xpose.msra.mxu0 %v696_v13  ;;  %v570_v44 = vld [vmem:[%s395_s15] sm:$0x1] }
  0x90   : > { %1250 = vmatpush3.bf16.msra.mxu1 %v1341_v45  ;;  %v766_v45 = vshrl.u32 %v765_v43, 7  ;;  %vm763_vm2 = vcmp.gt.f32.partialorder %v570_v44, 0.5 }
 0x14e   : > { %v1243_v46 = vpop.f32.mrf.mxu0 }
 0x14f   : > { %v1247_v47 = vpop.f32.mrf.mxu1  ;;  %v1521_v56 = vadd.f32 %v1243_v46, %v1184_v49  ;;  %v767_v46 = vsub.s32 0, %v766_v45 }
 0x150   : > { %v530_v48 = vpop.f32.mrf.mxu0  ;;  %v1537_v4 = vadd.f32 %v1247_v47, %v1184_v49  ;;  %v1400_v47 = vmov 0  }
 0x151   : > { %v546_v50 = vpop.f32.mrf.mxu1  ;;  %v1517_v53 = vadd.f32 %v1184_v49, %v530_v48  ;;  %v563_v1 = vmax.f32 %v1521_v56, 0.0  ;;  %v764_v48 = vsel %vm763_vm2, 1, %v1400_v47 }
 0x152   : > { %v1244_v51 = vpop.f32.mrf.mxu0  ;;  %v1515_v52 = vadd.f32 %v1184_v49, %v546_v50  ;;  %v567_v8 = vmax.f32 %v1537_v4, 0.0 }
 0x153   : > { %v1519_v54 = vadd.f32 %v1244_v51, %v1184_v49  ;;  %v1248_v55 = vpop.f32.mrf.mxu1  ;;  %v561_v63 = vmax.f32 %v1517_v53, 0.0 }
 0x154   : > { %v533_v57 = vpop.f32.mrf.mxu0  ;;  %v565_v61 = vmax.f32 %v1515_v52, 0.0  ;;  %v1543_v6 = vadd.f32 %v1248_v55, %v1184_v49 }
 0x155   : > { %v1523_v58 = vadd.f32 %v1184_v49, %v533_v57  ;;  %v549_v59 = vpop.f32.mrf.mxu1  ;;  %v564_v60 = vmax.f32 %v1519_v54, 0.0 }
 0x156   : > { %v1527_v62 = vadd.f32 %v1184_v49, %v549_v59  ;;  %v568_v9 = vmax.f32 %v1543_v6, 0.0  ;;  %v768_v49 = vrot.slane %v764_v48, %v767_v46 }
 0x157   : > { %v562_v0 = vmax.f32 %v1523_v58, 0.0  ;;  %v578_v5 = vpack.c.bf16 %v564_v60, %v563_v1 }
 0x158   : > { %v566_v2 = vmax.f32 %v1527_v62, 0.0  ;;  %v580_v10 = vpack.c.bf16 %v568_v9, %v567_v8  ;;  %vm769_vm3 = vcmp.eq.s32.totalorder %v768_v49, 1 }
 0x159   : > { %v577_v3 = vpack.c.bf16 %v562_v0, %v561_v63 }
 0x15a   : > { %v579_v7 = vpack.c.bf16 %v566_v2, %v565_v61 }
 0x15b   : > { %1251 = vmatprep.mubr.msk.bf16.mxu1 %vm483_vm1, %v577_v3 }
 0x15c   : > { %1252 = vmatmul.mubr.msk.bf16.vlgmr.msra.gmra.mxu1 %vm483_vm1, %v578_v5 }
 0x15d   : > { %1255 = vmatprep.mubr.msk.bf16.mxu1 %vm483_vm1, %v579_v7 }
 0x164   : > { %1256 = vmatmul.mubr.msk.bf16.gmra.mxu1 %vm483_vm1, %v580_v10 }
 0x21c   : > { %v1253_v14 = vpop.f32.mrf.mxu1 }
 0x21d   : > { %v648_v20 = vadd.f32 %v1253_v14, %v1190_v16 }
 0x21e   : > { %v639_v15 = vpop.f32.mrf.mxu1 }
 0x21f   : > { %v640_v18 = vadd.f32 %v1190_v16, %v639_v15  ;;  %v672_v27 = vmul.f32 0.25, %v648_v20 }
 0x220   : > { %v1254_v17 = vpop.f32.mrf.mxu1 }
 0x221   : > { %v651_v19 = vadd.f32 %v1254_v17, %v1190_v16  ;;  %v670_v25 = vmul.f32 0.25, %v640_v18 }
 0x222   : > { %v642_v21 = vpop.f32.mrf.mxu1 }
 0x223   : > { %v643_v22 = vadd.f32 %v1190_v16, %v642_v21  ;;  %v673_v23 = vmul.f32 0.25, %v651_v19 }
 0x224   : > { %v1257_v24 = vpop.f32.mrf.mxu1 }
 0x225   : > { %v671_v26 = vmul.f32 0.25, %v643_v22  ;;  %v679_v30 = vpack.c.bf16 %v673_v23, %v672_v27  ;;  %v664_v34 = vadd.f32 %v1257_v24, %v1190_v16 }
 0x226   : > { %v655_v28 = vpop.f32.mrf.mxu1 }
 0x227   : > { %v678_v29 = vpack.c.bf16 %v671_v26, %v670_v25  ;;  %v656_v32 = vadd.f32 %v1190_v16, %v655_v28  ;;  %v676_v40 = vmul.f32 0.25, %v664_v34 }
 0x228   : > { %v1258_v31 = vpop.f32.mrf.mxu1 }
 0x229   : > { %v667_v33 = vadd.f32 %v1258_v31, %v1190_v16  ;;  %1261 = vmatprep.mubr.msk.bf16.mxu0 %vm483_vm1, %v678_v29  ;;  %v674_v38 = vmul.f32 0.25, %v656_v32 }
 0x22a   : > { %v658_v35 = vpop.f32.mrf.mxu1  ;;  %1262 = vmatmul.mubr.msk.bf16.vlgmr.msra.gmra.mxu0 %vm483_vm1, %v679_v30 }
 0x22b   : > { %v659_v36 = vadd.f32 %v1190_v16, %v658_v35  ;;  %v677_v37 = vmul.f32 0.25, %v667_v33 }
 0x22d   : > { %v675_v39 = vmul.f32 0.25, %v659_v36  ;;  %v681_v42 = vpack.c.bf16 %v677_v37, %v676_v40 }
 0x22f   : > { %v680_v41 = vpack.c.bf16 %v675_v39, %v674_v38 }
 0x231   : > { %1265 = vmatprep.mubr.msk.bf16.mxu0 %vm483_vm1, %v680_v41 }
 0x232   : > { %1266 = vmatmul.mubr.msk.bf16.gmra.mxu0 %vm483_vm1, %v681_v42 }
 0x2ea   : > { %v1263_v50 = vpop.f32.mrf.mxu0 }
 0x2eb   : > { %v772_v3 = vsel %vm769_vm3, %v1263_v50, -1e+09 }
 0x2ec   : > { %v732_v51 = vpop.f32.mrf.mxu0  ;;  %v784_v11 = vsel %vm455_vm0, %v772_v3, -inf }
 0x2ed   : > { %v770_v55 = vsel %vm769_vm3, %v732_v51, -1e+09 }
 0x2ee   : > { %v1264_v57 = vpop.f32.mrf.mxu0  ;;  %v778_v59 = vsel %vm455_vm0, %v770_v55, -inf }
 0x2ef   : > { %779 = vmax.xlane.f32.xlu0 %v778_v59  ;;  %v773_v14 = vsel %vm769_vm3, %v1264_v57, -1e+09 }
 0x2f0   : > { %v735_v5 = vpop.f32.mrf.mxu0  ;;  %v787_v18 = vsel %vm455_vm0, %v773_v14, -inf }
 0x2f1   : > { %v771_v7 = vsel %vm769_vm3, %v735_v5, -1e+09 }
 0x2f2   : > { %v1267_v10 = vpop.f32.mrf.mxu0  ;;  %v781_v13 = vsel %vm455_vm0, %v771_v7, -inf }
 0x2f3   : > { %785 = vmax.xlane.f32.xlu0 %v784_v11  ;;  %782 = vmax.xlane.f32.xlu1 %v781_v13  ;;  %v776_v20 = vsel %vm769_vm3, %v1267_v10, -1e+09 }
 0x2f4   : > { %v748_v15 = vpop.f32.mrf.mxu0  ;;  %v796_v23 = vsel %vm455_vm0, %v776_v20, -inf }
 0x2f5   : > { %v774_v16 = vsel %vm769_vm3, %v748_v15, -1e+09 }
 0x2f6   : > { %v1268_v17 = vpop.f32.mrf.mxu0  ;;  %v790_v19 = vsel %vm455_vm0, %v774_v16, -inf }
 0x2f7   : > { %788 = vmax.xlane.f32.xlu0 %v787_v18  ;;  %791 = vmax.xlane.f32.xlu1 %v790_v19  ;;  %v777_v25 = vsel %vm769_vm3, %v1268_v17, -1e+09 }
 0x2f8   : > { %v751_v21 = vpop.f32.mrf.mxu0  ;;  %v799_v26 = vsel %vm455_vm0, %v777_v25, -inf }
 0x2f9   : > { %v775_v22 = vsel %vm769_vm3, %v751_v21, -1e+09 }
 0x2fa   : > { %v793_v24 = vsel %vm455_vm0, %v775_v22, -inf }
 0x2fb   : > { %797 = vmax.xlane.f32.xlu1 %v796_v23  ;;  %794 = vmax.xlane.f32.xlu0 %v793_v24 }
 0x2ff   : > { %800 = vmax.xlane.f32.xlu0 %v799_v26 }
 0x378   : > { %v780_v27 = vpop.xlane.xlu0 %779 }
 0x379   : > { %v802_v28 = vsub.f32 %v770_v55, %v780_v27 }
 0x37b   : > { %v810_v33 = vmul.f32 1.442695, %v802_v28 }
 0x37c   : > { %v786_v29 = vpop.xlane.xlu0 %785  ;;  %v783_v30 = vpop.xlane.xlu1 %782 }
 0x37d   : > { %v804_v31 = vsub.f32 %v772_v3, %v786_v29  ;;  %v803_v32 = vsub.f32 %v771_v7, %v783_v30 }
 0x37f   : > { %v814_v34 = vmul.f32 1.442695, %v804_v31  ;;  %v812_v35 = vmul.f32 1.442695, %v803_v32 }
 0x380   : > { %v789_v36 = vpop.xlane.xlu0 %788  ;;  %v792_v37 = vpop.xlane.xlu1 %791 }
 0x381   : > { %1343 = vpow2.f32 %v814_v34  ;;  %v805_v38 = vsub.f32 %v773_v14, %v789_v36  ;;  %v806_v40 = vsub.f32 %v774_v16, %v792_v37 }
 0x382   : > { %1345 = vpow2.f32 %v812_v35 }
 0x383   : > { %1347 = vpow2.f32 %v810_v33  ;;  %v816_v39 = vmul.f32 1.442695, %v805_v38  ;;  %v818_v45 = vmul.f32 1.442695, %v806_v40 }
 0x384   : > { %v798_v41 = vpop.xlane.xlu1 %797  ;;  %v795_v42 = vpop.xlane.xlu0 %794 }
 0x385   : > { %1349 = vpow2.f32 %v816_v39  ;;  %v808_v43 = vsub.f32 %v776_v20, %v798_v41  ;;  %v807_v44 = vsub.f32 %v775_v22, %v795_v42 }
 0x387   : > { %v822_v46 = vmul.f32 1.442695, %v808_v43  ;;  %v820_v47 = vmul.f32 1.442695, %v807_v44 }
 0x388   : > { %v801_v48 = vpop.xlane.xlu0 %800 }
 0x389   : > { %1351 = vpow2.f32 %v822_v46  ;;  %v809_v49 = vsub.f32 %v777_v25, %v801_v48 }
 0x38a   : > { %1353 = vpow2.f32 %v820_v47 }
 0x38b   : > { %1355 = vpow2.f32 %v818_v45  ;;  %v824_v50 = vmul.f32 1.442695, %v809_v49  ;;  %v1342_v49 = vld [vmem:[%s1663_s7] sm:$0xff]  }
 0x38c   : > { %1279 = vmatprep.subr.bf16.mxu0 %v1342_v49 }
 0x38d   : > { %1357 = vpow2.f32 %v824_v50  ;;  %1280 = vmatpush3.bf16.msra.mxu0 %v1342_v49 }
 0x38e   : > { %v1344_v51 = vpop.eup %1343 }
 0x38f   : > { %v1346_v55 = vpop.eup %1345  ;;  %v832_v57 = vsel %vm455_vm0, %v1344_v51, 0.0 }
 0x390   : > { %v1348_v59 = vpop.eup %1347  ;;  %833 = vadd.xlane.f32.xlu1 %v832_v57  ;;  %v829_v3 = vsel %vm455_vm0, %v1346_v55, 0.0 }
 0x391   : > { %830 = vadd.xlane.f32.xlu0 %v829_v3  ;;  %v826_v7 = vsel %vm455_vm0, %v1348_v59, 0.0 }
 0x392   : > { %v1350_v5 = vpop.eup %1349 }
 0x393   : > { %v835_v10 = vsel %vm455_vm0, %v1350_v5, 0.0 }
 0x394   : > { %827 = vadd.xlane.f32.xlu1 %v826_v7 }
 0x395   : > { %836 = vadd.xlane.f32.xlu0 %v835_v10 }
 0x396   : > { %v1352_v11 = vpop.eup %1351 }
 0x397   : > { %v1354_v13 = vpop.eup %1353  ;;  %v844_v14 = vsel %vm455_vm0, %v1352_v11, 0.0 }
 0x398   : > { %v1356_v15 = vpop.eup %1355  ;;  %845 = vadd.xlane.f32.xlu1 %v844_v14  ;;  %v841_v16 = vsel %vm455_vm0, %v1354_v13, 0.0 }
 0x399   : > { %842 = vadd.xlane.f32.xlu0 %v841_v16  ;;  %v838_v18 = vsel %vm455_vm0, %v1356_v15, 0.0 }
 0x39a   : > { %v1358_v17 = vpop.eup %1357 }
 0x39b   : > { %v847_v19 = vsel %vm455_vm0, %v1358_v17, 0.0 }
 0x39c   : > { %839 = vadd.xlane.f32.xlu1 %v838_v18 }
 0x39d   : > { %848 = vadd.xlane.f32.xlu0 %v847_v19 }
 0x3ad   : > { %871 = vrot.lane.b32.xlu1 %v1563_v12, %s1401_s16 }
 0x419   : > { %v834_v20 = vpop.xlane.xlu1 %833 }
 0x41a   : > { %v831_v21 = vpop.xlane.xlu0 %830 }
 0x41b   : > { %1359 = vrcp.f32 %v831_v21 }
 0x41c   : > { %1361 = vrcp.f32 %v834_v20 }
 0x41d   : > { %v828_v22 = vpop.xlane.xlu1 %827 }
 0x41e   : > { %1363 = vrcp.f32 %v828_v22  ;;  %v837_v23 = vpop.xlane.xlu0 %836 }
 0x41f   : > { %1365 = vrcp.f32 %v837_v23 }
 0x421   : > { %v846_v24 = vpop.xlane.xlu1 %845 }
 0x422   : > { %v843_v25 = vpop.xlane.xlu0 %842 }
 0x423   : > { %1367 = vrcp.f32 %v843_v25 }
 0x424   : > { %1369 = vrcp.f32 %v846_v24 }
 0x425   : > { %v840_v26 = vpop.xlane.xlu1 %839 }
 0x426   : > { %1371 = vrcp.f32 %v840_v26  ;;  %v849_v27 = vpop.xlane.xlu0 %848 }
 0x427   : > { %1373 = vrcp.f32 %v849_v27 }
 0x428   : > { %v1360_v28 = vpop.eup %1359 }
 0x429   : > { %v872_v29 = vpop.permute.xlu1 %871  ;;  %v1362_v12 = vpop.eup %1361  ;;  %v859_v34 = vmul.f32 %v1360_v28, %v1346_v55 }
 0x42a   : > { %v887_v30 = vsel %vm885_vm4, %v872_v29, 0  ;;  %1292 = vmatprep.subr.msk.bf16.mxu1 %vm885_vm4, %v872_v29  ;;  %v860_v35 = vmul.f32 %v1362_v12, %v1344_v51 }
 0x42b   : > { %v1364_v31 = vpop.eup %1363  ;;  %1270 = vmatpush3.bf16.msra.mxu1 %v887_v30 }
 0x42c   : > { %v1366_v32 = vpop.eup %1365  ;;  %v858_v33 = vmul.f32 %v1364_v31, %v1348_v59 }
 0x42d   : > { %v861_v36 = vmul.f32 %v1366_v32, %v1350_v5 }
 0x42e   : > { %v866_v37 = vpack.c.bf16 %v859_v34, %v858_v33 }
 0x42f   : > { %v867_v38 = vpack.c.bf16 %v861_v36, %v860_v35 }
 0x430   : > { %1271 = vmatprep.mubr.msk.bf16.mxu1 %vm455_vm0, %v866_v37  ;;  %v1368_v39 = vpop.eup %1367 }
 0x431   : > { %1272 = vmatmul.mubr.msk.bf16.vlgmr.msra.gmra.mxu1 %vm455_vm0, %v867_v38  ;;  %v1370_v40 = vpop.eup %1369  ;;  %v863_v44 = vmul.f32 %v1368_v39, %v1354_v13 }
 0x432   : > { %v864_v45 = vmul.f32 %v1370_v40, %v1352_v11 }
 0x433   : > { %v1372_v41 = vpop.eup %1371 }
 0x434   : > { %v1374_v42 = vpop.eup %1373  ;;  %v862_v43 = vmul.f32 %v1372_v41, %v1356_v15  ;;  %v1204_v15 = vld [vmem:[%s1664_s8] ss:$0 sm:$0xff] }
 0x435   : > { %v865_v46 = vmul.f32 %v1374_v42, %v1358_v17 }
 0x436   : > { %v868_v47 = vpack.c.bf16 %v863_v44, %v862_v43 }
 0x437   : > { %v869_v48 = vpack.c.bf16 %v865_v46, %v864_v45 }
 0x438   : > { %1275 = vmatprep.mubr.msk.bf16.mxu1 %vm455_vm0, %v868_v47 }
 0x439   : > { %1276 = vmatmul.mubr.msk.bf16.gmra.mxu1 %vm455_vm0, %v869_v48 }
 0x4f1   : > { %v1273_v50 = vpop.f32.mrf.mxu1 }
 0x4f3   : > { %v923_v51 = vpop.f32.mrf.mxu1 }
 0x4f5   : > { %v1274_v55 = vpop.f32.mrf.mxu1 }
 0x4f6   : > { %v955_v3 = vpack.c.bf16 %v1274_v55, %v1273_v50 }
 0x4f7   : > { %v926_v57 = vpop.f32.mrf.mxu1 }
 0x4f8   : > { %v954_v59 = vpack.c.bf16 %v926_v57, %v923_v51 }
 0x4f9   : > { %v1277_v5 = vpop.f32.mrf.mxu1 }
 0x4fa   : > { %1281 = vmatprep.mubr.msk.bf16.mxu0 %vm483_vm1, %v954_v59 }
 0x4fb   : > { %v939_v7 = vpop.f32.mrf.mxu1  ;;  %1282 = vmatmul.mubr.msk.bf16.vlgmr.msra.gmra.mxu0 %vm483_vm1, %v955_v3 }
 0x4fd   : > { %v1278_v10 = vpop.f32.mrf.mxu1 }
 0x4fe   : > { %v957_v14 = vpack.c.bf16 %v1278_v10, %v1277_v5 }
 0x4ff   : > { %v942_v11 = vpop.f32.mrf.mxu1 }
 0x500   : > { %v956_v13 = vpack.c.bf16 %v942_v11, %v939_v7 }
 0x502   : > { %1285 = vmatprep.mubr.msk.bf16.mxu0 %vm483_vm1, %v956_v13 }
 0x503   : > { %1286 = vmatmul.mubr.msk.bf16.gmra.mxu0 %vm483_vm1, %v957_v14 }
 0x5bb   : > { %v1283_v16 = vpop.f32.mrf.mxu0 }
 0x5bc   : > { %v1025_v17 = vadd.f32 %v1283_v16, %v1204_v15 }
 0x5bd   : > { %v1016_v18 = vpop.f32.mrf.mxu0 }
 0x5be   : > { %v1049_v19 = vadd.f32 %v1025_v17, %v563_v1  ;;  %v1017_v20 = vadd.f32 %v1204_v15, %v1016_v18 }
 0x5bf   : > { %v1284_v21 = vpop.f32.mrf.mxu0 }
 0x5c0   : > { %1057 = vst.msk [vmem:[%s404_s24 + $0x10] sm:$0xff] %vm483_vm1, %v1049_v19  ;;  %v1047_v22 = vadd.f32 %v1017_v20, %v561_v63  ;;  %v1028_v23 = vadd.f32 %v1284_v21, %v1204_v15 }
 0x5c1   : > { %v1019_v24 = vpop.f32.mrf.mxu0 }
 0x5c2   : > { %1055 = vst.msk [vmem:[%s404_s24] sm:$0xff] %vm483_vm1, %v1047_v22  ;;  %v1050_v25 = vadd.f32 %v1028_v23, %v564_v60  ;;  %v1020_v26 = vadd.f32 %v1204_v15, %v1019_v24 }
 0x5c3   : > { %v1287_v27 = vpop.f32.mrf.mxu0 }
 0x5c4   : > { %1058 = vst.msk [vmem:[%s404_s24 + $0x18] sm:$0xff] %vm483_vm1, %v1050_v25  ;;  %v1048_v56 = vadd.f32 %v1020_v26, %v562_v0  ;;  %v1041_v1 = vadd.f32 %v1287_v27, %v1204_v15 }
 0x5c5   : > { %v1032_v28 = vpop.f32.mrf.mxu0 }
 0x5c6   : > { %1056 = vst.msk [vmem:[%s404_s24 + $0x8] sm:$0xff] %vm483_vm1, %v1048_v56  ;;  %v1053_v53 = vadd.f32 %v1041_v1, %v567_v8  ;;  %v1033_v63 = vadd.f32 %v1204_v15, %v1032_v28 }
 0x5c7   : > { %v1288_v29 = vpop.f32.mrf.mxu0 }
 0x5c8   : > { %1061 = vst.msk [vmem:[%s404_s24 + $0x30] sm:$0xff] %vm483_vm1, %v1053_v53  ;;  %v1051_v54 = vadd.f32 %v1033_v63, %v565_v61  ;;  %v1044_v60 = vadd.f32 %v1288_v29, %v1204_v15 }
 0x5c9   : > { %v1035_v12 = vpop.f32.mrf.mxu0 }
 0x5ca   : > { %1059 = vst.msk [vmem:[%s404_s24 + $0x20] sm:$0xff] %vm483_vm1, %v1051_v54  ;;  %v1054_v58 = vadd.f32 %v1044_v60, %v568_v9  ;;  %v1036_v0 = vadd.f32 %v1204_v15, %v1035_v12 }
 0x5cc   : > { %1062 = vst.msk [vmem:[%s404_s24 + $0x38] sm:$0xff] %vm483_vm1, %v1054_v58  ;;  %v1052_v4 = vadd.f32 %v1036_v0, %v566_v2 }
 0x5ce   : > { %1060 = vst.msk [vmem:[%s404_s24 + $0x28] sm:$0xff] %vm483_vm1, %v1052_v4 }
 0x5cf PF: > { %s19_s11 = sadd.s32 1, %s1397_s11   ;;  %s1666_s30 = smov %s1393_s10 }
 0x5d0   : > { %p16_p5 = scmp.ge.s32.totalorder %s19_s11, 4   ;;  %s1667_s10 = smov %s1669_s12 }
 0x5d2   :  { %18 = sbr.rel (!%p16_p5) target bundleno = 2 (0x2), region = 92 }

// kernel: lavt_vlt_forward.16
= control target key start
LH: loop header
LB: loop body
LE: loop exit
PB: predicated region body
PF: predicated region fallthrough
CT: control target
= control target key end

     0   :  { %s1375_s21 = smov 0   ;;  %s1523_s0 = inlined_call_operand.vmem [shape: f32[2,8,32], index: 0, kind: input, shape index: {}]   ;;  %s1524_s1 = inlined_call_operand.vmem [shape: f32[2,1,8], index: 1, kind: input, shape index: {}]   ;;  %s1525_s2 = inlined_call_operand.vmem [shape: f32[1,32], index: 2, kind: input, shape index: {}]   ;;  %s1526_s3 = inlined_call_operand.vmem [shape: f32[1,32], index: 3, kind: input, shape index: {}]   ;;  %s1527_s4 = inlined_call_operand.vmem [shape: bf16[32,96], index: 4, kind: input, shape index: {}]   ;;  %s1528_s5 = inlined_call_operand.vmem [shape: f32[1,96], index: 5, kind: input, shape index: {}]   ;;  %s1529_s6 = inlined_call_operand.vmem [shape: bf16[32,32], index: 6, kind: input, shape index: {}]   ;;  %s1530_s7 = inlined_call_operand.vmem [shape: f32[1,32], index: 7, kind: input, shape index: {}]   ;;  %s1531_s8 = inlined_call_operand.vmem [shape: f32[1,32], index: 8, kind: input, shape index: {}]   ;;  %s1532_s9 = inlined_call_operand.vmem [shape: f32[1,32], index: 9, kind: input, shape index: {}]   ;;  %s1533_s10 = inlined_call_operand.vmem [shape: bf16[32,128], index: 10, kind: input, shape index: {}]   ;;  %s1534_s11 = inlined_call_operand.vmem [shape: f32[1,128], index: 11, kind: input, shape index: {}]   ;;  %s1535_s12 = inlined_call_operand.vmem [shape: bf16[128,32], index: 12, kind: input, shape index: {}]   ;;  %s1536_s13 = inlined_call_operand.vmem [shape: f32[1,32], index: 13, kind: input, shape index: {}]   ;;  %s1537_s14 = inlined_call_operand.vmem [shape: f32[1,32], index: 14, kind: input, shape index: {}]   ;;  %s1538_s15 = inlined_call_operand.vmem [shape: f32[1,32], index: 15, kind: input, shape index: {}]   ;;  %s1539_s16 = inlined_call_operand.vmem [shape: f32[2,8,32], index: 16, kind: output, shape index: {}]  }
   0x1   :  { %1540 = sst [smem:[#allocation2_spill]] %s1523_s0 }
   0x2 LB: > { %s1124_s22 = sadd.s32 4294967295, %s1283_s21   ;;  %p1128_p0 = scmp.ge.s32.totalorder %s1283_s21, 1  ;;  %s1283_s21 = sphi %s1375_s21, %s26_s21  }
   0x3   : > { %p469_p1 = scmp.lt.s32.totalorder %s1283_s21, 3 }
   0x5   : > { %p470_p2 = pnand %p1128_p0, %p469_p1 }
   0x6   : > { %p520_p3 = scmp.lt.s32.totalorder (!%p470_p2), %s1124_s22, 1  ;;  %s1541_s26 = sld [smem:[#allocation2_spill]] (!%p470_p2) }
   0x7   : > { %473 = sbr.rel (%p470_p2) target bundleno = 2561 (0xa01), region = 84  ;;  %s1289_s30 = smov (!%p470_p2), 64  }
   0xc   : > { %s1543_s22 = smov (!%p520_p3, %s1124_s22), 1  ;;  %vm536_vm0 = vcmask 261120   ;;  %v1253_v7 = vld [vmem:[%s1527_s4 + $0x8] sm:$0xff]   ;;  %v1285_v8 = vmov 0.0   ;;  %vm1286_vm1 = vmmov 0   ;;  %v1254_v9 = vld [vmem:[%s1527_s4] sm:$0xff]   ;;  %v686_v31 = vlaneseq }
   0xd   : > { %s1129_s23 = sshll.u32 %s1543_s22, 3  ;;  %1184 = vmatprep.subr.bf16.mxu0 %v1285_v8  ;;  %1188 = vmatprep.mubr.msk.bf16.mxu0 %vm1286_vm1, %v1285_v8  ;;  %v1131_v14 = vld [vmem:[%s1525_s2] ss:$0 sm:$0xff]  ;;  %s526_s29 = scalar_lea.vmem %s1524_s1, %s1543_s22  ;;  %v1288_v35 = vmov 0   ;;  %vm692_vm4 = vcmask 64512   ;;  %v1255_v49 = vld [vmem:[%s1529_s6 + $0x8] sm:$0xff]  }
   0xe   : > { %s523_s27 = scalar_lea.vmem %s1541_s26, %s1129_s23  ;;  %1185 = vmatpush3.bf16.msra.mxu0 %v1253_v7  ;;  %1204 = vmatprep.subr.bf16.mxu1 %v1285_v8  ;;  %v1132_v16 = vld [vmem:[%s1526_s3] ss:$0 sm:$0xff]  ;;  %s1287_s26 = smov 96   ;;  %v687_v33 = vshrl.u32 %v686_v31, 7  ;;  %vm710_vm5 = vcmask 1043456  }
   0xf   : > { %v532_v0 = vld [vmem:[%s523_s27] sm:$0xff]  ;;  %1186 = vmatprep.subr.bf16.mxu0 %v1285_v8  ;;  %1208 = vmatprep.mubr.msk.bf16.mxu1 %vm1286_vm1, %v1285_v8  ;;  %s530_s20 = scalar_lea.vmem %s1539_s16, %s1129_s23 }
  0x10   : > { %v537_v1 = vsel %vm536_vm0, %v532_v0, 0.0  ;;  %v1133_v20 = vld [vmem:[%s1528_s5] ss:$0 sm:$0xff]  ;;  %v688_v34 = vsub.s32 0, %v687_v33  ;;  %1205 = vmatpush3.bf16.msra.mxu1 %v1255_v49 }
  0x11   : > { %538 = vadd.xlane.f32.xlu0 %v537_v1  ;;  %v533_v32 = vld [vmem:[%s526_s29] sm:$0x1]  ;;  %1206 = vmatprep.subr.bf16.mxu1 %v1285_v8 }
  0x12   : > { %1187 = vmatpush3.bf16.msra.mxu0 %v1254_v9  ;;  %vm684_vm2 = vcmp.gt.f32.partialorder %v533_v32, 0.5  ;;  %v1256_v56 = vld [vmem:[%s1529_s6] sm:$0xff]  }
  0x13   : > { %1192 = vmatprep.subr.bf16.mxu0 %v1285_v8  ;;  %v685_v36 = vsel %vm684_vm2, 1, %v1288_v35  ;;  %v1139_v62 = vld [vmem:[%s1530_s7] ss:$0 sm:$0xff] }
  0x14   : > { %v689_v37 = vrot.slane %v685_v36, %v688_v34  ;;  %1207 = vmatpush3.bf16.msra.mxu1 %v1256_v56  ;;  %v1266_v31 = vld [vmem:[%s1535_s12] sm:$0xff]  }
  0x15   : > { %1220 = vmatprep.subr.bf16.mxu1 %v1285_v8  ;;  %v1145_v32 = vld [vmem:[%s1534_s11] ss:$0 sm:$0xff] }
  0x16   : > { %vm690_vm3 = vcmp.eq.s32.totalorder %v689_v37, 1  ;;  %v1158_v56 = vld [vmem:[%s1537_s14] ss:$0 sm:$0xff] }
  0x9a   : > { %v539_v2 = vpop.xlane.xlu0 %538 }
  0x9b   : > { %v541_v3 = vmul.f32 0.03125, %v539_v2 }
  0x9d   : > { %v542_v4 = vsub.f32 %v532_v0, %v541_v3 }
  0x9f   : > { %v543_v5 = vmul.f32 %v542_v4, %v542_v4 }
  0xa1   : > { %v544_v6 = vsel %vm536_vm0, %v543_v5, 0.0 }
  0xa2   : > { %545 = vadd.xlane.f32.xlu0 %v544_v6 }
 0x12b   : > { %v546_v10 = vpop.xlane.xlu0 %545 }
 0x12c   : > { %v547_v11 = vmul.f32 0.03125, %v546_v10 }
 0x12e   : > { %v548_v12 = vadd.f32 1e-05, %v547_v11 }
 0x130   : > { %1267 = vrsqrt.f32 %v548_v12  ;;  %v1257_v12 = vld [vmem:[%s1533_s10 + $0x8] sm:$0xff]  }
 0x13d   : > { %v1268_v13 = vpop.eup %1267 }
 0x13e   : > { %v550_v15 = vmul.f32 %v1268_v13, %v542_v4  ;;  %v1258_v13 = vld [vmem:[%s1533_s10] sm:$0xff]  }
 0x140   : > { %v557_v17 = vmul.f32 %v1131_v14, %v550_v15  ;;  %v1259_v14 = vld [vmem:[%s1535_s12 + $0x38] sm:$0xff]   ;;  %v1260_v15 = vld [vmem:[%s1535_s12 + $0x30] sm:$0xff]  }
 0x142   : > { %v1413_v18 = vadd.f32 %v1132_v16, %v557_v17  ;;  %v1261_v16 = vld [vmem:[%s1535_s12 + $0x28] sm:$0xff]   ;;  %v1262_v17 = vld [vmem:[%s1535_s12 + $0x20] sm:$0xff]  }
 0x144   : > { %v565_v19 = vpack.c.bf16 %v1413_v18, %v1413_v18 }
 0x146   : > { %1189 = vmatmul.mubr.msk.bf16.vlgmr.msra.gmra.mxu0 %vm536_vm0, %v565_v19  ;;  %v1264_v19 = vld [vmem:[%s1535_s12 + $0x10] sm:$0xff]  }
 0x147   : > { %1194 = vmatprep.mubr.msk.bf16.mxu0 %vm1286_vm1, %v1285_v8 }
 0x206   : > { %v626_v21 = vpop.f32.mrf.mxu0 }
 0x207   : > { %v627_v22 = vadd.f32 %v1133_v20, %v626_v21 }
 0x208   : > { %v1190_v23 = vpop.f32.mrf.mxu0 }
 0x209   : > { %v634_v24 = vpack.c.bf16 %v627_v22, %v627_v22  ;;  %v632_v29 = vmul.f32 0.17677669, %v627_v22 }
 0x20a   : > { %v629_v25 = vpop.f32.mrf.mxu0 }
 0x20b   : > { %636 = vrot.lane.b32.xlu1 %v634_v24, %s1287_s26  ;;  %v633_v30 = vpack.c.bf16 %v632_v29, %v632_v29 }
 0x20c   : > { %v1191_v26 = vpop.f32.mrf.mxu0 }
 0x20d   : > { %v1144_v26 = vld [vmem:[%s1532_s9] ss:$0 sm:$0xff] }
 0x27d   : > { %v637_v27 = vpop.permute.xlu1 %636 }
 0x27e   : > { %v642_v28 = vsel %vm536_vm0, %v637_v27, 0 }
 0x27f   : > { %1193 = vmatpush3.bf16.xpose.msra.mxu0 %v642_v28 }
 0x280   : > { %1198 = vmatprep.subr.bf16.mxu0 %v1285_v8 }
 0x286   : > { %1195 = vmatmul.mubr.msk.bf16.vlgmr.msra.gmra.mxu0 %vm536_vm0, %v633_v30  ;;  %v1265_v30 = vld [vmem:[%s1535_s12 + $0x8] sm:$0xff]  }
 0x287   : > { %1200 = vmatprep.mubr.msk.bf16.mxu0 %vm1286_vm1, %v1285_v8 }
 0x346   : > { %v678_v38 = vpop.f32.mrf.mxu0 }
 0x347   : > { %v691_v39 = vsel %vm690_vm3, %v678_v38, -1e+09 }
 0x348   : > { %v1196_v40 = vpop.f32.mrf.mxu0  ;;  %v693_v41 = vsel %vm692_vm4, %v691_v39, -inf }
 0x349   : > { %694 = vmax.xlane.f32.xlu1 %v693_v41 }
 0x34a   : > { %v681_v42 = vpop.f32.mrf.mxu0 }
 0x34c   : > { %v1197_v43 = vpop.f32.mrf.mxu0 }
 0x3d2   : > { %v695_v44 = vpop.xlane.xlu1 %694 }
 0x3d3   : > { %v696_v45 = vsub.f32 %v691_v39, %v695_v44 }
 0x3d5   : > { %v697_v46 = vmul.f32 1.442695, %v696_v45 }
 0x3d7   : > { %1269 = vpow2.f32 %v697_v46 }
 0x3e4   : > { %v1270_v47 = vpop.eup %1269 }
 0x3e5   : > { %v699_v48 = vsel %vm692_vm4, %v1270_v47, 0.0 }
 0x3e6   : > { %700 = vadd.xlane.f32.xlu0 %v699_v48 }
 0x3fc   : > { %705 = vrot.lane.b32.xlu0 %v634_v24, %s1289_s30  ;;  %v1143_v24 = vld [vmem:[%s1531_s8] ss:$0 sm:$0xff] }
 0x46f   : > { %v701_v50 = vpop.xlane.xlu0 %700 }
 0x470   : > { %1271 = vrcp.f32 %v701_v50 }
 0x473   : > { %v706_v51 = vpop.permute.xlu0 %705 }
 0x474   : > { %v712_v52 = vsel %vm710_vm5, %v706_v51, 0 }
 0x475   : > { %1199 = vmatpush3.bf16.msra.mxu0 %v712_v52 }
 0x476   : > { %1212 = vmatprep.subr.bf16.mxu0 %v1285_v8 }
 0x47d   : > { %v1272_v53 = vpop.eup %1271 }
 0x47e   : > { %v703_v54 = vmul.f32 %v1272_v53, %v1270_v47 }
 0x480   : > { %v704_v55 = vpack.c.bf16 %v703_v54, %v703_v54 }
 0x482   : > { %1201 = vmatmul.mubr.msk.bf16.vlgmr.msra.gmra.mxu0 %vm692_vm4, %v704_v55 }
 0x483   : > { %1216 = vmatprep.mubr.msk.bf16.mxu0 %vm1286_vm1, %v1285_v8  ;;  %1213 = vmatpush3.bf16.msra.mxu0 %v1257_v12 }
 0x484   : > { %1214 = vmatprep.subr.bf16.mxu0 %v1285_v8 }
 0x487   : > { %1215 = vmatpush3.bf16.msra.mxu0 %v1258_v13 }
 0x542   : > { %v748_v57 = vpop.f32.mrf.mxu0 }
 0x543   : > { %v754_v58 = vpack.c.bf16 %v748_v57, %v748_v57 }
 0x544   : > { %v1202_v59 = vpop.f32.mrf.mxu0 }
 0x545   : > { %1209 = vmatmul.mubr.msk.bf16.vlgmr.msra.gmra.mxu1 %vm536_vm0, %v754_v58  ;;  %v1159_v58 = vld [vmem:[%s1538_s15] ss:$0 sm:$0xff] }
 0x546   : > { %v751_v60 = vpop.f32.mrf.mxu0  ;;  %1236 = vmatprep.mubr.msk.bf16.mxu1 %vm1286_vm1, %v1285_v8  ;;  %1221 = vmatpush3.bf16.msra.mxu1 %v1259_v14 }
 0x547   : > { %1222 = vmatprep.subr.bf16.mxu1 %v1285_v8 }
 0x548   : > { %v1203_v61 = vpop.f32.mrf.mxu0 }
 0x54a   : > { %1223 = vmatpush3.bf16.msra.mxu1 %v1260_v15 }
 0x54b   : > { %1224 = vmatprep.subr.bf16.mxu1 %v1285_v8 }
 0x54e   : > { %1225 = vmatpush3.bf16.msra.mxu1 %v1261_v16 }
 0x54f   : > { %1226 = vmatprep.subr.bf16.mxu1 %v1285_v8 }
 0x552   : > { %1227 = vmatpush3.bf16.msra.mxu1 %v1262_v17 }
 0x553   : > { %1228 = vmatprep.subr.bf16.mxu1 %v1285_v8 }
 0x605   : > { %v815_v63 = vpop.f32.mrf.mxu1 }
 0x606   : > { %v816_v0 = vadd.f32 %v1139_v62, %v815_v63 }
 0x607   : > { %v1210_v1 = vpop.f32.mrf.mxu1 }
 0x608   : > { %v821_v2 = vadd.f32 %v816_v0, %v1413_v18  ;;  %v1263_v18 = vld [vmem:[%s1535_s12 + $0x18] sm:$0xff]  }
 0x609   : > { %v818_v3 = vpop.f32.mrf.mxu1  ;;  %1229 = vmatpush3.bf16.msra.mxu1 %v1263_v18 }
 0x60a   : > { %v824_v4 = vsel %vm536_vm0, %v821_v2, 0.0  ;;  %1230 = vmatprep.subr.bf16.mxu1 %v1285_v8 }
 0x60b   : > { %825 = vadd.xlane.f32.xlu0 %v824_v4  ;;  %v1211_v5 = vpop.f32.mrf.mxu1 }
 0x60d   : > { %1231 = vmatpush3.bf16.msra.mxu1 %v1264_v19 }
 0x60e   : > { %1232 = vmatprep.subr.bf16.mxu1 %v1285_v8 }
 0x611   : > { %1233 = vmatpush3.bf16.msra.mxu1 %v1265_v30 }
 0x612   : > { %1234 = vmatprep.subr.bf16.mxu1 %v1285_v8  ;;  %v1149_v8 = vld [vmem:[%s1536_s13] ss:$0 sm:$0xff] }
 0x615   : > { %1235 = vmatpush3.bf16.msra.mxu1 %v1266_v31 }
 0x694   : > { %v826_v6 = vpop.xlane.xlu0 %825 }
 0x695   : > { %v827_v7 = vmul.f32 0.03125, %v826_v6 }
 0x697   : > { %v828_v9 = vsub.f32 %v821_v2, %v827_v7 }
 0x699   : > { %v829_v10 = vmul.f32 %v828_v9, %v828_v9 }
 0x69b   : > { %v830_v11 = vsel %vm536_vm0, %v829_v10, 0.0 }
 0x69c   : > { %831 = vadd.xlane.f32.xlu1 %v830_v11 }
 0x725   : > { %v832_v20 = vpop.xlane.xlu1 %831 }
 0x726   : > { %v833_v21 = vmul.f32 0.03125, %v832_v20 }
 0x728   : > { %v834_v22 = vadd.f32 1e-05, %v833_v21 }
 0x72a   : > { %1273 = vrsqrt.f32 %v834_v22 }
 0x737   : > { %v1274_v23 = vpop.eup %1273 }
 0x738   : > { %v836_v25 = vmul.f32 %v1274_v23, %v828_v9 }
 0x73a   : > { %v843_v27 = vmul.f32 %v1143_v24, %v836_v25 }
 0x73c   : > { %v850_v28 = vadd.f32 %v1144_v26, %v843_v27 }
 0x73e   : > { %v851_v29 = vpack.c.bf16 %v850_v28, %v850_v28 }
 0x740   : > { %1217 = vmatmul.mubr.msk.bf16.vlgmr.msra.gmra.mxu0 %vm536_vm0, %v851_v29 }
 0x800   : > { %v912_v33 = vpop.f32.mrf.mxu0 }
 0x801   : > { %v913_v34 = vadd.f32 %v1145_v32, %v912_v33 }
 0x802   : > { %v1218_v35 = vpop.f32.mrf.mxu0 }
 0x803   : > { %v918_v36 = vmax.f32 %v913_v34, 0.0 }
 0x804   : > { %v915_v37 = vpop.f32.mrf.mxu0 }
 0x805   : > { %v919_v38 = vpack.c.bf16 %v918_v36, %v918_v36 }
 0x806   : > { %v1219_v39 = vpop.f32.mrf.mxu0 }
 0x807   : > { %1237 = vmatmul.mubr.bf16.vlgmr.msra.gmra.mxu1 %v919_v38 }
 0x8c7   : > { %v1025_v40 = vpop.f32.mrf.mxu1 }
 0x8c8   : > { %v1026_v41 = vadd.f32 %v1149_v8, %v1025_v40 }
 0x8c9   : > { %v1238_v42 = vpop.f32.mrf.mxu1 }
 0x8ca   : > { %v1031_v43 = vadd.f32 %v1026_v41, %v850_v28 }
 0x8cb   : > { %v1028_v44 = vpop.f32.mrf.mxu1 }
 0x8cc   : > { %v1034_v45 = vsel %vm536_vm0, %v1031_v43, 0.0 }
 0x8cd   : > { %1035 = vadd.xlane.f32.xlu1 %v1034_v45  ;;  %v1239_v46 = vpop.f32.mrf.mxu1 }
 0x956   : > { %v1036_v47 = vpop.xlane.xlu1 %1035 }
 0x957   : > { %v1037_v48 = vmul.f32 0.03125, %v1036_v47 }
 0x959   : > { %v1038_v49 = vsub.f32 %v1031_v43, %v1037_v48 }
 0x95b   : > { %v1039_v50 = vmul.f32 %v1038_v49, %v1038_v49 }
 0x95d   : > { %v1040_v51 = vsel %vm536_vm0, %v1039_v50, 0.0 }
 0x95e   : > { %1041 = vadd.xlane.f32.xlu1 %v1040_v51 }
 0x9e7   : > { %v1042_v52 = vpop.xlane.xlu1 %1041 }
 0x9e8   : > { %v1043_v53 = vmul.f32 0.03125, %v1042_v52 }
 0x9ea   : > { %v1044_v54 = vadd.f32 1e-05, %v1043_v53 }
 0x9ec   : > { %1275 = vrsqrt.f32 %v1044_v54 }
 0x9f9   : > { %v1276_v55 = vpop.eup %1275 }
 0x9fa   : > { %v1046_v57 = vmul.f32 %v1276_v55, %v1038_v49 }
 0x9fc   : > { %v1053_v59 = vmul.f32 %v1158_v56, %v1046_v57 }
 0x9fe   : > { %v1060_v60 = vadd.f32 %v1159_v58, %v1053_v59 }
 0xa00   : > { %1061 = vst.msk [vmem:[%s530_s20] sm:$0xff] %vm536_vm0, %v1060_v60 }
 0xa01 PF: > { %s26_s21 = sadd.s32 1, %s1283_s21  }
 0xa02   : > { %p23_p4 = scmp.ge.s32.totalorder %s26_s21, 4  }
 0xa04   :  { %25 = sbr.rel (!%p23_p4) target bundleno = 2 (0x2), region = 117 }

// kernel: lavt_vlt_forward.21
= control target key start
LH: loop header
LB: loop body
LE: loop exit
PB: predicated region body
PF: predicated region fallthrough
CT: control target
= control target key end

     0   :  { %v111_v0 = vmov 0.0   ;;  %vm112_vm0 = vmmov 0   ;;  %vm41_vm1 = vcmask 261120   ;;  %s154_s1 = inlined_call_operand.vmem [shape: bf16[32,128], index: 1, kind: input, shape index: {}]   ;;  %s155_s0 = inlined_call_operand.vmem [shape: f32[16,32], index: 0, kind: input, shape index: {}]   ;;  %s156_s2 = inlined_call_operand.vmem [shape: f32[1,128], index: 2, kind: input, shape index: {}]   ;;  %s157_s3 = inlined_call_operand.vmem [shape: f32[16,128], index: 3, kind: output, shape index: {}]  }
   0x1   :  { %99 = vmatprep.subr.bf16.mxu0 %v111_v0  ;;  %v109_v1 = vld [vmem:[%s154_s1 + $0x8] sm:$0xff]   ;;  %103 = vmatprep.mubr.msk.bf16.mxu0 %vm112_vm0, %v111_v0  ;;  %v110_v2 = vld [vmem:[%s154_s1] sm:$0xff]  }
   0x2   :  { %100 = vmatpush3.bf16.msra.mxu0 %v109_v1  ;;  %v15_v3 = vld [vmem:[%s155_s0] sm:$0xff]  ;;  %v16_v4 = vld [vmem:[%s155_s0 + $0x8] sm:$0xff] }
   0x3   :  { %101 = vmatprep.subr.bf16.mxu0 %v111_v0  ;;  %v17_v5 = vpack.c.bf16 %v16_v4, %v15_v3  ;;  %v92_v6 = vld [vmem:[%s156_s2] ss:$0 sm:$0xff] }
   0x6   :  { %102 = vmatpush3.bf16.msra.mxu0 %v110_v2 }
   0x9   :  { %104 = vmatmul.mubr.msk.bf16.vlgmr.msra.gmra.mxu0 %vm41_vm1, %v17_v5 }
  0xc9   :  { %v79_v7 = vpop.f32.mrf.mxu0 }
  0xca   :  { %v80_v8 = vadd.f32 %v92_v6, %v79_v7 }
  0xcb   :  { %v105_v9 = vpop.f32.mrf.mxu0 }
  0xcc   :  { %86 = vst [vmem:[%s157_s3] sm:$0xff] %v80_v8 }
  0xcd   :  { %v82_v10 = vpop.f32.mrf.mxu0 }
  0xce   :  { %v83_v11 = vadd.f32 %v92_v6, %v82_v10 }
  0xcf   :  { %v106_v12 = vpop.f32.mrf.mxu0 }
  0xd0   :  { %87 = vst [vmem:[%s157_s3 + $0x8] sm:$0xff] %v83_v11 }

// kernel: lavt_vlt_forward.20
= control target key start
LH: loop header
LB: loop body
LE: loop exit
PB: predicated region body
PF: predicated region fallthrough
CT: control target
= control target key end

     0   :  { %s1137_s30 = smov 0   ;;  %s1139_s10 = smov 0   ;;  %s1262_s0 = inlined_call_operand.vmem [shape: f32[2,4,2,4,32], index: 0, kind: input, shape index: {}]   ;;  %s1263_s1 = inlined_call_operand.vmem [shape: f32[2,8,64], index: 1, kind: input, shape index: {}]   ;;  %s1264_s2 = inlined_call_operand.vmem [shape: f32[2,1,8], index: 2, kind: input, shape index: {}]   ;;  %s1265_s3 = inlined_call_operand.vmem [shape: bf16[64,32], index: 3, kind: input, shape index: {}]   ;;  %s1266_s4 = inlined_call_operand.vmem [shape: f32[1,32], index: 4, kind: input, shape index: {}]   ;;  %s1267_s5 = inlined_call_operand.vmem [shape: bf16[32,32], index: 5, kind: input, shape index: {}]   ;;  %s1268_s6 = inlined_call_operand.vmem [shape: f32[1,32], index: 6, kind: input, shape index: {}]   ;;  %s1269_s7 = inlined_call_operand.vmem [shape: bf16[32,32], index: 7, kind: input, shape index: {}]   ;;  %s1270_s8 = inlined_call_operand.vmem [shape: f32[1,32], index: 8, kind: input, shape index: {}]   ;;  %s1271_s9 = inlined_call_operand.vmem [shape: f32[2,4,4,32], index: 9, kind: output, shape index: {}]  }
   0x1   :  { %s1141_s11 = smov 0  }
   0x2 LB: > { %s31_s12 = sadd.s32 1, %s1076_s10  ;;  %p932_p0 = scmp.ge.s32.totalorder %s1080_s11, 1  ;;  %s1080_s11 = sphi %s1141_s11, %s19_s11   ;;  %s1076_s10 = sphi %s1139_s10, %s1273_s10   ;;  %s1072_s30 = sphi %s1137_s30, %s1272_s30  }
   0x3   : > { %p33_p1 = scmp.ge.s32.totalorder %s31_s12, 2  ;;  %p326_p2 = scmp.lt.s32.totalorder %s1080_s11, 3 }
   0x5   : > { %s1275_s12 = smov (%p33_p1, %s31_s12), 0  ;;  %p327_p3 = pnand %p932_p0, %p326_p2 }
   0x6   : > { %p379_p4 = scmp.lt.s32.totalorder (!%p327_p3), %s1072_s30, 1  ;;  %s1084_s23 = smov (!%p327_p3), 32  }
   0x7   : > { %330 = sbr.rel (%p327_p3) target bundleno = 1461 (0x5b5), region = 56  ;;  %s1086_s24 = smov (!%p327_p3), 96  }
   0xc   : > { %v1042_v0 = vld [vmem:[%s1265_s3 + $0x18] sm:$0xff]   ;;  %v1082_v1 = vmov 0.0   ;;  %s1277_s30 = smov (!%p379_p4, %s1072_s30), 1  ;;  %v1043_v2 = vld [vmem:[%s1265_s3 + $0x10] sm:$0xff]   ;;  %vm1083_vm0 = vmmov 0   ;;  %v1044_v5 = vld [vmem:[%s1265_s3 + $0x8] sm:$0xff]   ;;  %v659_v49 = vlaneseq }
   0xd   : > { %973 = vmatprep.subr.bf16.mxu0 %v1082_v1  ;;  %985 = vmatprep.subr.bf16.mxu1 %v1082_v1  ;;  %s956_s17 = sshll.u32 %s1277_s30, 5  ;;  %v1045_v8 = vld [vmem:[%s1265_s3] sm:$0xff]   ;;  %vm431_vm1 = vcmask 261120   ;;  %vm484_vm2 = vcmask 523264   ;;  %v1046_v24 = vld [vmem:[%s1267_s5 + $0x8] sm:$0xff]   ;;  %s935_s15 = sshll.u32 %s1277_s30, 3 }
   0xe   : > { %974 = vmatpush3.bf16.msra.mxu0 %v1042_v0  ;;  %s387_s20 = scalar_lea.vmem %s1262_s0, %s956_s17  ;;  %981 = vmatprep.mubr.msk.bf16.mxu0 %vm1083_vm0, %v1082_v1  ;;  %v1047_v25 = vld [vmem:[%s1267_s5] sm:$0xff]   ;;  %s392_s18 = scalar_lea.vmem %s1263_s1, %s935_s15  ;;  %v660_v51 = vshrl.u32 %v659_v49, 7  ;;  %v1085_v53 = vmov 0   ;;  %vm666_vm5 = vcmask 64512   ;;  %vm696_vm6 = vcmask 1043456  }
   0xf   : > { %975 = vmatprep.subr.bf16.mxu0 %v1082_v1  ;;  %989 = vmatprep.mubr.msk.bf16.mxu1 %vm1083_vm0, %v1082_v1  ;;  %v412_v3 = vld [vmem:[%s387_s20 + $0x14] sm:$0xf]  ;;  %v408_v4 = vld [vmem:[%s387_s20 + $0x4] sm:$0xf]  ;;  %v414_v6 = vld [vmem:[%s387_s20 + $0x1c] sm:$0xf] }
  0x10   : > { %423 = vrot.lane.b32.xlu1 %v412_v3, %s1084_s23  ;;  %419 = vrot.lane.b32.xlu0 %v408_v4, %s1084_s23  ;;  %v410_v7 = vld [vmem:[%s387_s20 + $0xc] sm:$0xf]  ;;  %v411_v11 = vld [vmem:[%s387_s20 + $0x10] sm:$0xf]  ;;  %v661_v52 = vsub.s32 0, %v660_v51  ;;  %s957_s14 = sshll.u32 %s1277_s30, 4 }
  0x11   : > { %v407_v12 = vld [vmem:[%s387_s20] sm:$0xf]  ;;  %v413_v13 = vld [vmem:[%s387_s20 + $0x18] sm:$0xf]  ;;  %v409_v14 = vld [vmem:[%s387_s20 + $0x8] sm:$0xf]  ;;  %986 = vmatpush3.bf16.msra.mxu1 %v1046_v24  ;;  %s404_s17 = scalar_lea.vmem %s1271_s9, %s957_s14 }
  0x12   : > { %976 = vmatpush3.bf16.msra.mxu0 %v1043_v2  ;;  %987 = vmatprep.subr.bf16.mxu1 %v1082_v1  ;;  %v938_v26 = vld [vmem:[%s1266_s4] ss:$0 sm:$0xff]  ;;  %vm812_vm7 = vcmask 257024  }
  0x13   : > { %977 = vmatprep.subr.bf16.mxu0 %v1082_v1  ;;  %v531_v36 = vld [vmem:[%s392_s18] sm:$0xff] }
  0x14   : > { %425 = vrot.lane.b32.xlu1 %v414_v6, %s1084_s23  ;;  %421 = vrot.lane.b32.xlu0 %v410_v7, %s1084_s23  ;;  %v609_v37 = vpack.c.bf16 %v531_v36, %v531_v36  ;;  %v944_v39 = vld [vmem:[%s1268_s6] ss:$0 sm:$0xff]  ;;  %s395_s23 = scalar_lea.vmem %s1264_s2, %s1277_s30 }
  0x15   : > { %988 = vmatpush3.bf16.msra.mxu1 %v1047_v25  ;;  %v532_v50 = vld [vmem:[%s395_s23] sm:$0x1] }
  0x16   : > { %978 = vmatpush3.bf16.msra.mxu0 %v1044_v5  ;;  %993 = vmatprep.subr.bf16.mxu1 %v1082_v1  ;;  %v614_v38 = vsel %vm431_vm1, %v609_v37, 0  ;;  %vm657_vm3 = vcmp.gt.f32.partialorder %v532_v50, 0.5 }
  0x17   : > { %979 = vmatprep.subr.bf16.mxu0 %v1082_v1  ;;  %v658_v54 = vsel %vm657_vm3, 1, %v1085_v53 }
  0x18   : > { %v662_v55 = vrot.slane %v658_v54, %v661_v52 }
  0x1a   : > { %980 = vmatpush3.bf16.msra.mxu0 %v1045_v8  ;;  %vm663_vm4 = vcmp.eq.s32.totalorder %v662_v55, 1 }
  0x1b   : > { %999 = vmatprep.subr.bf16.mxu0 %v1082_v1 }
  0x82   : > { %v424_v9 = vpop.permute.xlu1 %423  ;;  %v420_v10 = vpop.permute.xlu0 %419 }
  0x83   : > { %v434_v17 = vsel %vm431_vm1, %v411_v11, %v424_v9  ;;  %v432_v18 = vsel %vm431_vm1, %v407_v12, %v420_v10 }
  0x86   : > { %v426_v15 = vpop.permute.xlu1 %425  ;;  %v422_v16 = vpop.permute.xlu0 %421 }
  0x87   : > { %v435_v19 = vsel %vm431_vm1, %v413_v13, %v426_v15  ;;  %v433_v20 = vsel %vm431_vm1, %v409_v14, %v422_v16  ;;  %v1048_v13 = vld [vmem:[%s1269_s7 + $0x8] sm:$0xff]  }
  0x88   : > { %v441_v21 = vcombine.low %v434_v17, %v435_v19  ;;  %v440_v22 = vcombine.low %v432_v18, %v433_v20 }
  0x8a   : > { %v444_v23 = vpack.c.bf16 %v441_v21, %v440_v22  ;;  %v1049_v21 = vld [vmem:[%s1269_s7] sm:$0xff]  }
  0x8c   : > { %982 = vmatmul.mubr.msk.bf16.vlgmr.msra.gmra.mxu0 %vm484_vm2, %v444_v23 }
  0x8d   : > { %1001 = vmatprep.mubr.msk.bf16.mxu0 %vm1083_vm0, %v1082_v1 }
 0x14c   : > { %v522_v27 = vpop.f32.mrf.mxu0 }
 0x14d   : > { %v1200_v29 = vadd.f32 %v938_v26, %v522_v27 }
 0x14e   : > { %v983_v28 = vpop.f32.mrf.mxu0 }
 0x14f   : > { %v529_v33 = vmax.f32 %v1200_v29, 0.0 }
 0x150   : > { %v525_v30 = vpop.f32.mrf.mxu0 }
 0x151   : > { %v1202_v31 = vadd.f32 %v938_v26, %v525_v30  ;;  %v950_v26 = vld [vmem:[%s1270_s8] ss:$0 sm:$0xff] }
 0x152   : > { %v984_v32 = vpop.f32.mrf.mxu0 }
 0x153   : > { %v530_v34 = vmax.f32 %v1202_v31, 0.0 }
 0x155   : > { %v543_v35 = vpack.c.bf16 %v530_v34, %v529_v33 }
 0x157   : > { %990 = vmatmul.mubr.msk.bf16.vlgmr.msra.gmra.mxu1 %vm431_vm1, %v543_v35 }
 0x158   : > { %995 = vmatprep.mubr.msk.bf16.mxu1 %vm1083_vm0, %v1082_v1  ;;  %994 = vmatpush3.bf16.xpose.msra.mxu1 %v614_v38 }
 0x159   : > { %1005 = vmatprep.subr.bf16.mxu1 %v1082_v1 }
 0x217   : > { %v599_v40 = vpop.f32.mrf.mxu1 }
 0x218   : > { %v600_v42 = vadd.f32 %v944_v39, %v599_v40 }
 0x219   : > { %v991_v41 = vpop.f32.mrf.mxu1 }
 0x21a   : > { %v606_v46 = vmul.f32 0.17677669, %v600_v42 }
 0x21b   : > { %v602_v43 = vpop.f32.mrf.mxu1 }
 0x21c   : > { %v603_v44 = vadd.f32 %v944_v39, %v602_v43 }
 0x21d   : > { %v992_v45 = vpop.f32.mrf.mxu1 }
 0x21e   : > { %v607_v47 = vmul.f32 0.17677669, %v603_v44 }
 0x220   : > { %v608_v48 = vpack.c.bf16 %v607_v47, %v606_v46 }
 0x222   : > { %996 = vmatmul.mubr.msk.bf16.vlgmr.msra.gmra.mxu1 %vm431_vm1, %v608_v48 }
 0x223   : > { %1009 = vmatprep.mubr.msk.bf16.mxu1 %vm1083_vm0, %v1082_v1  ;;  %1006 = vmatpush3.bf16.msra.mxu1 %v1048_v13 }
 0x224   : > { %1007 = vmatprep.subr.bf16.mxu1 %v1082_v1 }
 0x227   : > { %1008 = vmatpush3.bf16.msra.mxu1 %v1049_v21 }
 0x2e2   : > { %v650_v56 = vpop.f32.mrf.mxu1 }
 0x2e3   : > { %v664_v57 = vsel %vm663_vm4, %v650_v56, -1e+09 }
 0x2e4   : > { %v997_v58 = vpop.f32.mrf.mxu1  ;;  %v667_v59 = vsel %vm666_vm5, %v664_v57, -inf }
 0x2e5   : > { %668 = vmax.xlane.f32.xlu0 %v667_v59 }
 0x2e6   : > { %v653_v60 = vpop.f32.mrf.mxu1 }
 0x2e7   : > { %v665_v61 = vsel %vm663_vm4, %v653_v60, -1e+09 }
 0x2e8   : > { %v998_v62 = vpop.f32.mrf.mxu1  ;;  %v670_v63 = vsel %vm666_vm5, %v665_v61, -inf }
 0x2e9   : > { %671 = vmax.xlane.f32.xlu1 %v670_v63 }
 0x2fa   : > { %691 = vrot.lane.b32.xlu1 %v609_v37, %s1086_s24 }
 0x36e   : > { %v669_v0 = vpop.xlane.xlu0 %668 }
 0x36f   : > { %v673_v2 = vsub.f32 %v664_v57, %v669_v0 }
 0x371   : > { %v675_v3 = vmul.f32 1.442695, %v673_v2 }
 0x372   : > { %v672_v4 = vpop.xlane.xlu1 %671 }
 0x373   : > { %1050 = vpow2.f32 %v675_v3  ;;  %v674_v5 = vsub.f32 %v665_v61, %v672_v4 }
 0x375   : > { %v677_v6 = vmul.f32 1.442695, %v674_v5 }
 0x376   : > { %v692_v11 = vpop.permute.xlu1 %691 }
 0x377   : > { %1052 = vpow2.f32 %v677_v6  ;;  %v698_v12 = vsel %vm696_vm6, %v692_v11, 0 }
 0x378   : > { %1000 = vmatpush3.bf16.msra.mxu0 %v698_v12 }
 0x380   : > { %v1051_v7 = vpop.eup %1050 }
 0x381   : > { %v679_v8 = vsel %vm666_vm5, %v1051_v7, 0.0 }
 0x382   : > { %680 = vadd.xlane.f32.xlu0 %v679_v8 }
 0x384   : > { %v1053_v9 = vpop.eup %1052 }
 0x385   : > { %v682_v10 = vsel %vm666_vm5, %v1053_v9, 0.0 }
 0x386   : > { %683 = vadd.xlane.f32.xlu0 %v682_v10 }
 0x40b   : > { %v681_v14 = vpop.xlane.xlu0 %680 }
 0x40c   : > { %1054 = vrcp.f32 %v681_v14 }
 0x40f   : > { %v684_v15 = vpop.xlane.xlu0 %683 }
 0x410   : > { %1056 = vrcp.f32 %v684_v15 }
 0x419   : > { %v1055_v16 = vpop.eup %1054 }
 0x41a   : > { %v687_v19 = vmul.f32 %v1055_v16, %v1051_v7 }
 0x41d   : > { %v1057_v17 = vpop.eup %1056 }
 0x41e   : > { %v688_v18 = vmul.f32 %v1057_v17, %v1053_v9 }
 0x420   : > { %v689_v20 = vpack.c.bf16 %v688_v18, %v687_v19 }
 0x422   : > { %1002 = vmatmul.mubr.msk.bf16.vlgmr.msra.gmra.mxu0 %vm666_vm5, %v689_v20 }
 0x4e2   : > { %v734_v22 = vpop.f32.mrf.mxu0 }
 0x4e4   : > { %v1003_v23 = vpop.f32.mrf.mxu0 }
 0x4e6   : > { %v737_v1 = vpop.f32.mrf.mxu0 }
 0x4e7   : > { %v741_v24 = vpack.c.bf16 %v737_v1, %v734_v22 }
 0x4e8   : > { %v1004_v25 = vpop.f32.mrf.mxu0 }
 0x4e9   : > { %1010 = vmatmul.mubr.msk.bf16.vlgmr.msra.gmra.mxu1 %vm431_vm1, %v741_v24 }
 0x5a9   : > { %v797_v27 = vpop.f32.mrf.mxu1 }
 0x5aa   : > { %v798_v28 = vadd.f32 %v950_v26, %v797_v27 }
 0x5ab   : > { %v1011_v30 = vpop.f32.mrf.mxu1 }
 0x5ac   : > { %v804_v32 = vadd.f32 %v798_v28, %v529_v33 }
 0x5ad   : > { %v800_v35 = vpop.f32.mrf.mxu1 }
 0x5ae   : > { %v808_v36 = vcombine.high %v804_v32, %v804_v32  ;;  %813 = vst.msk [vmem:[%s404_s17] sm:$0xf] %vm812_vm7, %v804_v32  ;;  %v801_v37 = vadd.f32 %v950_v26, %v800_v35 }
 0x5af   : > { %v1012_v38 = vpop.f32.mrf.mxu1 }
 0x5b0   : > { %814 = vst.msk [vmem:[%s404_s17 + $0x4] sm:$0xf] %vm812_vm7, %v808_v36  ;;  %v805_v39 = vadd.f32 %v801_v37, %v530_v34 }
 0x5b2   : > { %v809_v40 = vcombine.high %v805_v39, %v805_v39  ;;  %815 = vst.msk [vmem:[%s404_s17 + $0x8] sm:$0xf] %vm812_vm7, %v805_v39 }
 0x5b4   : > { %816 = vst.msk [vmem:[%s404_s17 + $0xc] sm:$0xf] %vm812_vm7, %v809_v40 }
 0x5b5 PF: > { %s19_s11 = sadd.s32 1, %s1080_s11   ;;  %s1272_s30 = smov %s1076_s10 }
 0x5b6   : > { %p16_p5 = scmp.ge.s32.totalorder %s19_s11, 4   ;;  %s1273_s10 = smov %s1275_s12 }
 0x5b8   :  { %18 = sbr.rel (!%p16_p5) target bundleno = 2 (0x2), region = 92 }

// kernel: lavt_vlt_forward.25
= control target key start
LH: loop header
LB: loop body
LE: loop exit
PB: predicated region body
PF: predicated region fallthrough
CT: control target
= control target key end

     0   :  { %s422_s9 = smov 0   ;;  %s442_s0 = inlined_call_operand.vmem [shape: f32[2,2,2,32], index: 0, kind: input, shape index: {}]   ;;  %s443_s1 = inlined_call_operand.vmem [shape: f32[4,2], index: 1, kind: input, shape index: {}]   ;;  %s444_s2 = inlined_call_operand.vmem [shape: f32[2,2,4,32], index: 2, kind: output, shape index: {}]  }
   0x1 LB: > { %s356_s10 = sadd.s32 4294967295, %s403_s9   ;;  %p360_p0 = scmp.ge.s32.totalorder %s403_s9, 1  ;;  %s403_s9 = sphi %s422_s9, %s12_s9  }
   0x2   : > { %p112_p1 = scmp.lt.s32.totalorder %s403_s9, 3 }
   0x4   : > { %p113_p2 = pnand %p360_p0, %p112_p1 }
   0x5   : > { %p134_p3 = scmp.lt.s32.totalorder (!%p113_p2), %s356_s10, 1 }
   0x6   : > { %116 = sbr.rel (%p113_p2) target bundleno = 211 (0xd3), region = 28 }
   0xb   : > { %v405_v0 = vmov 0.0   ;;  %s446_s10 = smov (!%p134_p3, %s356_s10), 1  ;;  %vm406_vm0 = vmmov 0   ;;  %vm151_vm1 = vcmask 1041408   ;;  %v144_v1 = vld [vmem:[%s443_s1] sm:$0xf] }
   0xc   : > { %377 = vmatprep.subr.mxu0 %v405_v0  ;;  %382 = vmatprep.subr.mxu1 %v405_v0  ;;  %s371_s11 = sshll.u32 %s446_s10, 2  ;;  %vm147_vm2 = vcmask 15360   ;;  %s372_s17 = sshll.u32 %s446_s10, 3  ;;  %vm298_vm3 = vcmask 257024  }
   0xd   : > { %379 = vmatprep.mubr.msk.f32.mxu0 %vm406_vm0, %v405_v0  ;;  %384 = vmatprep.mubr.msk.f32.mxu1 %vm406_vm0, %v405_v0  ;;  %s138_s14 = scalar_lea.vmem %s442_s0, %s371_s11  ;;  %s143_s20 = scalar_lea.vmem %s444_s2, %s372_s17 }
   0xe   : > { %v145_v2 = vld [vmem:[%s138_s14] sm:$0x3]  ;;  %v146_v3 = vld [vmem:[%s138_s14 + $0x2] sm:$0x3] }
   0xf   : > { %378 = vmatpush3.msk.msra.mxu0 %vm151_vm1, %v145_v2  ;;  %383 = vmatpush3.msk.msra.mxu1 %vm151_vm1, %v146_v3 }
  0x10   : > { %380 = vmatmul.mubr.msk.f32.vlgmr.msra.gmra.mxu0 %vm147_vm2, %v144_v1  ;;  %385 = vmatmul.mubr.msk.f32.vlgmr.msra.gmra.mxu1 %vm147_vm2, %v144_v1 }
  0xd0   : > { %v221_v4 = vpop.f32.mrf.mxu0  ;;  %v294_v5 = vpop.f32.mrf.mxu1 }
  0xd1   : > { %299 = vst.msk [vmem:[%s143_s20] sm:$0xf] %vm298_vm3, %v221_v4  ;;  %300 = vst.msk [vmem:[%s143_s20 + $0x4] sm:$0xf] %vm298_vm3, %v294_v5 }
  0xd2   : > { %v381_v6 = vpop.f32.mrf.mxu0  ;;  %v386_v7 = vpop.f32.mrf.mxu1 }
  0xd3 PF: > { %s12_s9 = sadd.s32 1, %s403_s9  }
  0xd4   : > { %p9_p4 = scmp.ge.s32.totalorder %s12_s9, 4  }
  0xd6   :  { %11 = sbr.rel (!%p9_p4) target bundleno = 1 (0x1), region = 58 }

// kernel: lavt_vlt_forward.22
= control target key start
LH: loop header
LB: loop body
LE: loop exit
PB: predicated region body
PF: predicated region fallthrough
CT: control target
= control target key end

     0   :  { %s1205_s30 = smov 0   ;;  %s1207_s10 = smov 0   ;;  %s1362_s0 = inlined_call_operand.vmem [shape: f32[2,2,2,2,64], index: 0, kind: input, shape index: {}]   ;;  %s1363_s1 = inlined_call_operand.vmem [shape: f32[2,8,128], index: 1, kind: input, shape index: {}]   ;;  %s1364_s2 = inlined_call_operand.vmem [shape: f32[2,1,8], index: 2, kind: input, shape index: {}]   ;;  %s1365_s3 = inlined_call_operand.vmem [shape: bf16[128,64], index: 3, kind: input, shape index: {}]   ;;  %s1366_s4 = inlined_call_operand.vmem [shape: f32[1,64], index: 4, kind: input, shape index: {}]   ;;  %s1367_s5 = inlined_call_operand.vmem [shape: bf16[64,64], index: 5, kind: input, shape index: {}]   ;;  %s1368_s6 = inlined_call_operand.vmem [shape: f32[1,64], index: 6, kind: input, shape index: {}]   ;;  %s1369_s7 = inlined_call_operand.vmem [shape: bf16[64,64], index: 7, kind: input, shape index: {}]   ;;  %s1370_s8 = inlined_call_operand.vmem [shape: f32[1,64], index: 8, kind: input, shape index: {}]   ;;  %s1371_s9 = inlined_call_operand.vmem [shape: f32[2,2,2,64], index: 9, kind: output, shape index: {}]  }
   0x1   :  { %s1209_s11 = smov 0  }
   0x2 LB: > { %s31_s12 = sadd.s32 1, %s1144_s10  ;;  %p965_p0 = scmp.ge.s32.totalorder %s1148_s11, 1  ;;  %s1148_s11 = sphi %s1209_s11, %s19_s11   ;;  %s1144_s10 = sphi %s1207_s10, %s1373_s10   ;;  %s1140_s30 = sphi %s1205_s30, %s1372_s30  }
   0x3   : > { %p33_p1 = scmp.ge.s32.totalorder %s31_s12, 2  ;;  %p326_p2 = scmp.lt.s32.totalorder %s1148_s11, 3 }
   0x5   : > { %s1375_s12 = smov (%p33_p1, %s31_s12), 0  ;;  %p327_p3 = pnand %p965_p0, %p326_p2 }
   0x6   : > { %p379_p4 = scmp.lt.s32.totalorder (!%p327_p3), %s1140_s30, 1  ;;  %s1152_s23 = smov (!%p327_p3), 64  }
   0x7   : > { %330 = sbr.rel (%p327_p3) target bundleno = 1445 (0x5a5), region = 56 }
   0xc   : > { %v1106_v0 = vld [vmem:[%s1365_s3 + $0x38] sm:$0xff]   ;;  %v1150_v1 = vmov 0.0   ;;  %s1377_s30 = smov (!%p379_p4, %s1140_s30), 1  ;;  %v1107_v2 = vld [vmem:[%s1365_s3 + $0x30] sm:$0xff]   ;;  %v1108_v4 = vld [vmem:[%s1365_s3 + $0x28] sm:$0xff]   ;;  %vm1151_vm0 = vmmov 0   ;;  %v428_v15 = vlaneseq }
   0xd   : > { %1021 = vmatprep.subr.bf16.mxu0 %v1150_v1  ;;  %1041 = vmatprep.subr.bf16.mxu1 %v1150_v1  ;;  %s996_s17 = sshll.u32 %s1377_s30, 3  ;;  %v1109_v6 = vld [vmem:[%s1365_s3 + $0x20] sm:$0xff]   ;;  %v1114_v7 = vld [vmem:[%s1367_s5 + $0x18] sm:$0xff]   ;;  %v1115_v8 = vld [vmem:[%s1367_s5 + $0x10] sm:$0xff]   ;;  %v1153_v13 = vmov 1983009808   ;;  %s395_s18 = scalar_lea.vmem %s1364_s2, %s1377_s30 }
   0xe   : > { %1022 = vmatpush3.bf16.msra.mxu0 %v1106_v0  ;;  %s1240_s20 = scalar_lea.vmem %s1362_s0, %s996_s17  ;;  %1037 = vmatprep.mubr.msk.bf16.mxu0 %vm1151_vm0, %v1150_v1  ;;  %v1110_v9 = vld [vmem:[%s1365_s3 + $0x18] sm:$0xff]   ;;  %v1111_v10 = vld [vmem:[%s1365_s3 + $0x10] sm:$0xff]   ;;  %v1112_v11 = vld [vmem:[%s1365_s3 + $0x8] sm:$0xff]   ;;  %v426_v14 = vunpack.c.l.s4 %v1153_v13  ;;  %v429_v18 = vshrl.u32 %v428_v15, 7  ;;  %vm419_vm1 = vcmask 523264   ;;  %s392_s29 = scalar_lea.vmem %s1363_s1, %s996_s17  ;;  %v1154_v51 = vmov 0  }
   0xf   : > { %1023 = vmatprep.subr.bf16.mxu0 %v1150_v1  ;;  %v408_v3 = vld [vmem:[%s1240_s20 + $0x2] sm:$0x3]  ;;  %v410_v5 = vld [vmem:[%s1240_s20 + $0x6] sm:$0x3]  ;;  %1049 = vmatprep.mubr.msk.bf16.mxu1 %vm1151_vm0, %v1150_v1  ;;  %v407_v19 = vld [vmem:[%s1240_s20] sm:$0x3] }
  0x10   : > { %413 = vrot.lane.b32.xlu0 %v408_v3, %s1152_s23  ;;  %1042 = vmatpush3.bf16.msra.mxu1 %v1114_v7  ;;  %v1113_v12 = vld [vmem:[%s1365_s3] sm:$0xff]   ;;  %v427_v17 = vunpack.c.0.s8 %v426_v14  ;;  %v1116_v28 = vld [vmem:[%s1367_s5 + $0x8] sm:$0xff]   ;;  %v693_v50 = vsub.s32 0, %v429_v18  ;;  %vm697_vm4 = vcmask 60416   ;;  %vm717_vm5 = vcmask 1043456   ;;  %s997_s13 = sshll.u32 %s1377_s30, 2 }
  0x11   : > { %1043 = vmatprep.subr.bf16.mxu1 %v1150_v1  ;;  %v409_v20 = vld [vmem:[%s1240_s20 + $0x4] sm:$0x3]  ;;  %v971_v32 = vld [vmem:[%s1366_s4] ss:$0 sm:$0xff]  ;;  %vm713_vm6 = vcmask 64512   ;;  %vm847_vm7 = vcmask 517120  }
  0x12   : > { %1024 = vmatpush3.bf16.msra.mxu0 %v1107_v2  ;;  %v1285_v22 = vsub.s32 %v427_v17, %v429_v18  ;;  %v1117_v29 = vld [vmem:[%s1367_s5] sm:$0xff]  }
  0x13   : > { %1025 = vmatprep.subr.bf16.mxu0 %v1150_v1  ;;  %v546_v30 = vld [vmem:[%s392_s29] sm:$0xff] }
  0x14   : > { %415 = vrot.lane.b32.xlu0 %v410_v5, %s1152_s23  ;;  %1044 = vmatpush3.bf16.msra.mxu1 %v1115_v8  ;;  %v642_v31 = vpack.c.bf16 %v546_v30, %v546_v30  ;;  %v980_v41 = vld [vmem:[%s1368_s6] ss:$0 sm:$0xff]  ;;  %v1119_v5 = vld [vmem:[%s1369_s7 + $0x10] sm:$0xff]  }
  0x15   : > { %1045 = vmatprep.subr.bf16.mxu1 %v1150_v1  ;;  %v547_v49 = vld [vmem:[%s395_s18] sm:$0x1] }
  0x16   : > { %1026 = vmatpush3.bf16.msra.mxu0 %v1108_v4  ;;  %v647_v39 = vsel %vm419_vm1, %v642_v31, 0  ;;  %vm689_vm2 = vcmp.gt.f32.partialorder %v547_v49, 0.5  ;;  %v1118_v4 = vld [vmem:[%s1369_s7 + $0x18] sm:$0xff]  }
  0x17   : > { %1027 = vmatprep.subr.bf16.mxu0 %v1150_v1  ;;  %v690_v52 = vsel %vm689_vm2, 1, %v1154_v51 }
  0x18   : > { %1046 = vmatpush3.bf16.msra.mxu1 %v1116_v28  ;;  %711 = vrot.lane.b32.xlu0 %v642_v31, %s1152_s23  ;;  %v694_v53 = vrot.slane %v690_v52, %v693_v50  ;;  %s404_s23 = scalar_lea.vmem %s1371_s9, %s997_s13 }
  0x19   : > { %1047 = vmatprep.subr.bf16.mxu1 %v1150_v1 }
  0x1a   : > { %1028 = vmatpush3.bf16.msra.mxu0 %v1109_v6  ;;  %vm695_vm3 = vcmp.eq.s32.totalorder %v694_v53, 1  ;;  %v1120_v6 = vld [vmem:[%s1369_s7 + $0x8] sm:$0xff]  }
  0x1b   : > { %1029 = vmatprep.subr.bf16.mxu0 %v1150_v1 }
  0x1c   : > { %1048 = vmatpush3.bf16.msra.mxu1 %v1117_v29 }
  0x1d   : > { %1053 = vmatprep.subr.bf16.mxu1 %v1150_v1 }
  0x1e   : > { %1030 = vmatpush3.bf16.msra.mxu0 %v1110_v9 }
  0x1f   : > { %1031 = vmatprep.subr.bf16.mxu0 %v1150_v1 }
  0x22   : > { %1032 = vmatpush3.bf16.msra.mxu0 %v1111_v10 }
  0x23   : > { %1033 = vmatprep.subr.bf16.mxu0 %v1150_v1 }
  0x26   : > { %1034 = vmatpush3.bf16.msra.mxu0 %v1112_v11  ;;  %v1121_v11 = vld [vmem:[%s1369_s7] sm:$0xff]  }
  0x27   : > { %1035 = vmatprep.subr.bf16.mxu0 %v1150_v1 }
  0x2a   : > { %1036 = vmatpush3.bf16.msra.mxu0 %v1113_v12 }
  0x2b   : > { %1065 = vmatprep.subr.bf16.mxu0 %v1150_v1 }
  0x82   : > { %v414_v16 = vpop.permute.xlu0 %413 }
  0x83   : > { %v420_v23 = vsel %vm419_vm1, %v407_v19, %v414_v16  ;;  %v988_v16 = vld [vmem:[%s1370_s8] ss:$0 sm:$0xff] }
  0x86   : > { %v416_v21 = vpop.permute.xlu0 %415 }
  0x87   : > { %v421_v24 = vsel %vm419_vm1, %v409_v20, %v416_v21 }
  0x88   : > { %v424_v25 = vcombine.low %v420_v23, %v421_v24 }
  0x8a   : > { %v431_v26 = vrot.slane %v424_v25, %v1285_v22  ;;  %v712_v2 = vpop.permute.xlu0 %711 }
  0x8b   : > { %v719_v3 = vsel %vm717_vm5, %v712_v2, 0 }
  0x8c   : > { %v433_v27 = vpack.c.bf16 %v431_v26, %v431_v26 }
  0x8e   : > { %1038 = vmatmul.mubr.bf16.vlgmr.msra.gmra.mxu0 %v433_v27 }
  0x8f   : > { %1073 = vmatprep.mubr.msk.bf16.mxu0 %vm1151_vm0, %v1150_v1  ;;  %1066 = vmatpush3.bf16.msra.mxu0 %v1118_v4 }
  0x90   : > { %1067 = vmatprep.subr.bf16.mxu0 %v1150_v1 }
  0x93   : > { %1068 = vmatpush3.bf16.msra.mxu0 %v1119_v5 }
  0x94   : > { %1069 = vmatprep.subr.bf16.mxu0 %v1150_v1 }
  0x97   : > { %1070 = vmatpush3.bf16.msra.mxu0 %v1120_v6 }
  0x98   : > { %1071 = vmatprep.subr.bf16.mxu0 %v1150_v1 }
  0x9b   : > { %1072 = vmatpush3.bf16.msra.mxu0 %v1121_v11 }
 0x14e   : > { %v539_v33 = vpop.f32.mrf.mxu0 }
 0x14f   : > { %v540_v34 = vadd.f32 %v971_v32, %v539_v33 }
 0x150   : > { %v1039_v35 = vpop.f32.mrf.mxu0 }
 0x151   : > { %v1309_v36 = vmax.f32 %v540_v34, 0.0 }
 0x152   : > { %v542_v37 = vpop.f32.mrf.mxu0 }
 0x153   : > { %v566_v38 = vpack.c.bf16 %v1309_v36, %v1309_v36 }
 0x154   : > { %v1040_v40 = vpop.f32.mrf.mxu0 }
 0x155   : > { %1050 = vmatmul.mubr.msk.bf16.vlgmr.msra.gmra.mxu1 %vm419_vm1, %v566_v38 }
 0x156   : > { %1054 = vmatpush3.bf16.xpose.msra.mxu1 %v647_v39  ;;  %1055 = vmatprep.mubr.msk.bf16.mxu1 %vm1151_vm0, %v1150_v1 }
 0x157   : > { %1059 = vmatprep.subr.bf16.mxu1 %v1150_v1 }
 0x215   : > { %v634_v42 = vpop.f32.mrf.mxu1 }
 0x216   : > { %v635_v43 = vadd.f32 %v980_v41, %v634_v42 }
 0x217   : > { %v1051_v44 = vpop.f32.mrf.mxu1 }
 0x218   : > { %v640_v45 = vmul.f32 0.125, %v635_v43 }
 0x219   : > { %v637_v46 = vpop.f32.mrf.mxu1 }
 0x21a   : > { %v641_v47 = vpack.c.bf16 %v640_v45, %v640_v45 }
 0x21b   : > { %v1052_v48 = vpop.f32.mrf.mxu1 }
 0x21c   : > { %1056 = vmatmul.mubr.msk.bf16.vlgmr.msra.gmra.mxu1 %vm419_vm1, %v641_v47 }
 0x21d   : > { %1061 = vmatprep.mubr.msk.bf16.mxu1 %vm1151_vm0, %v1150_v1  ;;  %1060 = vmatpush3.bf16.msra.mxu1 %v719_v3 }
 0x2dc   : > { %v683_v54 = vpop.f32.mrf.mxu1 }
 0x2dd   : > { %v696_v55 = vsel %vm695_vm3, %v683_v54, -1e+09 }
 0x2de   : > { %v1057_v56 = vpop.f32.mrf.mxu1  ;;  %v698_v57 = vsel %vm697_vm4, %v696_v55, -inf }
 0x2df   : > { %699 = vmax.xlane.f32.xlu1 %v698_v57 }
 0x2e0   : > { %v686_v58 = vpop.f32.mrf.mxu1 }
 0x2e2   : > { %v1058_v59 = vpop.f32.mrf.mxu1 }
 0x368   : > { %v700_v60 = vpop.xlane.xlu1 %699 }
 0x369   : > { %v701_v61 = vsub.f32 %v696_v55, %v700_v60 }
 0x36b   : > { %v702_v62 = vmul.f32 1.442695, %v701_v61 }
 0x36d   : > { %1122 = vpow2.f32 %v702_v62 }
 0x37a   : > { %v1123_v63 = vpop.eup %1122 }
 0x37b   : > { %v704_v0 = vsel %vm697_vm4, %v1123_v63, 0.0 }
 0x37c   : > { %705 = vadd.xlane.f32.xlu1 %v704_v0 }
 0x405   : > { %v706_v7 = vpop.xlane.xlu1 %705 }
 0x406   : > { %1124 = vrcp.f32 %v706_v7 }
 0x413   : > { %v1125_v8 = vpop.eup %1124 }
 0x414   : > { %v708_v9 = vmul.f32 %v1125_v8, %v1123_v63 }
 0x416   : > { %v709_v10 = vpack.c.bf16 %v708_v9, %v708_v9 }
 0x418   : > { %1062 = vmatmul.mubr.msk.bf16.vlgmr.msra.gmra.mxu1 %vm713_vm6, %v709_v10 }
 0x4d8   : > { %v755_v12 = vpop.f32.mrf.mxu1 }
 0x4d9   : > { %v761_v13 = vpack.c.bf16 %v755_v12, %v755_v12 }
 0x4da   : > { %v1063_v14 = vpop.f32.mrf.mxu1 }
 0x4db   : > { %1074 = vmatmul.mubr.msk.bf16.vlgmr.msra.gmra.mxu0 %vm419_vm1, %v761_v13 }
 0x4dc   : > { %v758_v15 = vpop.f32.mrf.mxu1 }
 0x4de   : > { %v1064_v1 = vpop.f32.mrf.mxu1 }
 0x59b   : > { %v829_v17 = vpop.f32.mrf.mxu0 }
 0x59c   : > { %v830_v18 = vadd.f32 %v988_v16, %v829_v17 }
 0x59d   : > { %v1075_v19 = vpop.f32.mrf.mxu0 }
 0x59e   : > { %v835_v20 = vadd.f32 %v830_v18, %v1309_v36 }
 0x59f   : > { %v832_v21 = vpop.f32.mrf.mxu0 }
 0x5a0   : > { %v843_v23 = vrot.slane %v835_v20, %v1285_v22 }
 0x5a1   : > { %v1076_v24 = vpop.f32.mrf.mxu0 }
 0x5a2   : > { %v844_v25 = vcombine.high %v843_v23, %v843_v23  ;;  %848 = vst.msk [vmem:[%s404_s23] sm:$0x3] %vm847_vm7, %v843_v23 }
 0x5a4   : > { %849 = vst.msk [vmem:[%s404_s23 + $0x2] sm:$0x3] %vm847_vm7, %v844_v25 }
 0x5a5 PF: > { %s19_s11 = sadd.s32 1, %s1148_s11   ;;  %s1372_s30 = smov %s1144_s10 }
 0x5a6   : > { %p16_p5 = scmp.ge.s32.totalorder %s19_s11, 4   ;;  %s1373_s10 = smov %s1375_s12 }
 0x5a8   :  { %18 = sbr.rel (!%p16_p5) target bundleno = 2 (0x2), region = 92 }

// kernel: lavt_vlt_forward.24
= control target key start
LH: loop header
LB: loop body
LE: loop exit
PB: predicated region body
PF: predicated region fallthrough
CT: control target
= control target key end

     0   :  { %s948_s30 = smov 0   ;;  %s1042_s0 = inlined_call_operand.vmem [shape: f32[2,4,64], index: 0, kind: input, shape index: {}]   ;;  %s1043_s1 = inlined_call_operand.vmem [shape: f32[2,8,64], index: 1, kind: input, shape index: {}]   ;;  %s1044_s2 = inlined_call_operand.vmem [shape: f32[2,1,8], index: 2, kind: input, shape index: {}]   ;;  %s1045_s3 = inlined_call_operand.vmem [shape: bf16[64,32], index: 3, kind: input, shape index: {}]   ;;  %s1046_s4 = inlined_call_operand.vmem [shape: f32[1,32], index: 4, kind: input, shape index: {}]   ;;  %s1047_s5 = inlined_call_operand.vmem [shape: bf16[32,32], index: 5, kind: input, shape index: {}]   ;;  %s1048_s6 = inlined_call_operand.vmem [shape: f32[1,32], index: 6, kind: input, shape index: {}]   ;;  %s1049_s7 = inlined_call_operand.vmem [shape: bf16[32,32], index: 7, kind: input, shape index: {}]   ;;  %s1050_s8 = inlined_call_operand.vmem [shape: f32[1,32], index: 8, kind: input, shape index: {}]   ;;  %s1051_s9 = inlined_call_operand.vmem [shape: f32[2,4,32], index: 9, kind: output, shape index: {}]  }
   0x1 LB: > { %s781_s10 = sadd.s32 4294967295, %s892_s30   ;;  %p785_p0 = scmp.ge.s32.totalorder %s892_s30, 1  ;;  %s892_s30 = sphi %s948_s30, %s19_s30  }
   0x2   : > { %p303_p1 = scmp.lt.s32.totalorder %s892_s30, 3 }
   0x4   : > { %p304_p2 = pnand %p785_p0, %p303_p1 }
   0x5   : > { %p344_p3 = scmp.lt.s32.totalorder (!%p304_p2), %s781_s10, 1 }
   0x6   : > { %307 = sbr.rel (%p304_p2) target bundleno = 1328 (0x530), region = 56 }
   0xb   : > { %v874_v0 = vld [vmem:[%s1045_s3 + $0x18] sm:$0xff]   ;;  %v894_v1 = vmov 0.0   ;;  %v875_v2 = vld [vmem:[%s1045_s3 + $0x10] sm:$0xff]   ;;  %vm895_vm0 = vmmov 0   ;;  %s1053_s10 = smov (!%p344_p3, %s781_s10), 1  ;;  %v876_v3 = vld [vmem:[%s1045_s3 + $0x8] sm:$0xff]   ;;  %v572_v28 = vlaneseq }
   0xc   : > { %822 = vmatprep.subr.bf16.mxu0 %v894_v1  ;;  %834 = vmatprep.subr.bf16.mxu1 %v894_v1  ;;  %s786_s17 = sshll.u32 %s1053_s10, 2  ;;  %v877_v4 = vld [vmem:[%s1045_s3] sm:$0xff]   ;;  %vm401_vm1 = vcmask 523264   ;;  %v878_v7 = vld [vmem:[%s1047_s5 + $0x8] sm:$0xff]   ;;  %s787_s27 = sshll.u32 %s1053_s10, 3  ;;  %vm477_vm2 = vcmask 261120  }
   0xd   : > { %823 = vmatpush3.bf16.msra.mxu0 %v874_v0  ;;  %830 = vmatprep.mubr.msk.bf16.mxu0 %vm895_vm0, %v894_v1  ;;  %s347_s20 = scalar_lea.vmem %s1042_s0, %s786_s17  ;;  %v879_v8 = vld [vmem:[%s1047_s5] sm:$0xff]   ;;  %s351_s11 = scalar_lea.vmem %s1043_s1, %s787_s27  ;;  %v573_v30 = vshrl.u32 %v572_v28, 7  ;;  %v896_v32 = vmov 0   ;;  %vm578_vm5 = vcmask 60416   ;;  %vm598_vm6 = vcmask 1043456   ;;  %v880_v48 = vld [vmem:[%s1049_s7 + $0x8] sm:$0xff]  }
   0xe   : > { %824 = vmatprep.subr.bf16.mxu0 %v894_v1  ;;  %838 = vmatprep.mubr.msk.bf16.mxu1 %vm895_vm0, %v894_v1  ;;  %v360_v5 = vld [vmem:[%s347_s20] sm:$0xf]  ;;  %s354_s19 = scalar_lea.vmem %s1044_s2, %s1053_s10  ;;  %s897_s20 = smov 96   ;;  %vm594_vm7 = vcmask 64512   ;;  %vm705_vm8 = vcmask 257024  }
   0xf   : > { %v361_v6 = vpack.c.bf16 %v360_v5, %v360_v5  ;;  %835 = vmatpush3.bf16.msra.mxu1 %v878_v7  ;;  %v789_v9 = vld [vmem:[%s1046_s4] ss:$0 sm:$0xff]  ;;  %v574_v31 = vsub.s32 0, %v573_v30  ;;  %s358_s29 = scalar_lea.vmem %s1051_s9, %s786_s17 }
  0x10   : > { %836 = vmatprep.subr.bf16.mxu1 %v894_v1  ;;  %v446_v10 = vld [vmem:[%s351_s11] sm:$0xff] }
  0x11   : > { %825 = vmatpush3.bf16.msra.mxu0 %v875_v2  ;;  %v523_v13 = vpack.c.bf16 %v446_v10, %v446_v10  ;;  %v795_v20 = vld [vmem:[%s1048_s6] ss:$0 sm:$0xff] }
  0x12   : > { %826 = vmatprep.subr.bf16.mxu0 %v894_v1  ;;  %v447_v29 = vld [vmem:[%s354_s19] sm:$0x1] }
  0x13   : > { %837 = vmatpush3.bf16.msra.mxu1 %v879_v8  ;;  %v528_v18 = vsel %vm477_vm2, %v523_v13, 0  ;;  %vm570_vm3 = vcmp.gt.f32.partialorder %v447_v29, 0.5  ;;  %592 = vrot.lane.b32.xlu1 %v523_v13, %s897_s20  ;;  %v881_v49 = vld [vmem:[%s1049_s7] sm:$0xff]  }
  0x14   : > { %842 = vmatprep.subr.bf16.mxu1 %v894_v1  ;;  %v571_v33 = vsel %vm570_vm3, 1, %v896_v32  ;;  %v801_v59 = vld [vmem:[%s1050_s8] ss:$0 sm:$0xff] }
  0x15   : > { %827 = vmatpush3.bf16.msra.mxu0 %v876_v3  ;;  %v575_v34 = vrot.slane %v571_v33, %v574_v31 }
  0x16   : > { %828 = vmatprep.subr.bf16.mxu0 %v894_v1 }
  0x17   : > { %vm576_vm4 = vcmp.eq.s32.totalorder %v575_v34, 1 }
  0x19   : > { %829 = vmatpush3.bf16.msra.mxu0 %v877_v4 }
  0x1a   : > { %848 = vmatprep.subr.bf16.mxu0 %v894_v1 }
  0x1c   : > { %831 = vmatmul.mubr.msk.bf16.vlgmr.msra.gmra.mxu0 %vm401_vm1, %v361_v6 }
  0x1d   : > { %850 = vmatprep.mubr.msk.bf16.mxu0 %vm895_vm0, %v894_v1 }
  0x85   : > { %v593_v46 = vpop.permute.xlu1 %592 }
  0x86   : > { %v600_v47 = vsel %vm598_vm6, %v593_v46, 0 }
  0x87   : > { %849 = vmatpush3.bf16.msra.mxu0 %v600_v47 }
  0xdc   : > { %v439_v11 = vpop.f32.mrf.mxu0 }
  0xdd   : > { %v440_v12 = vadd.f32 %v789_v9, %v439_v11 }
  0xde   : > { %v832_v14 = vpop.f32.mrf.mxu0 }
  0xdf   : > { %v1003_v15 = vmax.f32 %v440_v12, 0.0 }
  0xe0   : > { %v442_v16 = vpop.f32.mrf.mxu0 }
  0xe1   : > { %v458_v17 = vpack.c.bf16 %v1003_v15, %v1003_v15 }
  0xe2   : > { %v833_v19 = vpop.f32.mrf.mxu0 }
  0xe3   : > { %839 = vmatmul.mubr.msk.bf16.vlgmr.msra.gmra.mxu1 %vm477_vm2, %v458_v17 }
  0xe4   : > { %843 = vmatpush3.bf16.xpose.msra.mxu1 %v528_v18  ;;  %844 = vmatprep.mubr.msk.bf16.mxu1 %vm895_vm0, %v894_v1 }
  0xe5   : > { %854 = vmatprep.subr.bf16.mxu1 %v894_v1 }
 0x1a3   : > { %v515_v21 = vpop.f32.mrf.mxu1 }
 0x1a4   : > { %v516_v22 = vadd.f32 %v795_v20, %v515_v21 }
 0x1a5   : > { %v840_v23 = vpop.f32.mrf.mxu1 }
 0x1a6   : > { %v521_v24 = vmul.f32 0.17677669, %v516_v22 }
 0x1a7   : > { %v518_v25 = vpop.f32.mrf.mxu1 }
 0x1a8   : > { %v522_v26 = vpack.c.bf16 %v521_v24, %v521_v24 }
 0x1a9   : > { %v841_v27 = vpop.f32.mrf.mxu1 }
 0x1aa   : > { %845 = vmatmul.mubr.msk.bf16.vlgmr.msra.gmra.mxu1 %vm477_vm2, %v522_v26 }
 0x1ab   : > { %858 = vmatprep.mubr.msk.bf16.mxu1 %vm895_vm0, %v894_v1  ;;  %855 = vmatpush3.bf16.msra.mxu1 %v880_v48 }
 0x1ac   : > { %856 = vmatprep.subr.bf16.mxu1 %v894_v1 }
 0x1af   : > { %857 = vmatpush3.bf16.msra.mxu1 %v881_v49 }
 0x26a   : > { %v564_v35 = vpop.f32.mrf.mxu1 }
 0x26b   : > { %v577_v36 = vsel %vm576_vm4, %v564_v35, -1e+09 }
 0x26c   : > { %v846_v37 = vpop.f32.mrf.mxu1  ;;  %v579_v38 = vsel %vm578_vm5, %v577_v36, -inf }
 0x26d   : > { %580 = vmax.xlane.f32.xlu0 %v579_v38 }
 0x26e   : > { %v567_v39 = vpop.f32.mrf.mxu1 }
 0x270   : > { %v847_v40 = vpop.f32.mrf.mxu1 }
 0x2f6   : > { %v581_v41 = vpop.xlane.xlu0 %580 }
 0x2f7   : > { %v582_v42 = vsub.f32 %v577_v36, %v581_v41 }
 0x2f9   : > { %v583_v43 = vmul.f32 1.442695, %v582_v42 }
 0x2fb   : > { %882 = vpow2.f32 %v583_v43 }
 0x308   : > { %v883_v44 = vpop.eup %882 }
 0x309   : > { %v585_v45 = vsel %vm578_vm5, %v883_v44, 0.0 }
 0x30a   : > { %586 = vadd.xlane.f32.xlu0 %v585_v45 }
 0x393   : > { %v587_v50 = vpop.xlane.xlu0 %586 }
 0x394   : > { %884 = vrcp.f32 %v587_v50 }
 0x3a1   : > { %v885_v51 = vpop.eup %884 }
 0x3a2   : > { %v589_v52 = vmul.f32 %v885_v51, %v883_v44 }
 0x3a4   : > { %v590_v53 = vpack.c.bf16 %v589_v52, %v589_v52 }
 0x3a6   : > { %851 = vmatmul.mubr.msk.bf16.vlgmr.msra.gmra.mxu0 %vm594_vm7, %v590_v53 }
 0x466   : > { %v636_v54 = vpop.f32.mrf.mxu0 }
 0x467   : > { %v642_v55 = vpack.c.bf16 %v636_v54, %v636_v54 }
 0x468   : > { %v852_v56 = vpop.f32.mrf.mxu0 }
 0x469   : > { %859 = vmatmul.mubr.msk.bf16.vlgmr.msra.gmra.mxu1 %vm477_vm2, %v642_v55 }
 0x46a   : > { %v639_v57 = vpop.f32.mrf.mxu0 }
 0x46c   : > { %v853_v58 = vpop.f32.mrf.mxu0 }
 0x529   : > { %v698_v60 = vpop.f32.mrf.mxu1 }
 0x52a   : > { %v699_v61 = vadd.f32 %v801_v59, %v698_v60 }
 0x52b   : > { %v860_v62 = vpop.f32.mrf.mxu1 }
 0x52c   : > { %v704_v63 = vadd.f32 %v699_v61, %v1003_v15 }
 0x52d   : > { %v701_v0 = vpop.f32.mrf.mxu1 }
 0x52e   : > { %706 = vst.msk [vmem:[%s358_s29] sm:$0xf] %vm705_vm8, %v704_v63 }
 0x52f   : > { %v861_v1 = vpop.f32.mrf.mxu1 }
 0x530 PF: > { %s19_s30 = sadd.s32 1, %s892_s30  }
 0x531   : > { %p16_p4 = scmp.ge.s32.totalorder %s19_s30, 4  }
 0x533   :  { %18 = sbr.rel (!%p16_p4) target bundleno = 1 (0x1), region = 92 }

// kernel: lavt_vlt_forward.26
= control target key start
LH: loop header
LB: loop body
LE: loop exit
PB: predicated region body
PF: predicated region fallthrough
CT: control target
= control target key end

     0   :  { %s326_s9 = smov 0   ;;  %s340_s0 = inlined_call_operand.vmem [shape: f32[2,2,128], index: 0, kind: input, shape index: {}]   ;;  %s341_s1 = inlined_call_operand.vmem [shape: f32[4,2], index: 1, kind: input, shape index: {}]   ;;  %s342_s2 = inlined_call_operand.vmem [shape: f32[2,4,128], index: 2, kind: output, shape index: {}]  }
   0x1 LB: > { %s273_s10 = sadd.s32 4294967295, %s307_s9   ;;  %p277_p0 = scmp.ge.s32.totalorder %s307_s9, 1  ;;  %s307_s9 = sphi %s326_s9, %s12_s9  }
   0x2   : > { %p111_p1 = scmp.lt.s32.totalorder %s307_s9, 3 }
   0x4   : > { %p112_p2 = pnand %p277_p0, %p111_p1 }
   0x5   : > { %p131_p3 = scmp.lt.s32.totalorder (!%p112_p2), %s273_s10, 1 }
   0x6   : > { %115 = sbr.rel (%p112_p2) target bundleno = 211 (0xd3), region = 28 }
   0xb   : > { %v309_v0 = vmov 0.0   ;;  %vm310_vm0 = vmmov 0   ;;  %s344_s10 = smov (!%p131_p3, %s273_s10), 1  ;;  %vm145_vm1 = vcmask 1041408   ;;  %v139_v1 = vld [vmem:[%s341_s1] sm:$0xf] }
   0xc   : > { %286 = vmatprep.subr.mxu0 %v309_v0  ;;  %288 = vmatprep.mubr.msk.f32.mxu0 %vm310_vm0, %v309_v0  ;;  %s278_s11 = sshll.u32 %s344_s10, 1  ;;  %vm141_vm2 = vcmask 15360   ;;  %s279_s17 = sshll.u32 %s344_s10, 2 }
   0xd   : > { %s134_s14 = scalar_lea.vmem %s340_s0, %s278_s11  ;;  %s138_s20 = scalar_lea.vmem %s342_s2, %s279_s17 }
   0xe   : > { %v140_v2 = vld [vmem:[%s134_s14] sm:$0x3] }
   0xf   : > { %287 = vmatpush3.msk.msra.mxu0 %vm145_vm1, %v140_v2 }
  0x10   : > { %289 = vmatmul.mubr.msk.f32.vlgmr.msra.gmra.mxu0 %vm141_vm2, %v139_v1 }
  0xd0   : > { %v215_v3 = vpop.f32.mrf.mxu0 }
  0xd1   : > { %219 = vst [vmem:[%s138_s20] sm:$0xf] %v215_v3 }
  0xd2   : > { %v290_v4 = vpop.f32.mrf.mxu0 }
  0xd3 PF: > { %s12_s9 = sadd.s32 1, %s307_s9  }
  0xd4   : > { %p9_p4 = scmp.ge.s32.totalorder %s12_s9, 4  }
  0xd6   :  { %11 = sbr.rel (!%p9_p4) target bundleno = 1 (0x1), region = 58 }

// kernel: lavt_vlt_forward.28
= control target key start
LH: loop header
LB: loop body
LE: loop exit
PB: predicated region body
PF: predicated region fallthrough
CT: control target
= control target key end

     0   :  { %s590_s9 = smov 0   ;;  %s618_s0 = inlined_call_operand.vmem [shape: f32[2,4,4,16], index: 0, kind: input, shape index: {}]   ;;  %s619_s1 = inlined_call_operand.vmem [shape: f32[8,4], index: 1, kind: input, shape index: {}]   ;;  %s620_s2 = inlined_call_operand.vmem [shape: f32[2,4,8,16], index: 2, kind: output, shape index: {}]  }
   0x1 LB: > { %s506_s10 = sadd.s32 4294967295, %s571_s9   ;;  %p510_p0 = scmp.ge.s32.totalorder %s571_s9, 1  ;;  %s571_s9 = sphi %s590_s9, %s12_s9  }
   0x2   : > { %p112_p1 = scmp.lt.s32.totalorder %s571_s9, 3 }
   0x4   : > { %p113_p2 = pnand %p510_p0, %p112_p1 }
   0x5   : > { %p134_p3 = scmp.lt.s32.totalorder (!%p113_p2), %s506_s10, 1 }
   0x6   : > { %116 = sbr.rel (%p113_p2) target bundleno = 215 (0xd7), region = 28 }
   0xb   : > { %v573_v0 = vmov 0.0   ;;  %s622_s10 = smov (!%p134_p3, %s506_s10), 1  ;;  %vm574_vm0 = vmmov 0   ;;  %vm153_vm1 = vcmask 1043456   ;;  %v144_v1 = vld [vmem:[%s619_s1] sm:$0xff]  ;;  %vm149_vm2 = vcmask 31744  }
   0xc   : > { %535 = vmatprep.subr.mxu0 %v573_v0  ;;  %540 = vmatprep.subr.mxu1 %v573_v0  ;;  %s525_s11 = sshll.u32 %s622_s10, 4  ;;  %s526_s17 = sshll.u32 %s622_s10, 5  ;;  %vm446_vm3 = vcmask 130048  }
   0xd   : > { %537 = vmatprep.mubr.msk.f32.mxu0 %vm574_vm0, %v573_v0  ;;  %542 = vmatprep.mubr.msk.f32.mxu1 %vm574_vm0, %v573_v0  ;;  %s138_s14 = scalar_lea.vmem %s618_s0, %s525_s11  ;;  %s143_s20 = scalar_lea.vmem %s620_s2, %s526_s17 }
   0xe   : > { %v145_v2 = vld [vmem:[%s138_s14] sm:$0xf]  ;;  %v146_v3 = vld [vmem:[%s138_s14 + $0x4] sm:$0xf]  ;;  %v147_v4 = vld [vmem:[%s138_s14 + $0x8] sm:$0xf] }
   0xf   : > { %536 = vmatpush3.msk.msra.mxu0 %vm153_vm1, %v145_v2  ;;  %541 = vmatpush3.msk.msra.mxu1 %vm153_vm1, %v146_v3  ;;  %v148_v5 = vld [vmem:[%s138_s14 + $0xc] sm:$0xf] }
  0x10   : > { %538 = vmatmul.mubr.msk.f32.vlgmr.msra.gmra.mxu0 %vm149_vm2, %v144_v1  ;;  %543 = vmatmul.mubr.msk.f32.vlgmr.msra.gmra.mxu1 %vm149_vm2, %v144_v1 }
  0x11   : > { %545 = vmatprep.subr.mxu0 %v573_v0  ;;  %550 = vmatprep.subr.mxu1 %v573_v0 }
  0x12   : > { %546 = vmatpush3.msk.msra.mxu0 %vm153_vm1, %v147_v4  ;;  %551 = vmatpush3.msk.msra.mxu1 %vm153_vm1, %v148_v5 }
  0x13   : > { %547 = vmatprep.mubr.msk.f32.mxu0 %vm574_vm0, %v573_v0  ;;  %552 = vmatprep.mubr.msk.f32.mxu1 %vm574_vm0, %v573_v0 }
  0x14   : > { %548 = vmatmul.mubr.msk.f32.vlgmr.msra.gmra.mxu0 %vm149_vm2, %v144_v1  ;;  %553 = vmatmul.mubr.msk.f32.vlgmr.msra.gmra.mxu1 %vm149_vm2, %v144_v1 }
  0xd0   : > { %v223_v6 = vpop.f32.mrf.mxu0  ;;  %v296_v7 = vpop.f32.mrf.mxu1 }
  0xd1   : > { %447 = vst.msk [vmem:[%s143_s20] sm:$0xff] %vm446_vm3, %v223_v6  ;;  %448 = vst.msk [vmem:[%s143_s20 + $0x8] sm:$0xff] %vm446_vm3, %v296_v7 }
  0xd2   : > { %v539_v8 = vpop.f32.mrf.mxu0  ;;  %v544_v9 = vpop.f32.mrf.mxu1 }
  0xd4   : > { %v369_v10 = vpop.f32.mrf.mxu0  ;;  %v442_v11 = vpop.f32.mrf.mxu1 }
  0xd5   : > { %449 = vst.msk [vmem:[%s143_s20 + $0x10] sm:$0xff] %vm446_vm3, %v369_v10  ;;  %450 = vst.msk [vmem:[%s143_s20 + $0x18] sm:$0xff] %vm446_vm3, %v442_v11 }
  0xd6   : > { %v549_v12 = vpop.f32.mrf.mxu0  ;;  %v554_v13 = vpop.f32.mrf.mxu1 }
  0xd7 PF: > { %s12_s9 = sadd.s32 1, %s571_s9  }
  0xd8   : > { %p9_p4 = scmp.ge.s32.totalorder %s12_s9, 4  }
  0xda   :  { %11 = sbr.rel (!%p9_p4) target bundleno = 1 (0x1), region = 58 }

// kernel: lavt_vlt_forward.27
= control target key start
LH: loop header
LB: loop body
LE: loop exit
PB: predicated region body
PF: predicated region fallthrough
CT: control target
= control target key end

     0   :  { %vm53_vm0 = vcmask 261120   ;;  %vm205_vm1 = vcmask 130048   ;;  %s345_s2 = inlined_call_operand.vmem [shape: bf16[32,32], index: 2, kind: input, shape index: {}]   ;;  %s346_s1 = inlined_call_operand.vmem [shape: f32[32,32], index: 1, kind: input, shape index: {}]   ;;  %s347_s4 = inlined_call_operand.vmem [shape: bf16[32,16], index: 4, kind: input, shape index: {}]   ;;  %s348_s3 = inlined_call_operand.vmem [shape: f32[1,32], index: 3, kind: input, shape index: {}]   ;;  %s349_s0 = inlined_call_operand.vmem [shape: f32[32,32], index: 0, kind: input, shape index: {}]   ;;  %s350_s5 = inlined_call_operand.vmem [shape: f32[1,16], index: 5, kind: input, shape index: {}]   ;;  %s351_s6 = inlined_call_operand.vmem [shape: f32[32,16], index: 6, kind: output, shape index: {}]  }
   0x1   :  { %v248_v0 = vld [vmem:[%s345_s2 + $0x8] sm:$0xff]   ;;  %v249_v1 = vld [vmem:[%s345_s2] sm:$0xff]   ;;  %v26_v5 = vld [vmem:[%s346_s1 + $0x10] sm:$0xff] }
   0x2   :  { %232 = vmatprep.subr.bf16.mxu0 %v248_v0  ;;  %v24_v2 = vld [vmem:[%s346_s1] sm:$0xff]  ;;  %v25_v3 = vld [vmem:[%s346_s1 + $0x8] sm:$0xff]  ;;  %v27_v6 = vld [vmem:[%s346_s1 + $0x18] sm:$0xff] }
   0x3   :  { %233 = vmatpush3.bf16.msra.mxu0 %v248_v0  ;;  %v28_v4 = vpack.c.bf16 %v25_v3, %v24_v2  ;;  %v29_v7 = vpack.c.bf16 %v27_v6, %v26_v5  ;;  %v250_v8 = vld [vmem:[%s347_s4 + $0x8] sm:$0xff]   ;;  %v251_v9 = vld [vmem:[%s347_s4] sm:$0xff]   ;;  %v116_v20 = vld [vmem:[%s349_s0 + $0x18] sm:$0xff] }
   0x4   :  { %234 = vmatprep.subr.bf16.mxu0 %v249_v1  ;;  %240 = vmatprep.subr.bf16.mxu1 %v250_v8  ;;  %v214_v11 = vld [vmem:[%s348_s3] ss:$0 sm:$0xff]  ;;  %v114_v24 = vld [vmem:[%s349_s0 + $0x8] sm:$0xff]  ;;  %v115_v25 = vld [vmem:[%s349_s0 + $0x10] sm:$0xff] }
   0x5   :  { %236 = vmatprep.mubr.msk.bf16.mxu0 %vm53_vm0, %v28_v4  ;;  %241 = vmatpush3.bf16.msra.mxu1 %v250_v8  ;;  %v113_v23 = vld [vmem:[%s349_s0] sm:$0xff] }
   0x6   :  { %242 = vmatprep.subr.bf16.mxu1 %v251_v9  ;;  %v219_v33 = vld [vmem:[%s350_s5] ss:$0 sm:$0xff] }
   0x7   :  { %235 = vmatpush3.bf16.msra.mxu0 %v249_v1 }
   0x9   :  { %243 = vmatpush3.bf16.msra.mxu1 %v251_v9 }
   0xa   :  { %237 = vmatmul.mubr.msk.bf16.vlgmr.msra.gmra.mxu0 %vm53_vm0, %v29_v7 }
  0xca   :  { %v238_v10 = vpop.f32.mrf.mxu0 }
  0xcb   :  { %v103_v14 = vadd.f32 %v238_v10, %v214_v11 }
  0xcc   :  { %v94_v12 = vpop.f32.mrf.mxu0 }
  0xcd   :  { %v95_v13 = vadd.f32 %v214_v11, %v94_v12  ;;  %v111_v22 = vmax.f32 %v103_v14, 0.0 }
  0xce   :  { %v239_v15 = vpop.f32.mrf.mxu0 }
  0xcf   :  { %v106_v16 = vadd.f32 %v239_v15, %v214_v11  ;;  %v109_v18 = vmax.f32 %v95_v13, 0.0  ;;  %v119_v30 = vadd.f32 %v115_v25, %v111_v22 }
  0xd0   :  { %v97_v17 = vpop.f32.mrf.mxu0 }
  0xd1   :  { %v112_v19 = vmax.f32 %v106_v16, 0.0  ;;  %v98_v21 = vadd.f32 %v214_v11, %v97_v17  ;;  %v117_v28 = vadd.f32 %v113_v23, %v109_v18 }
  0xd3   :  { %v110_v26 = vmax.f32 %v98_v21, 0.0  ;;  %v120_v27 = vadd.f32 %v116_v20, %v112_v19 }
  0xd5   :  { %v118_v29 = vadd.f32 %v114_v24, %v110_v26  ;;  %v122_v32 = vpack.c.bf16 %v120_v27, %v119_v30 }
  0xd7   :  { %v121_v31 = vpack.c.bf16 %v118_v29, %v117_v28 }
  0xd9   :  { %244 = vmatprep.mubr.msk.bf16.mxu1 %vm53_vm0, %v121_v31 }
  0xda   :  { %245 = vmatmul.mubr.msk.bf16.vlgmr.msra.gmra.mxu1 %vm53_vm0, %v122_v32 }
 0x19a   :  { %v246_v34 = vpop.f32.mrf.mxu1 }
 0x19b   :  { %v195_v35 = vadd.f32 %v246_v34, %v219_v33 }
 0x19c   :  { %v186_v36 = vpop.f32.mrf.mxu1 }
 0x19d   :  { %v203_v37 = vmax.f32 %v195_v35, 0.0  ;;  %v187_v38 = vadd.f32 %v219_v33, %v186_v36 }
 0x19e   :  { %v247_v39 = vpop.f32.mrf.mxu1 }
 0x19f   :  { %208 = vst.msk [vmem:[%s351_s6 + $0x10] sm:$0xff] %vm205_vm1, %v203_v37  ;;  %v201_v40 = vmax.f32 %v187_v38, 0.0  ;;  %v198_v41 = vadd.f32 %v247_v39, %v219_v33 }
 0x1a0   :  { %v189_v42 = vpop.f32.mrf.mxu1 }
 0x1a1   :  { %206 = vst.msk [vmem:[%s351_s6] sm:$0xff] %vm205_vm1, %v201_v40  ;;  %v204_v43 = vmax.f32 %v198_v41, 0.0  ;;  %v190_v44 = vadd.f32 %v219_v33, %v189_v42 }
 0x1a3   :  { %209 = vst.msk [vmem:[%s351_s6 + $0x18] sm:$0xff] %vm205_vm1, %v204_v43  ;;  %v202_v45 = vmax.f32 %v190_v44, 0.0 }
 0x1a5   :  { %207 = vst.msk [vmem:[%s351_s6 + $0x8] sm:$0xff] %vm205_vm1, %v202_v45 }

// kernel: lavt_vlt_forward.29
= control target key start
LH: loop header
LB: loop body
LE: loop exit
PB: predicated region body
PF: predicated region fallthrough
CT: control target
= control target key end

     0   :  { %s326_s9 = smov 0   ;;  %s340_s0 = inlined_call_operand.vmem [shape: f32[2,4,128], index: 0, kind: input, shape index: {}]   ;;  %s341_s1 = inlined_call_operand.vmem [shape: f32[8,4], index: 1, kind: input, shape index: {}]   ;;  %s342_s2 = inlined_call_operand.vmem [shape: f32[2,8,128], index: 2, kind: output, shape index: {}]  }
   0x1 LB: > { %s273_s10 = sadd.s32 4294967295, %s307_s9   ;;  %p277_p0 = scmp.ge.s32.totalorder %s307_s9, 1  ;;  %s307_s9 = sphi %s326_s9, %s12_s9  }
   0x2   : > { %p111_p1 = scmp.lt.s32.totalorder %s307_s9, 3 }
   0x4   : > { %p112_p2 = pnand %p277_p0, %p111_p1 }
   0x5   : > { %p131_p3 = scmp.lt.s32.totalorder (!%p112_p2), %s273_s10, 1 }
   0x6   : > { %115 = sbr.rel (%p112_p2) target bundleno = 211 (0xd3), region = 28 }
   0xb   : > { %v309_v0 = vmov 0.0   ;;  %vm310_vm0 = vmmov 0   ;;  %s344_s10 = smov (!%p131_p3, %s273_s10), 1  ;;  %vm145_vm1 = vcmask 1043456   ;;  %v139_v1 = vld [vmem:[%s341_s1] sm:$0xff]  ;;  %vm141_vm2 = vcmask 31744  }
   0xc   : > { %286 = vmatprep.subr.mxu0 %v309_v0  ;;  %288 = vmatprep.mubr.msk.f32.mxu0 %vm310_vm0, %v309_v0  ;;  %s278_s11 = sshll.u32 %s344_s10, 2  ;;  %s279_s17 = sshll.u32 %s344_s10, 3 }
   0xd   : > { %s134_s14 = scalar_lea.vmem %s340_s0, %s278_s11  ;;  %s138_s20 = scalar_lea.vmem %s342_s2, %s279_s17 }
   0xe   : > { %v140_v2 = vld [vmem:[%s134_s14] sm:$0xf] }
   0xf   : > { %287 = vmatpush3.msk.msra.mxu0 %vm145_vm1, %v140_v2 }
  0x10   : > { %289 = vmatmul.mubr.msk.f32.vlgmr.msra.gmra.mxu0 %vm141_vm2, %v139_v1 }
  0xd0   : > { %v215_v3 = vpop.f32.mrf.mxu0 }
  0xd1   : > { %219 = vst [vmem:[%s138_s20] sm:$0xff] %v215_v3 }
  0xd2   : > { %v290_v4 = vpop.f32.mrf.mxu0 }
  0xd3 PF: > { %s12_s9 = sadd.s32 1, %s307_s9  }
  0xd4   : > { %p9_p4 = scmp.ge.s32.totalorder %s12_s9, 4  }
  0xd6   :  { %11 = sbr.rel (!%p9_p4) target bundleno = 1 (0x1), region = 58 }

// kernel: lavt_vlt_forward.31
= control target key start
LH: loop header
LB: loop body
LE: loop exit
PB: predicated region body
PF: predicated region fallthrough
CT: control target
= control target key end

     0   :  { %8 = vsyncpa [#allocation3], 0  ;;  %s838_s0 = inlined_call_operand.vmem [shape: f32[2,2,8,8], index: 0, kind: input, shape index: {}]   ;;  %s839_s1 = inlined_call_operand.vmem [shape: f32[16,8], index: 1, kind: input, shape index: {}]   ;;  %s840_s2 = inlined_call_operand.vmem [shape: f32[8,16], index: 2, kind: input, shape index: {}]   ;;  %s841_s3 = inlined_call_operand.hbm [shape: f32[2,2,16,16], index: 3, kind: output, shape index: {}]  }
   0x1   :  { %10 = vsyncpa [#allocation3 + $0x1], 0  ;;  %s686_s12 = smov 0   ;;  %s688_s13 = smov 0  }
   0x2   :  { %s690_s14 = smov 0   ;;  %s692_s15 = smov 0  }
   0x3   :  { %s694_s16 = smov 0   ;;  %s696_s17 = smov 0  }
   0x4   :  { %s698_s18 = smov 0   ;;  %s700_s19 = smov 0  }
   0x5 LB: > { %s462_s20 = sadd.s32 4294967295, %s661_s19   ;;  %s463_s21 = sadd.s32 4294967294, %s661_s19   ;;  %s661_s19 = sphi %s700_s19, %s16_s19   ;;  %s657_s18 = sphi %s698_s18, %s850_s18   ;;  %s653_s17 = sphi %s696_s17, %s849_s17   ;;  %s649_s16 = sphi %s694_s16, %s848_s16   ;;  %s645_s15 = sphi %s692_s15, %s847_s15   ;;  %s641_s14 = sphi %s690_s14, %s846_s14   ;;  %s637_s13 = sphi %s688_s13, %s845_s13   ;;  %s633_s12 = sphi %s686_s12, %s844_s12  }
   0x6   : > { %s25_s22 = sadd.s32 1, %s653_s17  ;;  %s28_s23 = sadd.s32 1, %s657_s18 }
   0x7   : > { %p26_p0 = scmp.ge.s32.totalorder %s25_s22, 2  ;;  %p117_p1 = scmp.ne.s32.totalorder %s641_s14, %s637_s13 }
   0x8   : > { %p118_p2 = scmp.eq.s32.totalorder %s462_s20, 3  ;;  %p123_p5 = scmp.ne.s32.totalorder %s637_s13, %s633_s12 }
   0x9   : > { %s852_s22 = smov (%p26_p0, %s25_s22), 0  ;;  %s854_s23 = smov (!%p26_p0, %s28_s23), %s657_s18 }
   0xa   : > { %s103_s24 = ssub.s32 %s653_s17, %s852_s22  ;;  %p737_p3 = por %p118_p2, %p117_p1 }
   0xb   : > { %p30_p4 = scmp.ge.s32.totalorder %s854_s23, 2  ;;  %p124_p6 = scmp.eq.s32.totalorder %s463_s21, 3 }
   0xc   : > { %p466_p7 = scmp.ge.s32.totalorder %s661_s19, 1  ;;  %p159_p9 = scmp.lt.s32.totalorder %s661_s19, 5 }
   0xd   : > { %s856_s23 = smov (%p30_p4, %s854_s23), 0  ;;  %p746_p8 = por %p124_p6, %p123_p5 }
   0xe   : > { %s102_s27 = ssub.s32 %s657_s18, %s856_s23  ;;  %s107_s28 = sadd.s32 1, %s641_s14 }
   0xf   : > { %s104_s29 = sor.u32 %s103_s24, %s102_s27  ;;  %p160_p10 = pnand %p466_p7, %p159_p9 }
  0x10   : > { %p105_p11 = scmp.eq.s32.totalorder %s104_s29, 0  ;;  %p186_p12 = scmp.lt.s32.totalorder (!%p160_p10), %s649_s16, 1 }
  0x11   : > { %163 = sbr.rel (%p160_p10) target bundleno = 436 (0x1b4), region = 32  ;;  %p188_p13 = scmp.lt.s32.totalorder (!%p160_p10), %s645_s15, 1 }
  0x12   : > { %s755_s30 = scalar_select %p105_p11, %s641_s14, %s107_s28  }
  0x13   : > { %s183_s4 = sand.u32 (!%p160_p10), 1, %s637_s13   ;;  %s663_s27 = smov (!%p160_p10), [#allocation2]  }
  0x14   : > { %s467_s5 = sshll.u32 (!%p160_p10), %s183_s4, 4  ;;  %s573_s28 = sshll.u32 (!%p160_p10), %s663_s27, 4  ;;  %s574_s28 = int_to_ptr.vmem [resolvable:$false] %s573_s28 }
  0x15   : > { %s575_s29 = scalar_lea.vmem (!%p160_p10), %s574_s28, 512 }
  0x16   : > { %v194_v0 = vld [vmem:[%s839_s1] sm:$0xff]  ;;  %vm197_vm0 = vcmask 64512   ;;  %s187_s6 = scalar_select %p186_p12, %s649_s16, 1  ;;  %v195_v2 = vld [vmem:[%s839_s1 + $0x8] sm:$0xff]  ;;  %vm361_vm1 = vcmask 130048  }
  0x17   : > { %488 = vmatprep.mubr.msk.f32.mxu0 %vm197_vm0, %v194_v0  ;;  %s189_s7 = scalar_select %p188_p13, %s645_s15, 1  ;;  %v279_v3 = vld [vmem:[%s840_s2] sm:$0xff] }
  0x18   : > { %s468_s8 = sshll.u32 %s187_s6, 1  ;;  %491 = vmatprep.subr.mxu1 %v279_v3  ;;  %s475_s6 = sshll.u32 %s645_s15, 1 }
  0x19   : > { %s191_s9 = sadd.s32 %s468_s8, %s189_s7  ;;  %492 = vmatpush3.msra.mxu1 %v279_v3  ;;  %s476_s7 = sshll.u32 %s649_s16, 2 }
  0x1a   : > { %s469_s10 = sshll.u32 %s191_s9, 3  ;;  %s377_s8 = sadd.s32 %s476_s7, %s475_s6 }
  0x1b   : > { %s193_s21 = scalar_lea.vmem %s838_s0, %s469_s10  ;;  %s185_s9 = scalar_lea.vmem [#allocation2], %s467_s5 }
  0x1c   : > { %v196_v1 = vld [vmem:[%s193_s21] sm:$0xff]  ;;  %s380_s10 = sshll.u32 %s185_s9, 4  ;;  %s477_s11 = sshll.u32 %s377_s8, 7  ;;  %s780_s10 = int_to_ptr.vmem [resolvable:$true] %s380_s10 }
  0x1d   : > { %486 = vmatprep.subr.mxu0 %v196_v1  ;;  %s785_s24 = scalar_lea.hbm %s841_s3, %s477_s11  ;;  %s787_s15 = scalar_lea.sflag [#allocation3], %s183_s4 }
  0x1e   : > { %487 = vmatpush3.msra.mxu0 %v196_v1  ;;  %s569_s16 = scalar_lea.vmem %s780_s10, 256  ;;  %p576_p4 = scmp.lt.s32.totalorder %s780_s10, %s574_s28 }
  0x1f   : > { %489 = vmatmul.mubr.msk.f32.vlgmr.msra.gmra.mxu0 %vm197_vm0, %v195_v2  ;;  %p570_p0 = scmp.ne.s32.totalorder %s780_s10, %s569_s16  ;;  %p577_p5 = scmp.lt.s32.totalorder %s575_s29, %s569_s16 }
  0x21   : > { %p571_p1 = pnand %p570_p0, %p737_p3  ;;  %p578_p6 = por %p577_p5, %p576_p4 }
  0x23   : > { %p572_p2 = pneg %p571_p1 }
  0x25   : > { %p579_p7 = pnand %p578_p6, %p572_p2 }
  0xdf   : > { %v490_v4 = vpop.f32.mrf.mxu0 }
  0xe1   : > { %v270_v5 = vpop.f32.mrf.mxu0 }
  0xe2   : > { %493 = vmatprep.mubr.msk.f32.mxu1 %vm197_vm0, %v270_v5 }
  0xe3   : > { %494 = vmatmul.mubr.msk.f32.vlgmr.msra.gmra.mxu1 %vm197_vm0, %v490_v4 }
 0x1a3   : > { %v495_v6 = vpop.f32.mrf.mxu1 }
 0x1a4   : > { %363 = vst.msk [vmem:[%s185_s9 + $0x8] sm:$0xff] %vm361_vm1, %v495_v6 }
 0x1a5   : > { %v352_v7 = vpop.f32.mrf.mxu1 }
 0x1a6   : > { %362 = vst.msk [vmem:[%s185_s9] sm:$0xff] %vm361_vm1, %v352_v7 }
 0x1a7   : > { %582 = shalt.err (!%p579_p7)
}
 0x1a8   : > { %s583_s4 = scalar_lea.hbm %s785_s24, 256  ;;  %s587_s7 = scalar_lea.hbm %s841_s3, 1024 }
 0x1a9   : > { %p584_p9 = scmp.ne.s32.totalorder %s785_s24, %s583_s4  ;;  %p588_p12 = scmp.lt.s32.totalorder %s785_s24, %s841_s3 }
 0x1aa   : > { %p589_p13 = scmp.lt.s32.totalorder %s587_s7, %s583_s4 }
 0x1ab   : > { %p585_p10 = pnand %p584_p9, %p737_p3 }
 0x1ac   : > { %p590_p0 = por %p589_p13, %p588_p12 }
 0x1ad   : > { %p586_p11 = pneg %p585_p10 }
 0x1af   : > { %p591_p1 = pnand %p590_p0, %p586_p11 }
 0x1b1   : > { %594 = shalt.err (!%p591_p1)
}
 0x1b2   : > { %s664_s11 = smov 128   ;;  %s665_s20 = smov 8  }
 0x1b3   : > { %496 = dma.vmem_to_hbm [thread:$0]  (%p737_p3), %s780_s10, 256, %s785_s24, %s787_s15, %s664_s11, %s664_s11, %s665_s20  }
 0x1b4 PF: > { %p502_p2 = scmp.ge.s32.totalorder %s661_s19, 2  ;;  %s395_s21 = sand.u32 1, %s633_s12  }
 0x1b5   : > { %s396_s16 = scalar_lea.sflag [#allocation3], %s395_s21 }
 0x1b6   : > { %p499_p4 = pnand %p502_p2, %p746_p8 }
 0x1b8   : > { %p500_p5 = pneg %p499_p4 }
 0x1ba   : > { %628 = dma.done.wait (%p500_p5), %s396_s16, 256  }
 0x1bb   : > { %630 = vsyncadd (%p500_p5), %s396_s16, 4294967040  ;;  %s16_s19 = sadd.s32 1, %s661_s19   ;;  %s844_s12 = smov %s637_s13 }
 0x1bc   : > { %p13_p6 = scmp.ge.s32.totalorder %s16_s19, 6   ;;  %s845_s13 = smov %s641_s14 }
 0x1bd   : > { %s846_s14 = smov %s755_s30  ;;  %s847_s15 = smov %s653_s17 }
 0x1be   : > { %s848_s16 = smov %s657_s18  ;;  %s849_s17 = smov %s852_s22 }
 0x1bf   : > { %s850_s18 = smov %s856_s23  ;;  %15 = sbr.rel (!%p13_p6) target bundleno = 5 (0x5), region = 67 }
 0x1c4   :  { %401 = vsyncpa [#allocation3], 1 }
 0x1c5   :  { %403 = vsyncpa [#allocation3 + $0x1], 1 }

// kernel: lavt_vlt_forward.30
= control target key start
LH: loop header
LB: loop body
LE: loop exit
PB: predicated region body
PF: predicated region fallthrough
CT: control target
= control target key end

     0   :  { %vm69_vm0 = vcmask 130048   ;;  %vm597_vm1 = vmmov 0   ;;  %s831_s2 = inlined_call_operand.vmem [shape: bf16[16,16], index: 2, kind: input, shape index: {}]   ;;  %s832_s1 = inlined_call_operand.vmem [shape: f32[128,16], index: 1, kind: input, shape index: {}]   ;;  %s833_s4 = inlined_call_operand.vmem [shape: bf16[16,16], index: 4, kind: input, shape index: {}]   ;;  %s834_s3 = inlined_call_operand.vmem [shape: f32[1,16], index: 3, kind: input, shape index: {}]   ;;  %s835_s0 = inlined_call_operand.vmem [shape: f32[128,16], index: 0, kind: input, shape index: {}]   ;;  %s836_s7 = inlined_call_operand.vmem [shape: f32[2,1], index: 7, kind: input, shape index: {}]   ;;  %s837_s5 = inlined_call_operand.vmem [shape: f32[1,16], index: 5, kind: input, shape index: {}]   ;;  %s838_s6 = inlined_call_operand.vmem [shape: bf16[2,16], index: 6, kind: input, shape index: {}]   ;;  %s839_s8 = inlined_call_operand.vmem [shape: f32[2,128], index: 8, kind: output, shape index: {}]  }
   0x1   :  { %v594_v0 = vld [vmem:[%s831_s2] sm:$0xff]   ;;  %v31_v2 = vld [vmem:[%s832_s1 + $0x8] sm:$0xff]  ;;  %v32_v3 = vld [vmem:[%s832_s1 + $0x10] sm:$0xff] }
   0x2   :  { %v30_v1 = vld [vmem:[%s832_s1] sm:$0xff]  ;;  %534 = vmatprep.subr.bf16.mxu1 %v594_v0  ;;  %v33_v5 = vld [vmem:[%s832_s1 + $0x18] sm:$0xff]  ;;  %v35_v7 = vld [vmem:[%s832_s1 + $0x28] sm:$0xff] }
   0x3   :  { %v46_v4 = vpack.c.bf16 %v31_v2, %v30_v1  ;;  %v34_v6 = vld [vmem:[%s832_s1 + $0x20] sm:$0xff]  ;;  %535 = vmatpush3.bf16.msra.mxu1 %v594_v0  ;;  %v47_v8 = vpack.c.bf16 %v33_v5, %v32_v3  ;;  %v36_v10 = vld [vmem:[%s832_s1 + $0x30] sm:$0xff]  ;;  %v37_v11 = vld [vmem:[%s832_s1 + $0x38] sm:$0xff] }
   0x4   :  { %v48_v9 = vpack.c.bf16 %v35_v7, %v34_v6  ;;  %v595_v12 = vld [vmem:[%s833_s4] sm:$0xff]   ;;  %v39_v14 = vld [vmem:[%s832_s1 + $0x48] sm:$0xff]  ;;  %v49_v15 = vpack.c.bf16 %v37_v11, %v36_v10  ;;  %v40_v17 = vld [vmem:[%s832_s1 + $0x50] sm:$0xff] }
   0x5   :  { %536 = vmatprep.mubr.msk.bf16.mxu1 %vm69_vm0, %v46_v4  ;;  %v38_v13 = vld [vmem:[%s832_s1 + $0x40] sm:$0xff]  ;;  %552 = vmatprep.subr.bf16.mxu1 %v595_v12  ;;  %v41_v18 = vld [vmem:[%s832_s1 + $0x58] sm:$0xff]  ;;  %v43_v20 = vld [vmem:[%s832_s1 + $0x68] sm:$0xff] }
   0x6   :  { %537 = vmatmul.mubr.msk.bf16.vlgmr.msra.gmra.mxu1 %vm69_vm0, %v47_v8  ;;  %v50_v16 = vpack.c.bf16 %v39_v14, %v38_v13  ;;  %v42_v19 = vld [vmem:[%s832_s1 + $0x60] sm:$0xff]  ;;  %v51_v21 = vpack.c.bf16 %v41_v18, %v40_v17  ;;  %v44_v23 = vld [vmem:[%s832_s1 + $0x70] sm:$0xff]  ;;  %v45_v24 = vld [vmem:[%s832_s1 + $0x78] sm:$0xff] }
   0x7   :  { %540 = vmatprep.mubr.msk.bf16.mxu1 %vm69_vm0, %v48_v9  ;;  %553 = vmatpush3.bf16.msra.mxu1 %v595_v12  ;;  %v52_v22 = vpack.c.bf16 %v43_v20, %v42_v19  ;;  %v53_v25 = vpack.c.bf16 %v45_v24, %v44_v23  ;;  %v709_v27 = vld [vmem:[%s834_s3] ss:$0 sm:$0xff]  ;;  %v210_v36 = vld [vmem:[%s835_s0 + $0x18] sm:$0xff]  ;;  %v208_v40 = vld [vmem:[%s835_s0 + $0x8] sm:$0xff] }
   0x8   :  { %v207_v39 = vld [vmem:[%s835_s0] sm:$0xff]  ;;  %v209_v42 = vld [vmem:[%s835_s0 + $0x10] sm:$0xff]  ;;  %v214_v58 = vld [vmem:[%s835_s0 + $0x38] sm:$0xff] }
   0x9   :  { %v211_v61 = vld [vmem:[%s835_s0 + $0x20] sm:$0xff]  ;;  %v212_v62 = vld [vmem:[%s835_s0 + $0x28] sm:$0xff]  ;;  %v213_v0 = vld [vmem:[%s835_s0 + $0x30] sm:$0xff] }
   0xa   :  { %v215_v19 = vld [vmem:[%s835_s0 + $0x40] sm:$0xff]  ;;  %v216_v20 = vld [vmem:[%s835_s0 + $0x48] sm:$0xff] }
   0xe   :  { %541 = vmatmul.mubr.msk.bf16.gmra.mxu1 %vm69_vm0, %v49_v15 }
   0xf   :  { %544 = vmatprep.mubr.msk.bf16.mxu1 %vm69_vm0, %v50_v16  ;;  %v218_v16 = vld [vmem:[%s835_s0 + $0x58] sm:$0xff] }
  0x16   :  { %545 = vmatmul.mubr.msk.bf16.gmra.mxu1 %vm69_vm0, %v51_v21 }
  0x17   :  { %548 = vmatprep.mubr.msk.bf16.mxu1 %vm69_vm0, %v52_v22  ;;  %v217_v22 = vld [vmem:[%s835_s0 + $0x50] sm:$0xff] }
  0x1e   :  { %549 = vmatmul.mubr.msk.bf16.gmra.mxu1 %vm69_vm0, %v53_v25 }
  0xc6   :  { %v538_v26 = vpop.f32.mrf.mxu1 }
  0xc7   :  { %v137_v30 = vadd.f32 %v538_v26, %v709_v27 }
  0xc8   :  { %v128_v28 = vpop.f32.mrf.mxu1 }
  0xc9   :  { %v129_v29 = vadd.f32 %v709_v27, %v128_v28  ;;  %v193_v38 = vmax.f32 %v137_v30, 0.0 }
  0xca   :  { %v539_v31 = vpop.f32.mrf.mxu1 }
  0xcb   :  { %v140_v32 = vadd.f32 %v539_v31, %v709_v27  ;;  %v191_v34 = vmax.f32 %v129_v29, 0.0  ;;  %v225_v49 = vadd.f32 %v209_v42, %v193_v38  ;;  %v219_v42 = vld [vmem:[%s835_s0 + $0x60] sm:$0xff] }
  0xcc   :  { %v131_v33 = vpop.f32.mrf.mxu1 }
  0xcd   :  { %v194_v35 = vmax.f32 %v140_v32, 0.0  ;;  %v132_v37 = vadd.f32 %v709_v27, %v131_v33  ;;  %v223_v46 = vadd.f32 %v207_v39, %v191_v34  ;;  %v222_v39 = vld [vmem:[%s835_s0 + $0x78] sm:$0xff] }
  0xce   :  { %v542_v41 = vpop.f32.mrf.mxu1 }
  0xcf   :  { %v192_v43 = vmax.f32 %v132_v37, 0.0  ;;  %v226_v44 = vadd.f32 %v210_v36, %v194_v35  ;;  %v153_v50 = vadd.f32 %v542_v41, %v709_v27 }
  0xd0   :  { %v144_v45 = vpop.f32.mrf.mxu1 }
  0xd1   :  { %v224_v47 = vadd.f32 %v208_v40, %v192_v43  ;;  %v145_v48 = vadd.f32 %v709_v27, %v144_v45  ;;  %v240_v54 = vpack.c.bf16 %v226_v44, %v225_v49  ;;  %v197_v60 = vmax.f32 %v153_v50, 0.0  ;;  %v220_v43 = vld [vmem:[%s835_s0 + $0x68] sm:$0xff]  ;;  %v221_v44 = vld [vmem:[%s835_s0 + $0x70] sm:$0xff] }
  0xd2   :  { %v543_v51 = vpop.f32.mrf.mxu1 }
  0xd3   :  { %v239_v52 = vpack.c.bf16 %v224_v47, %v223_v46  ;;  %v156_v53 = vadd.f32 %v543_v51, %v709_v27  ;;  %v195_v56 = vmax.f32 %v145_v48, 0.0  ;;  %v229_v7 = vadd.f32 %v213_v0, %v197_v60 }
  0xd4   :  { %v147_v55 = vpop.f32.mrf.mxu1  ;;  %v596_v51 = vmov 0.0  }
  0xd5   :  { %v198_v57 = vmax.f32 %v156_v53, 0.0  ;;  %v148_v59 = vadd.f32 %v709_v27, %v147_v55  ;;  %554 = vmatprep.mubr.msk.bf16.mxu1 %vm69_vm0, %v239_v52  ;;  %v227_v4 = vadd.f32 %v211_v61, %v195_v56  ;;  %570 = vmatprep.subr.bf16.mxu0 %v596_v51  ;;  %v598_v52 = vmov 0   ;;  %v408_v53 = vld [vmem:[%s836_s7] sm:$0x3] }
  0xd6   :  { %v546_v63 = vpop.f32.mrf.mxu1  ;;  %555 = vmatmul.mubr.msk.bf16.vlgmr.msra.gmra.mxu1 %vm69_vm0, %v240_v54  ;;  %586 = vmatprep.mubr.msk.bf16.mxu0 %vm597_vm1, %v596_v51  ;;  %v791_v55 = vld [vmem:[%s837_s5] ss:$0 sm:$0xff] }
  0xd7   :  { %v196_v1 = vmax.f32 %v148_v59, 0.0  ;;  %v230_v2 = vadd.f32 %v214_v58, %v198_v57  ;;  %v169_v8 = vadd.f32 %v546_v63, %v709_v27  ;;  %593 = vset.pattern.permute.xlu0 %v598_v52 }
  0xd8   :  { %v160_v3 = vpop.f32.mrf.mxu1  ;;  %411 = vperm.xlu0 %593, %v408_v53  }
  0xd9   :  { %v228_v5 = vadd.f32 %v212_v62, %v196_v1  ;;  %v161_v6 = vadd.f32 %v709_v27, %v160_v3  ;;  %v242_v12 = vpack.c.bf16 %v230_v2, %v229_v7  ;;  %v201_v18 = vmax.f32 %v169_v8, 0.0 }
  0xda   :  { %v547_v9 = vpop.f32.mrf.mxu1 }
  0xdb   :  { %v241_v10 = vpack.c.bf16 %v228_v5, %v227_v4  ;;  %v172_v11 = vadd.f32 %v547_v9, %v709_v27  ;;  %v199_v14 = vmax.f32 %v161_v6, 0.0  ;;  %v233_v30 = vadd.f32 %v217_v22, %v201_v18 }
  0xdc   :  { %v163_v13 = vpop.f32.mrf.mxu1 }
  0xdd   :  { %v202_v15 = vmax.f32 %v172_v11, 0.0  ;;  %v164_v17 = vadd.f32 %v709_v27, %v163_v13  ;;  %558 = vmatprep.mubr.msk.bf16.mxu1 %vm69_vm0, %v241_v10  ;;  %v231_v26 = vadd.f32 %v215_v19, %v199_v14 }
  0xde   :  { %v550_v21 = vpop.f32.mrf.mxu1  ;;  %559 = vmatmul.mubr.msk.bf16.gmra.mxu1 %vm69_vm0, %v242_v12 }
  0xdf   :  { %v200_v23 = vmax.f32 %v164_v17, 0.0  ;;  %v234_v24 = vadd.f32 %v218_v16, %v202_v15  ;;  %v185_v31 = vadd.f32 %v550_v21, %v709_v27 }
  0xe0   :  { %v176_v25 = vpop.f32.mrf.mxu1 }
  0xe1   :  { %v232_v28 = vadd.f32 %v216_v20, %v200_v23  ;;  %v177_v29 = vadd.f32 %v709_v27, %v176_v25  ;;  %v244_v35 = vpack.c.bf16 %v234_v24, %v233_v30  ;;  %v205_v41 = vmax.f32 %v185_v31, 0.0 }
  0xe2   :  { %v551_v32 = vpop.f32.mrf.mxu1 }
  0xe3   :  { %v243_v33 = vpack.c.bf16 %v232_v28, %v231_v26  ;;  %v188_v34 = vadd.f32 %v551_v32, %v709_v27  ;;  %v203_v37 = vmax.f32 %v177_v29, 0.0  ;;  %v237_v48 = vadd.f32 %v221_v44, %v205_v41 }
  0xe4   :  { %v179_v36 = vpop.f32.mrf.mxu1 }
  0xe5   :  { %v206_v38 = vmax.f32 %v188_v34, 0.0  ;;  %v180_v40 = vadd.f32 %v709_v27, %v179_v36  ;;  %562 = vmatprep.mubr.msk.bf16.mxu1 %vm69_vm0, %v243_v33  ;;  %v235_v27 = vadd.f32 %v219_v42, %v203_v37 }
  0xe6   :  { %563 = vmatmul.mubr.msk.bf16.gmra.mxu1 %vm69_vm0, %v244_v35 }
  0xe7   :  { %v204_v45 = vmax.f32 %v180_v40, 0.0  ;;  %v238_v46 = vadd.f32 %v222_v39, %v206_v38 }
  0xe9   :  { %v236_v47 = vadd.f32 %v220_v43, %v204_v45  ;;  %v246_v50 = vpack.c.bf16 %v238_v46, %v237_v48 }
  0xeb   :  { %v245_v49 = vpack.c.bf16 %v236_v47, %v235_v27 }
  0xed   :  { %566 = vmatprep.mubr.msk.bf16.mxu1 %vm69_vm0, %v245_v49 }
  0xee   :  { %567 = vmatmul.mubr.msk.bf16.gmra.mxu1 %vm69_vm0, %v246_v50 }
 0x196   :  { %v556_v54 = vpop.f32.mrf.mxu1 }
 0x197   :  { %v329_v57 = vadd.f32 %v556_v54, %v791_v55 }
 0x198   :  { %v320_v56 = vpop.f32.mrf.mxu1 }
 0x199   :  { %v321_v59 = vadd.f32 %v791_v55, %v320_v56  ;;  %v385_v62 = vmax.f32 %v329_v57, 0.0  ;;  %v399_v56 = vld [vmem:[%s838_s6] sm:$0x1]  ;;  %v412_v57 = vpop.permute.xlu0 %411 }
 0x19a   :  { %v557_v58 = vpop.f32.mrf.mxu1 }
 0x19b   :  { %v332_v60 = vadd.f32 %v557_v58, %v791_v55  ;;  %v383_v2 = vmax.f32 %v321_v59, 0.0 }
 0x19c   :  { %v323_v61 = vpop.f32.mrf.mxu1 }
 0x19d   :  { %v386_v63 = vmax.f32 %v332_v60, 0.0  ;;  %v324_v0 = vadd.f32 %v791_v55, %v323_v61 }
 0x19e   :  { %v560_v1 = vpop.f32.mrf.mxu1 }
 0x19f   :  { %v401_v3 = vpack.c.bf16 %v386_v63, %v385_v62  ;;  %v384_v4 = vmax.f32 %v324_v0, 0.0  ;;  %v345_v42 = vadd.f32 %v560_v1, %v791_v55 }
 0x1a0   :  { %v336_v5 = vpop.f32.mrf.mxu1 }
 0x1a1   :  { %v400_v6 = vpack.c.bf16 %v384_v4, %v383_v2  ;;  %v389_v45 = vmax.f32 %v345_v42, 0.0  ;;  %v337_v47 = vadd.f32 %v791_v55, %v336_v5  ;;  %v421_v54 = vsel %vm69_vm0, %v401_v3, 0 }
 0x1a2   :  { %v561_v7 = vpop.f32.mrf.mxu1 }
 0x1a3   :  { %v348_v40 = vadd.f32 %v561_v7, %v791_v55  ;;  %v387_v50 = vmax.f32 %v337_v47, 0.0 }
 0x1a4   :  { %v339_v8 = vpop.f32.mrf.mxu1 }
 0x1a5   :  { %v390_v43 = vmax.f32 %v348_v40, 0.0  ;;  %v340_v27 = vadd.f32 %v791_v55, %v339_v8 }
 0x1a6   :  { %v564_v9 = vpop.f32.mrf.mxu1 }
 0x1a7   :  { %v361_v30 = vadd.f32 %v564_v9, %v791_v55  ;;  %v403_v46 = vpack.c.bf16 %v390_v43, %v389_v45  ;;  %v388_v48 = vmax.f32 %v340_v27, 0.0 }
 0x1a8   :  { %v352_v10 = vpop.f32.mrf.mxu1 }
 0x1a9   :  { %v393_v33 = vmax.f32 %v361_v30, 0.0  ;;  %v353_v36 = vadd.f32 %v791_v55, %v352_v10  ;;  %v427_v49 = vsel %vm69_vm0, %v403_v46, 0  ;;  %v402_v52 = vpack.c.bf16 %v388_v48, %v387_v50 }
 0x1aa   :  { %v565_v11 = vpop.f32.mrf.mxu1 }
 0x1ab   :  { %v364_v28 = vadd.f32 %v565_v11, %v791_v55  ;;  %v391_v39 = vmax.f32 %v353_v36, 0.0  ;;  %v424_v53 = vsel %vm69_vm0, %v402_v52, 0 }
 0x1ac   :  { %v355_v12 = vpop.f32.mrf.mxu1 }
 0x1ad   :  { %v394_v31 = vmax.f32 %v364_v28, 0.0  ;;  %v356_v35 = vadd.f32 %v791_v55, %v355_v12 }
 0x1ae   :  { %v568_v13 = vpop.f32.mrf.mxu1 }
 0x1af   :  { %v377_v15 = vadd.f32 %v568_v13, %v791_v55  ;;  %v405_v34 = vpack.c.bf16 %v394_v31, %v393_v33  ;;  %v392_v37 = vmax.f32 %v356_v35, 0.0 }
 0x1b0   :  { %v368_v14 = vpop.f32.mrf.mxu1 }
 0x1b1   :  { %v397_v19 = vmax.f32 %v377_v15, 0.0  ;;  %v369_v22 = vadd.f32 %v791_v55, %v368_v14  ;;  %v433_v38 = vsel %vm69_vm0, %v405_v34, 0  ;;  %v404_v41 = vpack.c.bf16 %v392_v37, %v391_v39 }
 0x1b2   :  { %v569_v16 = vpop.f32.mrf.mxu1 }
 0x1b3   :  { %v380_v17 = vadd.f32 %v569_v16, %v791_v55  ;;  %v395_v26 = vmax.f32 %v369_v22, 0.0  ;;  %v430_v44 = vsel %vm69_vm0, %v404_v41, 0 }
 0x1b4   :  { %v371_v18 = vpop.f32.mrf.mxu1 }
 0x1b5   :  { %v398_v20 = vmax.f32 %v380_v17, 0.0  ;;  %v372_v21 = vadd.f32 %v791_v55, %v371_v18  ;;  %v418_v55 = vsel %vm69_vm0, %v400_v6, 0 }
 0x1b7   :  { %v407_v23 = vpack.c.bf16 %v398_v20, %v397_v19  ;;  %v396_v24 = vmax.f32 %v372_v21, 0.0 }
 0x1b9   :  { %v439_v25 = vsel %vm69_vm0, %v407_v23, 0  ;;  %v406_v29 = vpack.c.bf16 %v396_v24, %v395_v26 }
 0x1ba   :  { %571 = vmatpush3.bf16.xpose.msra.mxu0 %v439_v25 }
 0x1bb   :  { %572 = vmatprep.subr.bf16.mxu0 %v596_v51  ;;  %v436_v32 = vsel %vm69_vm0, %v406_v29, 0 }
 0x1c2   :  { %573 = vmatpush3.bf16.xpose.msra.mxu0 %v436_v32 }
 0x1c3   :  { %574 = vmatprep.subr.bf16.mxu0 %v596_v51 }
 0x1ca   :  { %575 = vmatpush3.bf16.xpose.msra.mxu0 %v433_v38 }
 0x1cb   :  { %576 = vmatprep.subr.bf16.mxu0 %v596_v51 }
 0x1d2   :  { %577 = vmatpush3.bf16.xpose.msra.mxu0 %v430_v44 }
 0x1d3   :  { %578 = vmatprep.subr.bf16.mxu0 %v596_v51 }
 0x1da   :  { %579 = vmatpush3.bf16.xpose.msra.mxu0 %v427_v49 }
 0x1db   :  { %580 = vmatprep.subr.bf16.mxu0 %v596_v51 }
 0x1e2   :  { %581 = vmatpush3.bf16.xpose.msra.mxu0 %v424_v53 }
 0x1e3   :  { %582 = vmatprep.subr.bf16.mxu0 %v596_v51 }
 0x1ea   :  { %583 = vmatpush3.bf16.xpose.msra.mxu0 %v421_v54 }
 0x1eb   :  { %584 = vmatprep.subr.bf16.mxu0 %v596_v51 }
 0x1f2   :  { %585 = vmatpush3.bf16.xpose.msra.mxu0 %v418_v55 }
 0x1f9   :  { %587 = vmatmul.mubr.msk.bf16.vlgmr.msra.gmra.mxu0 %vm69_vm0, %v399_v56 }
 0x2b9   :  { %v475_v58 = vpop.f32.mrf.mxu0 }
 0x2ba   :  { %v476_v59 = vadd.f32 %v475_v58, %v412_v57 }
 0x2bb   :  { %v588_v60 = vpop.f32.mrf.mxu0 }
 0x2bc   :  { %481 = vst [vmem:[%s839_s8] sm:$0x3] %v476_v59 }
 0x2bd   :  { %v478_v61 = vpop.f32.mrf.mxu0 }
 0x2bf   :  { %v589_v62 = vpop.f32.mrf.mxu0 }

</bundles_post_ra>
